<compile_context>
chip_gen: v6e
topology: v6e:2x2x1
jax: 0.10.0
libtpu: 0.0.40
codegen_flags: <defaults>
</compile_context>

<pallas_src>
import math

import jax
import jax.numpy as jnp
from jax.experimental import pallas as pl
from jax.experimental.pallas import tpu as pltpu

# ---------------- model hyper-params (small, synthetic, lane-dense) ----------
B = 2              # batch
S = 8              # sequence length (MAX_STRING_LEN analogue, shrunk)
H = 128            # hidden width (CLASSIFICATION_LAYER_WIDTH analogue, shrunk
                   # to one 128-lane vreg width so every tensor is lane-dense)
NUM_HEADS = 2
HEAD_DIM = H // NUM_HEADS
FFN = 4 * H        # 512
NUM_LAYERS = 2
NUM_CLASSES = 2    # len(['0', '1'])
VOCAB = 128
LN_EPS = 1e-12     # BERT layer-norm eps
M = B * S          # rows of the [B*S, H] hidden-state slab


# ---------------- shared math helpers (usable in-kernel and in reference) ----
def _layer_norm(x, gamma, beta):
    mean = jnp.mean(x, axis=-1, keepdims=True)
    var = jnp.mean(jnp.square(x - mean), axis=-1, keepdims=True)
    return (x - mean) * jax.lax.rsqrt(var + LN_EPS) * gamma + beta


# ---------------- Pallas kernels ---------------------------------------------
def _embed_layernorm_kernel(x_ref, g_ref, b_ref, o_ref):
    o_ref[...] = _layer_norm(x_ref[...], g_ref[...], b_ref[...]).astype(o_ref.dtype)


def _encoder_layer_kernel(x_ref, mb_ref, wqkv_ref, bqkv_ref, wo_ref, bo_ref,
                          ln1g_ref, ln1b_ref, w1_ref, b1_ref, w2_ref, b2_ref,
                          ln2g_ref, ln2b_ref, o_ref, ctx_ref):
    """One full transformer encoder layer, fully fused, activations VMEM-resident."""
    x = x_ref[...]                                   # [M, H] f32 residual stream
    mb = mb_ref[...]                                 # [B, S] f32 additive key-mask bias

    # ---- fused QKV projection: one bf16 MXU pass over [H, 3H] ----
    qkv = jnp.dot(x.astype(jnp.bfloat16), wqkv_ref[...],
                  preferred_element_type=jnp.float32) + bqkv_ref[...]
    q = qkv[:, 0 * H:1 * H]
    k = qkv[:, 1 * H:2 * H]
    v = qkv[:, 2 * H:3 * H]

    # ---- multi-head self-attention (B * NUM_HEADS = 4 tiny unrolled steps) ----
    scale = 1.0 / math.sqrt(HEAD_DIM)
    for b in range(B):
        rows = slice(b * S, (b + 1) * S)
        mb_b = mb[b:b + 1, :]                        # [1, S] bias over keys
        for h in range(NUM_HEADS):
            cols = slice(h * HEAD_DIM, (h + 1) * HEAD_DIM)
            qbh = q[rows, cols].astype(jnp.bfloat16)   # [S, hd]
            kbh = k[rows, cols].astype(jnp.bfloat16)
            vbh = v[rows, cols].astype(jnp.bfloat16)
            # q @ k^T without an explicit transpose (contract both on head_dim)
            s = jax.lax.dot_general(qbh, kbh, (((1,), (1,)), ((), ())),
                                    preferred_element_type=jnp.float32)
            s = s * scale + mb_b                       # [S, S]
            s_max = jnp.max(s, axis=-1, keepdims=True)
            e = jnp.exp(s - s_max)
            denom = jnp.sum(e, axis=-1, keepdims=True)
            p = e * pl.reciprocal(denom, approx=True)  # EUP reciprocal (free slot)
            ctx_ref[rows, cols] = jnp.dot(p.astype(jnp.bfloat16), vbh,
                                          preferred_element_type=jnp.float32)

    # ---- output projection + residual + layer-norm ----
    attn_out = jnp.dot(ctx_ref[...].astype(jnp.bfloat16), wo_ref[...],
                       preferred_element_type=jnp.float32) + bo_ref[...]
    x = _layer_norm(attn_out + x, ln1g_ref[...], ln1b_ref[...])

    # ---- FFN (GELU) + residual + layer-norm ----
    h1 = jnp.dot(x.astype(jnp.bfloat16), w1_ref[...],
                 preferred_element_type=jnp.float32) + b1_ref[...]
    # TODO(synk): HF BERT uses exact erf-GELU; erf has no guaranteed Mosaic
    # lowering, so the tanh approximation is used (tiny numeric drift).
    h1 = jax.nn.gelu(h1)
    ffn_out = jnp.dot(h1.astype(jnp.bfloat16), w2_ref[...],
                      preferred_element_type=jnp.float32) + b2_ref[...]
    x = _layer_norm(ffn_out + x, ln2g_ref[...], ln2b_ref[...])

    o_ref[...] = x.astype(o_ref.dtype)


def _classifier_kernel(x_ref, w_ref, b_ref, o_ref):
    y = jnp.dot(x_ref[...].astype(jnp.bfloat16), w_ref[...],
                preferred_element_type=jnp.float32)
    o_ref[...] = (y + b_ref[...]).astype(o_ref.dtype)


# ---------------- thin wrappers around pallas_call ----------------------------
def _full_spec(shape):
    n = len(shape)
    return pl.BlockSpec(shape, lambda i, _n=n: (0,) * _n)


def embed_layernorm(x, gamma, beta):
    return pl.pallas_call(
        _embed_layernorm_kernel,
        grid=(1,),
        out_shape=jax.ShapeDtypeStruct(x.shape, jnp.float32),
        in_specs=[_full_spec(x.shape), _full_spec(gamma.shape), _full_spec(beta.shape)],
        out_specs=_full_spec(x.shape),
    )(x, gamma, beta)


def fused_encoder_layer(x, mask_bias, p):
    args = (x, mask_bias, p["wqkv"], p["bqkv"], p["wo"], p["bo"],
            p["ln1_g"], p["ln1_b"], p["w1"], p["b1"], p["w2"], p["b2"],
            p["ln2_g"], p["ln2_b"])
    return pl.pallas_call(
        _encoder_layer_kernel,
        grid=(1,),
        out_shape=jax.ShapeDtypeStruct((M, H), jnp.float32),
        in_specs=[_full_spec(a.shape) for a in args],
        out_specs=_full_spec((M, H)),
        scratch_shapes=[pltpu.VMEM((M, H), jnp.float32)],   # attention context
        compiler_params=pltpu.CompilerParams(
            dimension_semantics=("arbitrary",)),
    )(*args)


def classifier_head(pooled, w, b):
    return pl.pallas_call(
        _classifier_kernel,
        grid=(1,),
        out_shape=jax.ShapeDtypeStruct((B, NUM_CLASSES), jnp.float32),
        in_specs=[_full_spec(pooled.shape), _full_spec(w.shape), _full_spec(b.shape)],
        out_specs=_full_spec((B, NUM_CLASSES)),
    )(pooled, w, b)


# ---------------- parameter construction (deterministic, synthetic) -----------
def init_params(key):
    def nrm(k, shape, scale=0.02, dtype=jnp.float32):
        return (scale * jax.random.normal(k, shape, dtype=jnp.float32)).astype(dtype)

    keys = jax.random.split(key, 5 + NUM_LAYERS)
    params = {
        "word_emb": nrm(keys[0], (VOCAB, H)),
        "pos_emb": nrm(keys[1], (S, H)),
        "type_emb": nrm(keys[2], (2, H)),
        "emb_ln_g": jnp.ones((1, H), jnp.float32),
        "emb_ln_b": jnp.zeros((1, H), jnp.float32),
        "cls_w": nrm(keys[3], (H, NUM_CLASSES), dtype=jnp.bfloat16),
        "cls_b": nrm(keys[4], (1, NUM_CLASSES)),
        "layers": [],
    }
    for li in range(NUM_LAYERS):
        lk = jax.random.split(keys[5 + li], 10)
        wq, wk, wv = nrm(lk[0], (H, H)), nrm(lk[1], (H, H)), nrm(lk[2], (H, H))
        params["layers"].append({
            # fused QKV weight: one [H, 3H] bf16 matmul instead of three [H, H]
            "wqkv": jnp.concatenate([wq, wk, wv], axis=1).astype(jnp.bfloat16),
            "bqkv": nrm(lk[3], (1, 3 * H)),
            "wo": nrm(lk[4], (H, H), dtype=jnp.bfloat16),
            "bo": nrm(lk[5], (1, H)),
            "w1": nrm(lk[6], (H, FFN), dtype=jnp.bfloat16),
            "b1": nrm(lk[7], (1, FFN)),
            "w2": nrm(lk[8], (FFN, H), dtype=jnp.bfloat16),
            "b2": nrm(lk[9], (1, H)),
            "ln1_g": jnp.ones((1, H), jnp.float32), "ln1_b": jnp.zeros((1, H), jnp.float32),
            "ln2_g": jnp.ones((1, H), jnp.float32), "ln2_b": jnp.zeros((1, H), jnp.float32),
        })
    return params


# ---------------- forward pass -------------------------------------------------
def bert_classifier_forward(params, input_ids, attention_mask):
    # Embedding-table gathers stay in plain JAX (tiny, data-dependent glue).
    word = params["word_emb"][input_ids]                     # [B, S, H]
    pos = params["pos_emb"]                                  # [S, H]
    tok = params["type_emb"][0]                              # [H] (token_type_ids == 0)
    emb = (word + pos[None, :, :] + tok[None, None, :]).reshape(M, H)
    x = embed_layernorm(emb, params["emb_ln_g"], params["emb_ln_b"])

    # BERT-style additive attention mask: 0 for valid tokens, -10000 for pad.
    mask_bias = (1.0 - attention_mask.astype(jnp.float32)) * -10000.0   # [B, S]

    for p in params["layers"]:
        x = fused_encoder_layer(x, mask_bias, p)

    pooled = x.reshape(B, S, H)[:, 0]                        # CLS token, [B, H]
    return classifier_head(pooled, params["cls_w"], params["cls_b"])    # [B, C]


# ---------------- pure-JAX reference (for correctness check) -------------------
def reference_forward(params, input_ids, attention_mask):
    word = params["word_emb"][input_ids]
    x = (word + params["pos_emb"][None, :, :]
         + params["type_emb"][0][None, None, :]).reshape(M, H)
    x = _layer_norm(x, params["emb_ln_g"], params["emb_ln_b"])
    mb = (1.0 - attention_mask.astype(jnp.float32)) * -10000.0
    for p in params["layers"]:
        qkv = x @ p["wqkv"].astype(jnp.float32) + p["bqkv"]
        q, k, v = jnp.split(qkv, 3, axis=1)

        def heads(t):
            return t.reshape(B, S, NUM_HEADS, HEAD_DIM).transpose(0, 2, 1, 3)

        qh, kh, vh = heads(q), heads(k), heads(v)
        s = jnp.einsum("bhqd,bhkd->bhqk", qh, kh) / math.sqrt(HEAD_DIM)
        s = s + mb[:, None, None, :]
        pr = jax.nn.softmax(s, axis=-1)
        ctx = jnp.einsum("bhqk,bhkd->bhqd", pr, vh).transpose(0, 2, 1, 3).reshape(M, H)
        attn_out = ctx @ p["wo"].astype(jnp.float32) + p["bo"]
        x = _layer_norm(attn_out + x, p["ln1_g"], p["ln1_b"])
        h1 = jax.nn.gelu(x @ p["w1"].astype(jnp.float32) + p["b1"])
        x = _layer_norm(h1 @ p["w2"].astype(jnp.float32) + p["b2"] + x,
                        p["ln2_g"], p["ln2_b"])
    pooled = x.reshape(B, S, H)[:, 0]
    return pooled @ params["cls_w"].astype(jnp.float32) + params["cls_b"]


# TODO(synk): tokenizer / Prepare Dataset / DataLoader / sklearn metrics from the
# original module are host-side preprocessing with no Pallas equivalent; omitted.

if __name__ == "__main__":
    key = jax.random.PRNGKey(0)
    pkey, ikey = jax.random.split(key)
    params = init_params(pkey)

    input_ids = jax.random.randint(ikey, (B, S), 0, VOCAB, dtype=jnp.int32)
    # last two positions of batch element 1 are padding
    attention_mask = jnp.array([[1] * S, [1] * (S - 2) + [0, 0]], dtype=jnp.int32)

    fwd = jax.jit(bert_classifier_forward)
    logits = jax.block_until_ready(fwd(params, input_ids, attention_mask))

    assert logits.shape == (B, NUM_CLASSES)
    assert bool(jnp.all(jnp.isfinite(logits)))

    ref = reference_forward(params, input_ids, attention_mask)
    max_err = float(jnp.max(jnp.abs(logits - ref)))
    assert max_err < 5e-2, f"kernel/reference mismatch: {max_err}"
    print("KERNEL_OK")
</pallas_src>

<mosaic_0001>
module attributes {stable_mosaic.version = 11 : i64} {
  func.func @_embed_layernorm_kernel(%arg0: i32, %arg1: memref<16x128xf32, #tpu.memory_space<vmem>>, %arg2: memref<1x128xf32, #tpu.memory_space<vmem>>, %arg3: memref<1x128xf32, #tpu.memory_space<vmem>>, %arg4: memref<16x128xf32, #tpu.memory_space<vmem>>) attributes {dimension_semantics = [#tpu.dimension_semantics<arbitrary>], iteration_bounds = array<i64: 1>, scalar_prefetch = 0 : i64, scratch_operands = 0 : i64, tpu.core_type = #tpu.core_type<tc>, window_params = [{pipeline_mode = #tpu.pipeline_mode<synchronous>, transform_indices = @transform_0, window_bounds = array<i64: 16, 128>}, {pipeline_mode = #tpu.pipeline_mode<synchronous>, transform_indices = @transform_1, window_bounds = array<i64: 1, 128>}, {pipeline_mode = #tpu.pipeline_mode<synchronous>, transform_indices = @transform_2, window_bounds = array<i64: 1, 128>}, {pipeline_mode = #tpu.pipeline_mode<synchronous>, transform_indices = @transform_3, window_bounds = array<i64: 16, 128>}]} {
    %c0 = arith.constant 0 : index
    %c0_0 = arith.constant 0 : index
    %0 = vector.load %arg1[%c0, %c0_0] : memref<16x128xf32, #tpu.memory_space<vmem>>, vector<16x128xf32>
    %c0_1 = arith.constant 0 : index
    %c0_2 = arith.constant 0 : index
    %1 = vector.load %arg2[%c0_1, %c0_2] : memref<1x128xf32, #tpu.memory_space<vmem>>, vector<1x128xf32>
    %c0_3 = arith.constant 0 : index
    %c0_4 = arith.constant 0 : index
    %2 = vector.load %arg3[%c0_3, %c0_4] : memref<1x128xf32, #tpu.memory_space<vmem>>, vector<1x128xf32>
    %cst = arith.constant dense<0.000000e+00> : vector<16xf32>
    %3 = vector.multi_reduction <add>, %0, %cst [1] : vector<16x128xf32> to vector<16xf32>
    %4 = vector.shape_cast %3 : vector<16xf32> to vector<16x1xf32>
    %cst_5 = arith.constant 1.280000e+02 : f32
    %5 = vector.broadcast %cst_5 : f32 to vector<16x1xf32>
    %6 = arith.divf %4, %5 : vector<16x1xf32>
    %7 = vector.broadcast %6 : vector<16x1xf32> to vector<16x128xf32>
    %8 = arith.subf %0, %7 : vector<16x128xf32>
    %9 = arith.mulf %8, %8 : vector<16x128xf32>
    %cst_6 = arith.constant dense<0.000000e+00> : vector<16xf32>
    %10 = vector.multi_reduction <add>, %9, %cst_6 [1] : vector<16x128xf32> to vector<16xf32>
    %11 = vector.shape_cast %10 : vector<16xf32> to vector<16x1xf32>
    %cst_7 = arith.constant 1.280000e+02 : f32
    %12 = vector.broadcast %cst_7 : f32 to vector<16x1xf32>
    %13 = arith.divf %11, %12 : vector<16x1xf32>
    %14 = vector.broadcast %6 : vector<16x1xf32> to vector<16x128xf32>
    %15 = arith.subf %0, %14 : vector<16x128xf32>
    %cst_8 = arith.constant 9.99999996E-13 : f32
    %16 = vector.broadcast %cst_8 : f32 to vector<16x1xf32>
    %17 = arith.addf %13, %16 : vector<16x1xf32>
    %18 = math.rsqrt %17 : vector<16x1xf32>
    %19 = vector.broadcast %18 : vector<16x1xf32> to vector<16x128xf32>
    %20 = arith.mulf %15, %19 : vector<16x128xf32>
    %21 = vector.broadcast %1 : vector<1x128xf32> to vector<16x128xf32>
    %22 = arith.mulf %20, %21 : vector<16x128xf32>
    %23 = vector.broadcast %2 : vector<1x128xf32> to vector<16x128xf32>
    %24 = arith.addf %22, %23 : vector<16x128xf32>
    %c0_9 = arith.constant 0 : index
    %c0_10 = arith.constant 0 : index
    %25 = vector.load %arg4[%c0_9, %c0_10] : memref<16x128xf32, #tpu.memory_space<vmem>>, vector<16x128xf32>
    tpu.vector_store %arg4[%c0_9, %c0_10], %24 {strides = array<i32>} : memref<16x128xf32, #tpu.memory_space<vmem>>, vector<16x128xf32>,
    return
  }
  func.func @transform_0(%arg0: i32) -> (i32, i32) {
    %c0_i32 = arith.constant 0 : i32
    %c0_i32_0 = arith.constant 0 : i32
    %c0_i32_1 = arith.constant 0 : i32
    return %c0_i32, %c0_i32_0 : i32, i32
  }
  func.func @transform_1(%arg0: i32) -> (i32, i32) {
    %c0_i32 = arith.constant 0 : i32
    %c0_i32_0 = arith.constant 0 : i32
    %c0_i32_1 = arith.constant 0 : i32
    return %c0_i32, %c0_i32_0 : i32, i32
  }
  func.func @transform_2(%arg0: i32) -> (i32, i32) {
    %c0_i32 = arith.constant 0 : i32
    %c0_i32_0 = arith.constant 0 : i32
    %c0_i32_1 = arith.constant 0 : i32
    return %c0_i32, %c0_i32_0 : i32, i32
  }
  func.func @transform_3(%arg0: i32) -> (i32, i32) {
    %c0_i32 = arith.constant 0 : i32
    %c0_i32_0 = arith.constant 0 : i32
    %c0_i32_1 = arith.constant 0 : i32
    return %c0_i32, %c0_i32_0 : i32, i32
  }
}

module attributes {stable_mosaic.version = 11 : i64} {
  func.func @_encoder_layer_kernel(%arg0: i32, %arg1: memref<16x128xf32, #tpu.memory_space<vmem>>, %arg2: memref<2x8xf32, #tpu.memory_space<vmem>>, %arg3: memref<128x384xbf16, #tpu.memory_space<vmem>>, %arg4: memref<1x384xf32, #tpu.memory_space<vmem>>, %arg5: memref<128x128xbf16, #tpu.memory_space<vmem>>, %arg6: memref<1x128xf32, #tpu.memory_space<vmem>>, %arg7: memref<1x128xf32, #tpu.memory_space<vmem>>, %arg8: memref<1x128xf32, #tpu.memory_space<vmem>>, %arg9: memref<128x512xbf16, #tpu.memory_space<vmem>>, %arg10: memref<1x512xf32, #tpu.memory_space<vmem>>, %arg11: memref<512x128xbf16, #tpu.memory_space<vmem>>, %arg12: memref<1x128xf32, #tpu.memory_space<vmem>>, %arg13: memref<1x128xf32, #tpu.memory_space<vmem>>, %arg14: memref<1x128xf32, #tpu.memory_space<vmem>>, %arg15: memref<16x128xf32, #tpu.memory_space<vmem>>, %arg16: memref<16x128xf32, #tpu.memory_space<vmem>>) attributes {dimension_semantics = [#tpu.dimension_semantics<arbitrary>], iteration_bounds = array<i64: 1>, scalar_prefetch = 0 : i64, scratch_operands = 1 : i64, tpu.core_type = #tpu.core_type<tc>, window_params = [{pipeline_mode = #tpu.pipeline_mode<synchronous>, transform_indices = @transform_0, window_bounds = array<i64: 16, 128>}, {pipeline_mode = #tpu.pipeline_mode<synchronous>, transform_indices = @transform_1, window_bounds = array<i64: 2, 8>}, {pipeline_mode = #tpu.pipeline_mode<synchronous>, transform_indices = @transform_2, window_bounds = array<i64: 128, 384>}, {pipeline_mode = #tpu.pipeline_mode<synchronous>, transform_indices = @transform_3, window_bounds = array<i64: 1, 384>}, {pipeline_mode = #tpu.pipeline_mode<synchronous>, transform_indices = @transform_4, window_bounds = array<i64: 128, 128>}, {pipeline_mode = #tpu.pipeline_mode<synchronous>, transform_indices = @transform_5, window_bounds = array<i64: 1, 128>}, {pipeline_mode = #tpu.pipeline_mode<synchronous>, transform_indices = @transform_6, window_bounds = array<i64: 1, 128>}, {pipeline_mode = #tpu.pipeline_mode<synchronous>, transform_indices = @transform_7, window_bounds = array<i64: 1, 128>}, {pipeline_mode = #tpu.pipeline_mode<synchronous>, transform_indices = @transform_8, window_bounds = array<i64: 128, 512>}, {pipeline_mode = #tpu.pipeline_mode<synchronous>, transform_indices = @transform_9, window_bounds = array<i64: 1, 512>}, {pipeline_mode = #tpu.pipeline_mode<synchronous>, transform_indices = @transform_10, window_bounds = array<i64: 512, 128>}, {pipeline_mode = #tpu.pipeline_mode<synchronous>, transform_indices = @transform_11, window_bounds = array<i64: 1, 128>}, {pipeline_mode = #tpu.pipeline_mode<synchronous>, transform_indices = @transform_12, window_bounds = array<i64: 1, 128>}, {pipeline_mode = #tpu.pipeline_mode<synchronous>, transform_indices = @transform_13, window_bounds = array<i64: 1, 128>}, {pipeline_mode = #tpu.pipeline_mode<synchronous>, transform_indices = @transform_14, window_bounds = array<i64: 16, 128>}]} {
    %c0 = arith.constant 0 : index
    %c0_0 = arith.constant 0 : index
    %0 = vector.load %arg1[%c0, %c0_0] : memref<16x128xf32, #tpu.memory_space<vmem>>, vector<16x128xf32>
    %c0_1 = arith.constant 0 : index
    %c0_2 = arith.constant 0 : index
    %1 = vector.load %arg2[%c0_1, %c0_2] : memref<2x8xf32, #tpu.memory_space<vmem>>, vector<2x8xf32>
    %2 = arith.truncf %0 : vector<16x128xf32> to vector<16x128xbf16>
    %c0_3 = arith.constant 0 : index
    %c0_4 = arith.constant 0 : index
    %3 = vector.load %arg3[%c0_3, %c0_4] : memref<128x384xbf16, #tpu.memory_space<vmem>>, vector<128x384xbf16>
    %cst = arith.constant dense<0.000000e+00> : vector<16x384xf32>
    %4 = tpu.matmul %2, %3, %cst {dimension_numbers = #tpu.dot_dimension_numbers<[1], [0], [0], [1], [0, 0, 1, 1], [], []>} : vector<16x128xbf16>, vector<128x384xbf16>, vector<16x384xf32> -> vector<16x384xf32>
    %c0_5 = arith.constant 0 : index
    %c0_6 = arith.constant 0 : index
    %5 = vector.load %arg4[%c0_5, %c0_6] : memref<1x384xf32, #tpu.memory_space<vmem>>, vector<1x384xf32>
    %6 = vector.broadcast %5 : vector<1x384xf32> to vector<16x384xf32>
    %7 = arith.addf %4, %6 : vector<16x384xf32>
    %8 = vector.extract_strided_slice %7 {offsets = [0, 0], sizes = [16, 128], strides = [1, 1]} : vector<16x384xf32> to vector<16x128xf32>
    %9 = vector.extract_strided_slice %7 {offsets = [0, 128], sizes = [16, 128], strides = [1, 1]} : vector<16x384xf32> to vector<16x128xf32>
    %10 = vector.extract_strided_slice %7 {offsets = [0, 256], sizes = [16, 128], strides = [1, 1]} : vector<16x384xf32> to vector<16x128xf32>
    %11 = vector.extract_strided_slice %1 {offsets = [0, 0], sizes = [1, 8], strides = [1, 1]} : vector<2x8xf32> to vector<1x8xf32>
    %12 = vector.extract_strided_slice %8 {offsets = [0, 0], sizes = [8, 64], strides = [1, 1]} : vector<16x128xf32> to vector<8x64xf32>
    %13 = arith.truncf %12 : vector<8x64xf32> to vector<8x64xbf16>
    %14 = vector.extract_strided_slice %9 {offsets = [0, 0], sizes = [8, 64], strides = [1, 1]} : vector<16x128xf32> to vector<8x64xf32>
    %15 = arith.truncf %14 : vector<8x64xf32> to vector<8x64xbf16>
    %16 = vector.extract_strided_slice %10 {offsets = [0, 0], sizes = [8, 64], strides = [1, 1]} : vector<16x128xf32> to vector<8x64xf32>
    %17 = arith.truncf %16 : vector<8x64xf32> to vector<8x64xbf16>
    %cst_7 = arith.constant dense<0.000000e+00> : vector<8x8xf32>
    %18 = tpu.matmul %13, %15, %cst_7 {dimension_numbers = #tpu.dot_dimension_numbers<[1], [1], [0], [0], [0, 0, 1, 0], [], []>} : vector<8x64xbf16>, vector<8x64xbf16>, vector<8x8xf32> -> vector<8x8xf32>
    %cst_8 = arith.constant 1.250000e-01 : f32
    %19 = vector.broadcast %cst_8 : f32 to vector<8x8xf32>
    %20 = arith.mulf %18, %19 : vector<8x8xf32>
    %21 = vector.broadcast %11 : vector<1x8xf32> to vector<8x8xf32>
    %22 = arith.addf %20, %21 : vector<8x8xf32>
    %cst_9 = arith.constant dense<0xFF800000> : vector<8xf32>
    %23 = vector.multi_reduction <maximumf>, %22, %cst_9 [1] : vector<8x8xf32> to vector<8xf32>
    %24 = vector.shape_cast %23 : vector<8xf32> to vector<8x1xf32>
    %25 = vector.broadcast %24 : vector<8x1xf32> to vector<8x8xf32>
    %26 = arith.subf %22, %25 : vector<8x8xf32>
    %27 = math.exp %26 : vector<8x8xf32>
    %cst_10 = arith.constant dense<0.000000e+00> : vector<8xf32>
    %28 = vector.multi_reduction <add>, %27, %cst_10 [1] : vector<8x8xf32> to vector<8xf32>
    %29 = vector.shape_cast %28 : vector<8xf32> to vector<8x1xf32>
    %30 = tpu.reciprocal %29 {approx = true} : vector<8x1xf32> -> vector<8x1xf32>
    %31 = vector.broadcast %30 : vector<8x1xf32> to vector<8x8xf32>
    %32 = arith.mulf %27, %31 : vector<8x8xf32>
    %33 = arith.truncf %32 : vector<8x8xf32> to vector<8x8xbf16>
    %cst_11 = arith.constant dense<0.000000e+00> : vector<8x64xf32>
    %34 = tpu.matmul %33, %17, %cst_11 {dimension_numbers = #tpu.dot_dimension_numbers<[1], [0], [0], [1], [0, 0, 1, 1], [], []>} : vector<8x8xbf16>, vector<8x64xbf16>, vector<8x64xf32> -> vector<8x64xf32>
    %c0_12 = arith.constant 0 : index
    %c0_13 = arith.constant 0 : index
    %35 = vector.load %arg16[%c0_12, %c0_13] : memref<16x128xf32, #tpu.memory_space<vmem>>, vector<8x64xf32>
    tpu.vector_store %arg16[%c0_12, %c0_13], %34 {strides = array<i32>} : memref<16x128xf32, #tpu.memory_space<vmem>>, vector<8x64xf32>,
    %36 = vector.extract_strided_slice %8 {offsets = [0, 64], sizes = [8, 64], strides = [1, 1]} : vector<16x128xf32> to vector<8x64xf32>
    %37 = arith.truncf %36 : vector<8x64xf32> to vector<8x64xbf16>
    %38 = vector.extract_strided_slice %9 {offsets = [0, 64], sizes = [8, 64], strides = [1, 1]} : vector<16x128xf32> to vector<8x64xf32>
    %39 = arith.truncf %38 : vector<8x64xf32> to vector<8x64xbf16>
    %40 = vector.extract_strided_slice %10 {offsets = [0, 64], sizes = [8, 64], strides = [1, 1]} : vector<16x128xf32> to vector<8x64xf32>
    %41 = arith.truncf %40 : vector<8x64xf32> to vector<8x64xbf16>
    %cst_14 = arith.constant dense<0.000000e+00> : vector<8x8xf32>
    %42 = tpu.matmul %37, %39, %cst_14 {dimension_numbers = #tpu.dot_dimension_numbers<[1], [1], [0], [0], [0, 0, 1, 0], [], []>} : vector<8x64xbf16>, vector<8x64xbf16>, vector<8x8xf32> -> vector<8x8xf32>
    %cst_15 = arith.constant 1.250000e-01 : f32
    %43 = vector.broadcast %cst_15 : f32 to vector<8x8xf32>
    %44 = arith.mulf %42, %43 : vector<8x8xf32>
    %45 = vector.broadcast %11 : vector<1x8xf32> to vector<8x8xf32>
    %46 = arith.addf %44, %45 : vector<8x8xf32>
    %cst_16 = arith.constant dense<0xFF800000> : vector<8xf32>
    %47 = vector.multi_reduction <maximumf>, %46, %cst_16 [1] : vector<8x8xf32> to vector<8xf32>
    %48 = vector.shape_cast %47 : vector<8xf32> to vector<8x1xf32>
    %49 = vector.broadcast %48 : vector<8x1xf32> to vector<8x8xf32>
    %50 = arith.subf %46, %49 : vector<8x8xf32>
    %51 = math.exp %50 : vector<8x8xf32>
    %cst_17 = arith.constant dense<0.000000e+00> : vector<8xf32>
    %52 = vector.multi_reduction <add>, %51, %cst_17 [1] : vector<8x8xf32> to vector<8xf32>
    %53 = vector.shape_cast %52 : vector<8xf32> to vector<8x1xf32>
    %54 = tpu.reciprocal %53 {approx = true} : vector<8x1xf32> -> vector<8x1xf32>
    %55 = vector.broadcast %54 : vector<8x1xf32> to vector<8x8xf32>
    %56 = arith.mulf %51, %55 : vector<8x8xf32>
    %57 = arith.truncf %56 : vector<8x8xf32> to vector<8x8xbf16>
    %cst_18 = arith.constant dense<0.000000e+00> : vector<8x64xf32>
    %58 = tpu.matmul %57, %41, %cst_18 {dimension_numbers = #tpu.dot_dimension_numbers<[1], [0], [0], [1], [0, 0, 1, 1], [], []>} : vector<8x8xbf16>, vector<8x64xbf16>, vector<8x64xf32> -> vector<8x64xf32>
    %c0_19 = arith.constant 0 : index
    %c64 = arith.constant 64 : index
    %59 = vector.load %arg16[%c0_19, %c64] : memref<16x128xf32, #tpu.memory_space<vmem>>, vector<8x64xf32>
    tpu.vector_store %arg16[%c0_19, %c64], %58 {strides = array<i32>} : memref<16x128xf32, #tpu.memory_space<vmem>>, vector<8x64xf32>,
    %60 = vector.extract_strided_slice %1 {offsets = [1, 0], sizes = [1, 8], strides = [1, 1]} : vector<2x8xf32> to vector<1x8xf32>
    %61 = vector.extract_strided_slice %8 {offsets = [8, 0], sizes = [8, 64], strides = [1, 1]} : vector<16x128xf32> to vector<8x64xf32>
    %62 = arith.truncf %61 : vector<8x64xf32> to vector<8x64xbf16>
    %63 = vector.extract_strided_slice %9 {offsets = [8, 0], sizes = [8, 64], strides = [1, 1]} : vector<16x128xf32> to vector<8x64xf32>
    %64 = arith.truncf %63 : vector<8x64xf32> to vector<8x64xbf16>
    %65 = vector.extract_strided_slice %10 {offsets = [8, 0], sizes = [8, 64], strides = [1, 1]} : vector<16x128xf32> to vector<8x64xf32>
    %66 = arith.truncf %65 : vector<8x64xf32> to vector<8x64xbf16>
    %cst_20 = arith.constant dense<0.000000e+00> : vector<8x8xf32>
    %67 = tpu.matmul %62, %64, %cst_20 {dimension_numbers = #tpu.dot_dimension_numbers<[1], [1], [0], [0], [0, 0, 1, 0], [], []>} : vector<8x64xbf16>, vector<8x64xbf16>, vector<8x8xf32> -> vector<8x8xf32>
    %cst_21 = arith.constant 1.250000e-01 : f32
    %68 = vector.broadcast %cst_21 : f32 to vector<8x8xf32>
    %69 = arith.mulf %67, %68 : vector<8x8xf32>
    %70 = vector.broadcast %60 : vector<1x8xf32> to vector<8x8xf32>
    %71 = arith.addf %69, %70 : vector<8x8xf32>
    %cst_22 = arith.constant dense<0xFF800000> : vector<8xf32>
    %72 = vector.multi_reduction <maximumf>, %71, %cst_22 [1] : vector<8x8xf32> to vector<8xf32>
    %73 = vector.shape_cast %72 : vector<8xf32> to vector<8x1xf32>
    %74 = vector.broadcast %73 : vector<8x1xf32> to vector<8x8xf32>
    %75 = arith.subf %71, %74 : vector<8x8xf32>
    %76 = math.exp %75 : vector<8x8xf32>
    %cst_23 = arith.constant dense<0.000000e+00> : vector<8xf32>
    %77 = vector.multi_reduction <add>, %76, %cst_23 [1] : vector<8x8xf32> to vector<8xf32>
    %78 = vector.shape_cast %77 : vector<8xf32> to vector<8x1xf32>
    %79 = tpu.reciprocal %78 {approx = true} : vector<8x1xf32> -> vector<8x1xf32>
    %80 = vector.broadcast %79 : vector<8x1xf32> to vector<8x8xf32>
    %81 = arith.mulf %76, %80 : vector<8x8xf32>
    %82 = arith.truncf %81 : vector<8x8xf32> to vector<8x8xbf16>
    %cst_24 = arith.constant dense<0.000000e+00> : vector<8x64xf32>
    %83 = tpu.matmul %82, %66, %cst_24 {dimension_numbers = #tpu.dot_dimension_numbers<[1], [0], [0], [1], [0, 0, 1, 1], [], []>} : vector<8x8xbf16>, vector<8x64xbf16>, vector<8x64xf32> -> vector<8x64xf32>
    %c8 = arith.constant 8 : index
    %c0_25 = arith.constant 0 : index
    %84 = vector.load %arg16[%c8, %c0_25] : memref<16x128xf32, #tpu.memory_space<vmem>>, vector<8x64xf32>
    tpu.vector_store %arg16[%c8, %c0_25], %83 {strides = array<i32>} : memref<16x128xf32, #tpu.memory_space<vmem>>, vector<8x64xf32>,
    %85 = vector.extract_strided_slice %8 {offsets = [8, 64], sizes = [8, 64], strides = [1, 1]} : vector<16x128xf32> to vector<8x64xf32>
    %86 = arith.truncf %85 : vector<8x64xf32> to vector<8x64xbf16>
    %87 = vector.extract_strided_slice %9 {offsets = [8, 64], sizes = [8, 64], strides = [1, 1]} : vector<16x128xf32> to vector<8x64xf32>
    %88 = arith.truncf %87 : vector<8x64xf32> to vector<8x64xbf16>
    %89 = vector.extract_strided_slice %10 {offsets = [8, 64], sizes = [8, 64], strides = [1, 1]} : vector<16x128xf32> to vector<8x64xf32>
    %90 = arith.truncf %89 : vector<8x64xf32> to vector<8x64xbf16>
    %cst_26 = arith.constant dense<0.000000e+00> : vector<8x8xf32>
    %91 = tpu.matmul %86, %88, %cst_26 {dimension_numbers = #tpu.dot_dimension_numbers<[1], [1], [0], [0], [0, 0, 1, 0], [], []>} : vector<8x64xbf16>, vector<8x64xbf16>, vector<8x8xf32> -> vector<8x8xf32>
    %cst_27 = arith.constant 1.250000e-01 : f32
    %92 = vector.broadcast %cst_27 : f32 to vector<8x8xf32>
    %93 = arith.mulf %91, %92 : vector<8x8xf32>
    %94 = vector.broadcast %60 : vector<1x8xf32> to vector<8x8xf32>
    %95 = arith.addf %93, %94 : vector<8x8xf32>
    %cst_28 = arith.constant dense<0xFF800000> : vector<8xf32>
    %96 = vector.multi_reduction <maximumf>, %95, %cst_28 [1] : vector<8x8xf32> to vector<8xf32>
    %97 = vector.shape_cast %96 : vector<8xf32> to vector<8x1xf32>
    %98 = vector.broadcast %97 : vector<8x1xf32> to vector<8x8xf32>
    %99 = arith.subf %95, %98 : vector<8x8xf32>
    %100 = math.exp %99 : vector<8x8xf32>
    %cst_29 = arith.constant dense<0.000000e+00> : vector<8xf32>
    %101 = vector.multi_reduction <add>, %100, %cst_29 [1] : vector<8x8xf32> to vector<8xf32>
    %102 = vector.shape_cast %101 : vector<8xf32> to vector<8x1xf32>
    %103 = tpu.reciprocal %102 {approx = true} : vector<8x1xf32> -> vector<8x1xf32>
    %104 = vector.broadcast %103 : vector<8x1xf32> to vector<8x8xf32>
    %105 = arith.mulf %100, %104 : vector<8x8xf32>
    %106 = arith.truncf %105 : vector<8x8xf32> to vector<8x8xbf16>
    %cst_30 = arith.constant dense<0.000000e+00> : vector<8x64xf32>
    %107 = tpu.matmul %106, %90, %cst_30 {dimension_numbers = #tpu.dot_dimension_numbers<[1], [0], [0], [1], [0, 0, 1, 1], [], []>} : vector<8x8xbf16>, vector<8x64xbf16>, vector<8x64xf32> -> vector<8x64xf32>
    %c8_31 = arith.constant 8 : index
    %c64_32 = arith.constant 64 : index
    %108 = vector.load %arg16[%c8_31, %c64_32] : memref<16x128xf32, #tpu.memory_space<vmem>>, vector<8x64xf32>
    tpu.vector_store %arg16[%c8_31, %c64_32], %107 {strides = array<i32>} : memref<16x128xf32, #tpu.memory_space<vmem>>, vector<8x64xf32>,
    %c0_33 = arith.constant 0 : index
    %c0_34 = arith.constant 0 : index
    %109 = vector.load %arg16[%c0_33, %c0_34] : memref<16x128xf32, #tpu.memory_space<vmem>>, vector<16x128xf32>
    %110 = arith.truncf %109 : vector<16x128xf32> to vector<16x128xbf16>
    %c0_35 = arith.constant 0 : index
    %c0_36 = arith.constant 0 : index
    %111 = vector.load %arg5[%c0_35, %c0_36] : memref<128x128xbf16, #tpu.memory_space<vmem>>, vector<128x128xbf16>
    %cst_37 = arith.constant dense<0.000000e+00> : vector<16x128xf32>
    %112 = tpu.matmul %110, %111, %cst_37 {dimension_numbers = #tpu.dot_dimension_numbers<[1], [0], [0], [1], [0, 0, 1, 1], [], []>} : vector<16x128xbf16>, vector<128x128xbf16>, vector<16x128xf32> -> vector<16x128xf32>
    %c0_38 = arith.constant 0 : index
    %c0_39 = arith.constant 0 : index
    %113 = vector.load %arg6[%c0_38, %c0_39] : memref<1x128xf32, #tpu.memory_space<vmem>>, vector<1x128xf32>
    %114 = vector.broadcast %113 : vector<1x128xf32> to vector<16x128xf32>
    %115 = arith.addf %112, %114 : vector<16x128xf32>
    %116 = arith.addf %115, %0 : vector<16x128xf32>
    %c0_40 = arith.constant 0 : index
    %c0_41 = arith.constant 0 : index
    %117 = vector.load %arg7[%c0_40, %c0_41] : memref<1x128xf32, #tpu.memory_space<vmem>>, vector<1x128xf32>
    %c0_42 = arith.constant 0 : index
    %c0_43 = arith.constant 0 : index
    %118 = vector.load %arg8[%c0_42, %c0_43] : memref<1x128xf32, #tpu.memory_space<vmem>>, vector<1x128xf32>
    %cst_44 = arith.constant dense<0.000000e+00> : vector<16xf32>
    %119 = vector.multi_reduction <add>, %116, %cst_44 [1] : vector<16x128xf32> to vector<16xf32>
    %120 = vector.shape_cast %119 : vector<16xf32> to vector<16x1xf32>
    %cst_45 = arith.constant 1.280000e+02 : f32
    %121 = vector.broadcast %cst_45 : f32 to vector<16x1xf32>
    %122 = arith.divf %120, %121 : vector<16x1xf32>
    %123 = vector.broadcast %122 : vector<16x1xf32> to vector<16x128xf32>
    %124 = arith.subf %116, %123 : vector<16x128xf32>
    %125 = arith.mulf %124, %124 : vector<16x128xf32>
    %cst_46 = arith.constant dense<0.000000e+00> : vector<16xf32>
    %126 = vector.multi_reduction <add>, %125, %cst_46 [1] : vector<16x128xf32> to vector<16xf32>
    %127 = vector.shape_cast %126 : vector<16xf32> to vector<16x1xf32>
    %cst_47 = arith.constant 1.280000e+02 : f32
    %128 = vector.broadcast %cst_47 : f32 to vector<16x1xf32>
    %129 = arith.divf %127, %128 : vector<16x1xf32>
    %130 = vector.broadcast %122 : vector<16x1xf32> to vector<16x128xf32>
    %131 = arith.subf %116, %130 : vector<16x128xf32>
    %cst_48 = arith.constant 9.99999996E-13 : f32
    %132 = vector.broadcast %cst_48 : f32 to vector<16x1xf32>
    %133 = arith.addf %129, %132 : vector<16x1xf32>
    %134 = math.rsqrt %133 : vector<16x1xf32>
    %135 = vector.broadcast %134 : vector<16x1xf32> to vector<16x128xf32>
    %136 = arith.mulf %131, %135 : vector<16x128xf32>
    %137 = vector.broadcast %117 : vector<1x128xf32> to vector<16x128xf32>
    %138 = arith.mulf %136, %137 : vector<16x128xf32>
    %139 = vector.broadcast %118 : vector<1x128xf32> to vector<16x128xf32>
    %140 = arith.addf %138, %139 : vector<16x128xf32>
    %141 = arith.truncf %140 : vector<16x128xf32> to vector<16x128xbf16>
    %c0_49 = arith.constant 0 : index
    %c0_50 = arith.constant 0 : index
    %142 = vector.load %arg9[%c0_49, %c0_50] : memref<128x512xbf16, #tpu.memory_space<vmem>>, vector<128x512xbf16>
    %cst_51 = arith.constant dense<0.000000e+00> : vector<16x512xf32>
    %143 = tpu.matmul %141, %142, %cst_51 {dimension_numbers = #tpu.dot_dimension_numbers<[1], [0], [0], [1], [0, 0, 1, 1], [], []>} : vector<16x128xbf16>, vector<128x512xbf16>, vector<16x512xf32> -> vector<16x512xf32>
    %c0_52 = arith.constant 0 : index
    %c0_53 = arith.constant 0 : index
    %144 = vector.load %arg10[%c0_52, %c0_53] : memref<1x512xf32, #tpu.memory_space<vmem>>, vector<1x512xf32>
    %145 = vector.broadcast %144 : vector<1x512xf32> to vector<16x512xf32>
    %146 = arith.addf %143, %145 : vector<16x512xf32>
    %147 = arith.mulf %146, %146 : vector<16x512xf32>
    %148 = arith.mulf %146, %147 : vector<16x512xf32>
    %cst_54 = arith.constant 4.471500e-02 : f32
    %149 = vector.broadcast %cst_54 : f32 to vector<16x512xf32>
    %150 = arith.mulf %149, %148 : vector<16x512xf32>
    %151 = arith.addf %146, %150 : vector<16x512xf32>
    %cst_55 = arith.constant 0.797884583 : f32
    %152 = vector.broadcast %cst_55 : f32 to vector<16x512xf32>
    %153 = arith.mulf %152, %151 : vector<16x512xf32>
    %154 = math.tanh %153 : vector<16x512xf32>
    %cst_56 = arith.constant 1.000000e+00 : f32
    %155 = vector.broadcast %cst_56 : f32 to vector<16x512xf32>
    %156 = arith.addf %155, %154 : vector<16x512xf32>
    %cst_57 = arith.constant 5.000000e-01 : f32
    %157 = vector.broadcast %cst_57 : f32 to vector<16x512xf32>
    %158 = arith.mulf %157, %156 : vector<16x512xf32>
    %159 = arith.mulf %146, %158 : vector<16x512xf32>
    %160 = arith.truncf %159 : vector<16x512xf32> to vector<16x512xbf16>
    %c0_58 = arith.constant 0 : index
    %c0_59 = arith.constant 0 : index
    %161 = vector.load %arg11[%c0_58, %c0_59] : memref<512x128xbf16, #tpu.memory_space<vmem>>, vector<512x128xbf16>
    %cst_60 = arith.constant dense<0.000000e+00> : vector<16x128xf32>
    %162 = tpu.matmul %160, %161, %cst_60 {dimension_numbers = #tpu.dot_dimension_numbers<[1], [0], [0], [1], [0, 0, 1, 1], [], []>} : vector<16x512xbf16>, vector<512x128xbf16>, vector<16x128xf32> -> vector<16x128xf32>
    %c0_61 = arith.constant 0 : index
    %c0_62 = arith.constant 0 : index
    %163 = vector.load %arg12[%c0_61, %c0_62] : memref<1x128xf32, #tpu.memory_space<vmem>>, vector<1x128xf32>
    %164 = vector.broadcast %163 : vector<1x128xf32> to vector<16x128xf32>
    %165 = arith.addf %162, %164 : vector<16x128xf32>
    %166 = arith.addf %165, %140 : vector<16x128xf32>
    %c0_63 = arith.constant 0 : index
    %c0_64 = arith.constant 0 : index
    %167 = vector.load %arg13[%c0_63, %c0_64] : memref<1x128xf32, #tpu.memory_space<vmem>>, vector<1x128xf32>
    %c0_65 = arith.constant 0 : index
    %c0_66 = arith.constant 0 : index
    %168 = vector.load %arg14[%c0_65, %c0_66] : memref<1x128xf32, #tpu.memory_space<vmem>>, vector<1x128xf32>
    %cst_67 = arith.constant dense<0.000000e+00> : vector<16xf32>
    %169 = vector.multi_reduction <add>, %166, %cst_67 [1] : vector<16x128xf32> to vector<16xf32>
    %170 = vector.shape_cast %169 : vector<16xf32> to vector<16x1xf32>
    %cst_68 = arith.constant 1.280000e+02 : f32
    %171 = vector.broadcast %cst_68 : f32 to vector<16x1xf32>
    %172 = arith.divf %170, %171 : vector<16x1xf32>
    %173 = vector.broadcast %172 : vector<16x1xf32> to vector<16x128xf32>
    %174 = arith.subf %166, %173 : vector<16x128xf32>
    %175 = arith.mulf %174, %174 : vector<16x128xf32>
    %cst_69 = arith.constant dense<0.000000e+00> : vector<16xf32>
    %176 = vector.multi_reduction <add>, %175, %cst_69 [1] : vector<16x128xf32> to vector<16xf32>
    %177 = vector.shape_cast %176 : vector<16xf32> to vector<16x1xf32>
    %cst_70 = arith.constant 1.280000e+02 : f32
    %178 = vector.broadcast %cst_70 : f32 to vector<16x1xf32>
    %179 = arith.divf %177, %178 : vector<16x1xf32>
    %180 = vector.broadcast %172 : vector<16x1xf32> to vector<16x128xf32>
    %181 = arith.subf %166, %180 : vector<16x128xf32>
    %cst_71 = arith.constant 9.99999996E-13 : f32
    %182 = vector.broadcast %cst_71 : f32 to vector<16x1xf32>
    %183 = arith.addf %179, %182 : vector<16x1xf32>
    %184 = math.rsqrt %183 : vector<16x1xf32>
    %185 = vector.broadcast %184 : vector<16x1xf32> to vector<16x128xf32>
    %186 = arith.mulf %181, %185 : vector<16x128xf32>
    %187 = vector.broadcast %167 : vector<1x128xf32> to vector<16x128xf32>
    %188 = arith.mulf %186, %187 : vector<16x128xf32>
    %189 = vector.broadcast %168 : vector<1x128xf32> to vector<16x128xf32>
    %190 = arith.addf %188, %189 : vector<16x128xf32>
    %c0_72 = arith.constant 0 : index
    %c0_73 = arith.constant 0 : index
    %191 = vector.load %arg15[%c0_72, %c0_73] : memref<16x128xf32, #tpu.memory_space<vmem>>, vector<16x128xf32>
    tpu.vector_store %arg15[%c0_72, %c0_73], %190 {strides = array<i32>} : memref<16x128xf32, #tpu.memory_space<vmem>>, vector<16x128xf32>,
    return
  }
  func.func @transform_0(%arg0: i32) -> (i32, i32) {
    %c0_i32 = arith.constant 0 : i32
    %c0_i32_0 = arith.constant 0 : i32
    %c0_i32_1 = arith.constant 0 : i32
    return %c0_i32, %c0_i32_0 : i32, i32
  }
  func.func @transform_1(%arg0: i32) -> (i32, i32) {
    %c0_i32 = arith.constant 0 : i32
    %c0_i32_0 = arith.constant 0 : i32
    %c0_i32_1 = arith.constant 0 : i32
    return %c0_i32, %c0_i32_0 : i32, i32
  }
  func.func @transform_2(%arg0: i32) -> (i32, i32) {
    %c0_i32 = arith.constant 0 : i32
    %c0_i32_0 = arith.constant 0 : i32
    %c0_i32_1 = arith.constant 0 : i32
    return %c0_i32, %c0_i32_0 : i32, i32
  }
  func.func @transform_3(%arg0: i32) -> (i32, i32) {
    %c0_i32 = arith.constant 0 : i32
    %c0_i32_0 = arith.constant 0 : i32
    %c0_i32_1 = arith.constant 0 : i32
    return %c0_i32, %c0_i32_0 : i32, i32
  }
  func.func @transform_4(%arg0: i32) -> (i32, i32) {
    %c0_i32 = arith.constant 0 : i32
    %c0_i32_0 = arith.constant 0 : i32
    %c0_i32_1 = arith.constant 0 : i32
    return %c0_i32, %c0_i32_0 : i32, i32
  }
  func.func @transform_5(%arg0: i32) -> (i32, i32) {
    %c0_i32 = arith.constant 0 : i32
    %c0_i32_0 = arith.constant 0 : i32
    %c0_i32_1 = arith.constant 0 : i32
    return %c0_i32, %c0_i32_0 : i32, i32
  }
  func.func @transform_6(%arg0: i32) -> (i32, i32) {
    %c0_i32 = arith.constant 0 : i32
    %c0_i32_0 = arith.constant 0 : i32
    %c0_i32_1 = arith.constant 0 : i32
    return %c0_i32, %c0_i32_0 : i32, i32
  }
  func.func @transform_7(%arg0: i32) -> (i32, i32) {
    %c0_i32 = arith.constant 0 : i32
    %c0_i32_0 = arith.constant 0 : i32
    %c0_i32_1 = arith.constant 0 : i32
    return %c0_i32, %c0_i32_0 : i32, i32
  }
  func.func @transform_8(%arg0: i32) -> (i32, i32) {
    %c0_i32 = arith.constant 0 : i32
    %c0_i32_0 = arith.constant 0 : i32
    %c0_i32_1 = arith.constant 0 : i32
    return %c0_i32, %c0_i32_0 : i32, i32
  }
  func.func @transform_9(%arg0: i32) -> (i32, i32) {
    %c0_i32 = arith.constant 0 : i32
    %c0_i32_0 = arith.constant 0 : i32
    %c0_i32_1 = arith.constant 0 : i32
    return %c0_i32, %c0_i32_0 : i32, i32
  }
  func.func @transform_10(%arg0: i32) -> (i32, i32) {
    %c0_i32 = arith.constant 0 : i32
    %c0_i32_0 = arith.constant 0 : i32
    %c0_i32_1 = arith.constant 0 : i32
    return %c0_i32, %c0_i32_0 : i32, i32
  }
  func.func @transform_11(%arg0: i32) -> (i32, i32) {
    %c0_i32 = arith.constant 0 : i32
    %c0_i32_0 = arith.constant 0 : i32
    %c0_i32_1 = arith.constant 0 : i32
    return %c0_i32, %c0_i32_0 : i32, i32
  }
  func.func @transform_12(%arg0: i32) -> (i32, i32) {
    %c0_i32 = arith.constant 0 : i32
    %c0_i32_0 = arith.constant 0 : i32
    %c0_i32_1 = arith.constant 0 : i32
    return %c0_i32, %c0_i32_0 : i32, i32
  }
  func.func @transform_13(%arg0: i32) -> (i32, i32) {
    %c0_i32 = arith.constant 0 : i32
    %c0_i32_0 = arith.constant 0 : i32
    %c0_i32_1 = arith.constant 0 : i32
    return %c0_i32, %c0_i32_0 : i32, i32
  }
  func.func @transform_14(%arg0: i32) -> (i32, i32) {
    %c0_i32 = arith.constant 0 : i32
    %c0_i32_0 = arith.constant 0 : i32
    %c0_i32_1 = arith.constant 0 : i32
    return %c0_i32, %c0_i32_0 : i32, i32
  }
}

module attributes {stable_mosaic.version = 11 : i64} {
  func.func @_classifier_kernel(%arg0: i32, %arg1: memref<2x128xf32, #tpu.memory_space<vmem>>, %arg2: memref<128x2xbf16, #tpu.memory_space<vmem>>, %arg3: memref<1x2xf32, #tpu.memory_space<vmem>>, %arg4: memref<2x2xf32, #tpu.memory_space<vmem>>) attributes {dimension_semantics = [#tpu.dimension_semantics<arbitrary>], iteration_bounds = array<i64: 1>, scalar_prefetch = 0 : i64, scratch_operands = 0 : i64, tpu.core_type = #tpu.core_type<tc>, window_params = [{pipeline_mode = #tpu.pipeline_mode<synchronous>, transform_indices = @transform_0, window_bounds = array<i64: 2, 128>}, {pipeline_mode = #tpu.pipeline_mode<synchronous>, transform_indices = @transform_1, window_bounds = array<i64: 128, 2>}, {pipeline_mode = #tpu.pipeline_mode<synchronous>, transform_indices = @transform_2, window_bounds = array<i64: 1, 2>}, {pipeline_mode = #tpu.pipeline_mode<synchronous>, transform_indices = @transform_3, window_bounds = array<i64: 2, 2>}]} {
    %c0 = arith.constant 0 : index
    %c0_0 = arith.constant 0 : index
    %0 = vector.load %arg1[%c0, %c0_0] : memref<2x128xf32, #tpu.memory_space<vmem>>, vector<2x128xf32>
    %1 = arith.truncf %0 : vector<2x128xf32> to vector<2x128xbf16>
    %c0_1 = arith.constant 0 : index
    %c0_2 = arith.constant 0 : index
    %2 = vector.load %arg2[%c0_1, %c0_2] : memref<128x2xbf16, #tpu.memory_space<vmem>>, vector<128x2xbf16>
    %cst = arith.constant dense<0.000000e+00> : vector<2x2xf32>
    %3 = tpu.matmul %1, %2, %cst {dimension_numbers = #tpu.dot_dimension_numbers<[1], [0], [0], [1], [0, 0, 1, 1], [], []>} : vector<2x128xbf16>, vector<128x2xbf16>, vector<2x2xf32> -> vector<2x2xf32>
    %c0_3 = arith.constant 0 : index
    %c0_4 = arith.constant 0 : index
    %4 = vector.load %arg3[%c0_3, %c0_4] : memref<1x2xf32, #tpu.memory_space<vmem>>, vector<1x2xf32>
    %5 = vector.broadcast %4 : vector<1x2xf32> to vector<2x2xf32>
    %6 = arith.addf %3, %5 : vector<2x2xf32>
    %c0_5 = arith.constant 0 : index
    %c0_6 = arith.constant 0 : index
    %7 = vector.load %arg4[%c0_5, %c0_6] : memref<2x2xf32, #tpu.memory_space<vmem>>, vector<2x2xf32>
    tpu.vector_store %arg4[%c0_5, %c0_6], %6 {strides = array<i32>} : memref<2x2xf32, #tpu.memory_space<vmem>>, vector<2x2xf32>,
    return
  }
  func.func @transform_0(%arg0: i32) -> (i32, i32) {
    %c0_i32 = arith.constant 0 : i32
    %c0_i32_0 = arith.constant 0 : i32
    %c0_i32_1 = arith.constant 0 : i32
    return %c0_i32, %c0_i32_0 : i32, i32
  }
  func.func @transform_1(%arg0: i32) -> (i32, i32) {
    %c0_i32 = arith.constant 0 : i32
    %c0_i32_0 = arith.constant 0 : i32
    %c0_i32_1 = arith.constant 0 : i32
    return %c0_i32, %c0_i32_0 : i32, i32
  }
  func.func @transform_2(%arg0: i32) -> (i32, i32) {
    %c0_i32 = arith.constant 0 : i32
    %c0_i32_0 = arith.constant 0 : i32
    %c0_i32_1 = arith.constant 0 : i32
    return %c0_i32, %c0_i32_0 : i32, i32
  }
  func.func @transform_3(%arg0: i32) -> (i32, i32) {
    %c0_i32 = arith.constant 0 : i32
    %c0_i32_0 = arith.constant 0 : i32
    %c0_i32_1 = arith.constant 0 : i32
    return %c0_i32, %c0_i32_0 : i32, i32
  }
}

module attributes {stable_mosaic.version = 11 : i64} {
  func.func @_encoder_layer_kernel(%arg0: i32, %arg1: memref<16x128xf32, #tpu.memory_space<vmem>>, %arg2: memref<2x8xf32, #tpu.memory_space<vmem>>, %arg3: memref<128x384xbf16, #tpu.memory_space<vmem>>, %arg4: memref<1x384xf32, #tpu.memory_space<vmem>>, %arg5: memref<128x128xbf16, #tpu.memory_space<vmem>>, %arg6: memref<1x128xf32, #tpu.memory_space<vmem>>, %arg7: memref<1x128xf32, #tpu.memory_space<vmem>>, %arg8: memref<1x128xf32, #tpu.memory_space<vmem>>, %arg9: memref<128x512xbf16, #tpu.memory_space<vmem>>, %arg10: memref<1x512xf32, #tpu.memory_space<vmem>>, %arg11: memref<512x128xbf16, #tpu.memory_space<vmem>>, %arg12: memref<1x128xf32, #tpu.memory_space<vmem>>, %arg13: memref<1x128xf32, #tpu.memory_space<vmem>>, %arg14: memref<1x128xf32, #tpu.memory_space<vmem>>, %arg15: memref<16x128xf32, #tpu.memory_space<vmem>>, %arg16: memref<16x128xf32, #tpu.memory_space<vmem>>) attributes {dimension_semantics = [#tpu.dimension_semantics<arbitrary>], iteration_bounds = array<i64: 1>, scalar_prefetch = 0 : i64, scratch_operands = 1 : i64, tpu.core_type = #tpu.core_type<tc>, window_params = [{pipeline_mode = #tpu.pipeline_mode<synchronous>, transform_indices = @transform_0, window_bounds = array<i64: 16, 128>}, {pipeline_mode = #tpu.pipeline_mode<synchronous>, transform_indices = @transform_1, window_bounds = array<i64: 2, 8>}, {pipeline_mode = #tpu.pipeline_mode<synchronous>, transform_indices = @transform_2, window_bounds = array<i64: 128, 384>}, {pipeline_mode = #tpu.pipeline_mode<synchronous>, transform_indices = @transform_3, window_bounds = array<i64: 1, 384>}, {pipeline_mode = #tpu.pipeline_mode<synchronous>, transform_indices = @transform_4, window_bounds = array<i64: 128, 128>}, {pipeline_mode = #tpu.pipeline_mode<synchronous>, transform_indices = @transform_5, window_bounds = array<i64: 1, 128>}, {pipeline_mode = #tpu.pipeline_mode<synchronous>, transform_indices = @transform_6, window_bounds = array<i64: 1, 128>}, {pipeline_mode = #tpu.pipeline_mode<synchronous>, transform_indices = @transform_7, window_bounds = array<i64: 1, 128>}, {pipeline_mode = #tpu.pipeline_mode<synchronous>, transform_indices = @transform_8, window_bounds = array<i64: 128, 512>}, {pipeline_mode = #tpu.pipeline_mode<synchronous>, transform_indices = @transform_9, window_bounds = array<i64: 1, 512>}, {pipeline_mode = #tpu.pipeline_mode<synchronous>, transform_indices = @transform_10, window_bounds = array<i64: 512, 128>}, {pipeline_mode = #tpu.pipeline_mode<synchronous>, transform_indices = @transform_11, window_bounds = array<i64: 1, 128>}, {pipeline_mode = #tpu.pipeline_mode<synchronous>, transform_indices = @transform_12, window_bounds = array<i64: 1, 128>}, {pipeline_mode = #tpu.pipeline_mode<synchronous>, transform_indices = @transform_13, window_bounds = array<i64: 1, 128>}, {pipeline_mode = #tpu.pipeline_mode<synchronous>, transform_indices = @transform_14, window_bounds = array<i64: 16, 128>}]} {
    %c0 = arith.constant 0 : index
    %c0_0 = arith.constant 0 : index
    %0 = vector.load %arg1[%c0, %c0_0] : memref<16x128xf32, #tpu.memory_space<vmem>>, vector<16x128xf32>
    %c0_1 = arith.constant 0 : index
    %c0_2 = arith.constant 0 : index
    %1 = vector.load %arg2[%c0_1, %c0_2] : memref<2x8xf32, #tpu.memory_space<vmem>>, vector<2x8xf32>
    %2 = arith.truncf %0 : vector<16x128xf32> to vector<16x128xbf16>
    %c0_3 = arith.constant 0 : index
    %c0_4 = arith.constant 0 : index
    %3 = vector.load %arg3[%c0_3, %c0_4] : memref<128x384xbf16, #tpu.memory_space<vmem>>, vector<128x384xbf16>
    %cst = arith.constant dense<0.000000e+00> : vector<16x384xf32>
    %4 = tpu.matmul %2, %3, %cst {dimension_numbers = #tpu.dot_dimension_numbers<[1], [0], [0], [1], [0, 0, 1, 1], [], []>} : vector<16x128xbf16>, vector<128x384xbf16>, vector<16x384xf32> -> vector<16x384xf32>
    %c0_5 = arith.constant 0 : index
    %c0_6 = arith.constant 0 : index
    %5 = vector.load %arg4[%c0_5, %c0_6] : memref<1x384xf32, #tpu.memory_space<vmem>>, vector<1x384xf32>
    %6 = vector.broadcast %5 : vector<1x384xf32> to vector<16x384xf32>
    %7 = arith.addf %4, %6 : vector<16x384xf32>
    %8 = vector.extract_strided_slice %7 {offsets = [0, 0], sizes = [16, 128], strides = [1, 1]} : vector<16x384xf32> to vector<16x128xf32>
    %9 = vector.extract_strided_slice %7 {offsets = [0, 128], sizes = [16, 128], strides = [1, 1]} : vector<16x384xf32> to vector<16x128xf32>
    %10 = vector.extract_strided_slice %7 {offsets = [0, 256], sizes = [16, 128], strides = [1, 1]} : vector<16x384xf32> to vector<16x128xf32>
    %11 = vector.extract_strided_slice %1 {offsets = [0, 0], sizes = [1, 8], strides = [1, 1]} : vector<2x8xf32> to vector<1x8xf32>
    %12 = vector.extract_strided_slice %8 {offsets = [0, 0], sizes = [8, 64], strides = [1, 1]} : vector<16x128xf32> to vector<8x64xf32>
    %13 = arith.truncf %12 : vector<8x64xf32> to vector<8x64xbf16>
    %14 = vector.extract_strided_slice %9 {offsets = [0, 0], sizes = [8, 64], strides = [1, 1]} : vector<16x128xf32> to vector<8x64xf32>
    %15 = arith.truncf %14 : vector<8x64xf32> to vector<8x64xbf16>
    %16 = vector.extract_strided_slice %10 {offsets = [0, 0], sizes = [8, 64], strides = [1, 1]} : vector<16x128xf32> to vector<8x64xf32>
    %17 = arith.truncf %16 : vector<8x64xf32> to vector<8x64xbf16>
    %cst_7 = arith.constant dense<0.000000e+00> : vector<8x8xf32>
    %18 = tpu.matmul %13, %15, %cst_7 {dimension_numbers = #tpu.dot_dimension_numbers<[1], [1], [0], [0], [0, 0, 1, 0], [], []>} : vector<8x64xbf16>, vector<8x64xbf16>, vector<8x8xf32> -> vector<8x8xf32>
    %cst_8 = arith.constant 1.250000e-01 : f32
    %19 = vector.broadcast %cst_8 : f32 to vector<8x8xf32>
    %20 = arith.mulf %18, %19 : vector<8x8xf32>
    %21 = vector.broadcast %11 : vector<1x8xf32> to vector<8x8xf32>
    %22 = arith.addf %20, %21 : vector<8x8xf32>
    %cst_9 = arith.constant dense<0xFF800000> : vector<8xf32>
    %23 = vector.multi_reduction <maximumf>, %22, %cst_9 [1] : vector<8x8xf32> to vector<8xf32>
    %24 = vector.shape_cast %23 : vector<8xf32> to vector<8x1xf32>
    %25 = vector.broadcast %24 : vector<8x1xf32> to vector<8x8xf32>
    %26 = arith.subf %22, %25 : vector<8x8xf32>
    %27 = math.exp %26 : vector<8x8xf32>
    %cst_10 = arith.constant dense<0.000000e+00> : vector<8xf32>
    %28 = vector.multi_reduction <add>, %27, %cst_10 [1] : vector<8x8xf32> to vector<8xf32>
    %29 = vector.shape_cast %28 : vector<8xf32> to vector<8x1xf32>
    %30 = tpu.reciprocal %29 {approx = true} : vector<8x1xf32> -> vector<8x1xf32>
    %31 = vector.broadcast %30 : vector<8x1xf32> to vector<8x8xf32>
    %32 = arith.mulf %27, %31 : vector<8x8xf32>
    %33 = arith.truncf %32 : vector<8x8xf32> to vector<8x8xbf16>
    %cst_11 = arith.constant dense<0.000000e+00> : vector<8x64xf32>
    %34 = tpu.matmul %33, %17, %cst_11 {dimension_numbers = #tpu.dot_dimension_numbers<[1], [0], [0], [1], [0, 0, 1, 1], [], []>} : vector<8x8xbf16>, vector<8x64xbf16>, vector<8x64xf32> -> vector<8x64xf32>
    %c0_12 = arith.constant 0 : index
    %c0_13 = arith.constant 0 : index
    %35 = vector.load %arg16[%c0_12, %c0_13] : memref<16x128xf32, #tpu.memory_space<vmem>>, vector<8x64xf32>
    tpu.vector_store %arg16[%c0_12, %c0_13], %34 {strides = array<i32>} : memref<16x128xf32, #tpu.memory_space<vmem>>, vector<8x64xf32>,
    %36 = vector.extract_strided_slice %8 {offsets = [0, 64], sizes = [8, 64], strides = [1, 1]} : vector<16x128xf32> to vector<8x64xf32>
    %37 = arith.truncf %36 : vector<8x64xf32> to vector<8x64xbf16>
    %38 = vector.extract_strided_slice %9 {offsets = [0, 64], sizes = [8, 64], strides = [1, 1]} : vector<16x128xf32> to vector<8x64xf32>
    %39 = arith.truncf %38 : vector<8x64xf32> to vector<8x64xbf16>
    %40 = vector.extract_strided_slice %10 {offsets = [0, 64], sizes = [8, 64], strides = [1, 1]} : vector<16x128xf32> to vector<8x64xf32>
    %41 = arith.truncf %40 : vector<8x64xf32> to vector<8x64xbf16>
    %cst_14 = arith.constant dense<0.000000e+00> : vector<8x8xf32>
    %42 = tpu.matmul %37, %39, %cst_14 {dimension_numbers = #tpu.dot_dimension_numbers<[1], [1], [0], [0], [0, 0, 1, 0], [], []>} : vector<8x64xbf16>, vector<8x64xbf16>, vector<8x8xf32> -> vector<8x8xf32>
    %cst_15 = arith.constant 1.250000e-01 : f32
    %43 = vector.broadcast %cst_15 : f32 to vector<8x8xf32>
    %44 = arith.mulf %42, %43 : vector<8x8xf32>
    %45 = vector.broadcast %11 : vector<1x8xf32> to vector<8x8xf32>
    %46 = arith.addf %44, %45 : vector<8x8xf32>
    %cst_16 = arith.constant dense<0xFF800000> : vector<8xf32>
    %47 = vector.multi_reduction <maximumf>, %46, %cst_16 [1] : vector<8x8xf32> to vector<8xf32>
    %48 = vector.shape_cast %47 : vector<8xf32> to vector<8x1xf32>
    %49 = vector.broadcast %48 : vector<8x1xf32> to vector<8x8xf32>
    %50 = arith.subf %46, %49 : vector<8x8xf32>
    %51 = math.exp %50 : vector<8x8xf32>
    %cst_17 = arith.constant dense<0.000000e+00> : vector<8xf32>
    %52 = vector.multi_reduction <add>, %51, %cst_17 [1] : vector<8x8xf32> to vector<8xf32>
    %53 = vector.shape_cast %52 : vector<8xf32> to vector<8x1xf32>
    %54 = tpu.reciprocal %53 {approx = true} : vector<8x1xf32> -> vector<8x1xf32>
    %55 = vector.broadcast %54 : vector<8x1xf32> to vector<8x8xf32>
    %56 = arith.mulf %51, %55 : vector<8x8xf32>
    %57 = arith.truncf %56 : vector<8x8xf32> to vector<8x8xbf16>
    %cst_18 = arith.constant dense<0.000000e+00> : vector<8x64xf32>
    %58 = tpu.matmul %57, %41, %cst_18 {dimension_numbers = #tpu.dot_dimension_numbers<[1], [0], [0], [1], [0, 0, 1, 1], [], []>} : vector<8x8xbf16>, vector<8x64xbf16>, vector<8x64xf32> -> vector<8x64xf32>
    %c0_19 = arith.constant 0 : index
    %c64 = arith.constant 64 : index
    %59 = vector.load %arg16[%c0_19, %c64] : memref<16x128xf32, #tpu.memory_space<vmem>>, vector<8x64xf32>
    tpu.vector_store %arg16[%c0_19, %c64], %58 {strides = array<i32>} : memref<16x128xf32, #tpu.memory_space<vmem>>, vector<8x64xf32>,
    %60 = vector.extract_strided_slice %1 {offsets = [1, 0], sizes = [1, 8], strides = [1, 1]} : vector<2x8xf32> to vector<1x8xf32>
    %61 = vector.extract_strided_slice %8 {offsets = [8, 0], sizes = [8, 64], strides = [1, 1]} : vector<16x128xf32> to vector<8x64xf32>
    %62 = arith.truncf %61 : vector<8x64xf32> to vector<8x64xbf16>
    %63 = vector.extract_strided_slice %9 {offsets = [8, 0], sizes = [8, 64], strides = [1, 1]} : vector<16x128xf32> to vector<8x64xf32>
    %64 = arith.truncf %63 : vector<8x64xf32> to vector<8x64xbf16>
    %65 = vector.extract_strided_slice %10 {offsets = [8, 0], sizes = [8, 64], strides = [1, 1]} : vector<16x128xf32> to vector<8x64xf32>
    %66 = arith.truncf %65 : vector<8x64xf32> to vector<8x64xbf16>
    %cst_20 = arith.constant dense<0.000000e+00> : vector<8x8xf32>
    %67 = tpu.matmul %62, %64, %cst_20 {dimension_numbers = #tpu.dot_dimension_numbers<[1], [1], [0], [0], [0, 0, 1, 0], [], []>} : vector<8x64xbf16>, vector<8x64xbf16>, vector<8x8xf32> -> vector<8x8xf32>
    %cst_21 = arith.constant 1.250000e-01 : f32
    %68 = vector.broadcast %cst_21 : f32 to vector<8x8xf32>
    %69 = arith.mulf %67, %68 : vector<8x8xf32>
    %70 = vector.broadcast %60 : vector<1x8xf32> to vector<8x8xf32>
    %71 = arith.addf %69, %70 : vector<8x8xf32>
    %cst_22 = arith.constant dense<0xFF800000> : vector<8xf32>
    %72 = vector.multi_reduction <maximumf>, %71, %cst_22 [1] : vector<8x8xf32> to vector<8xf32>
    %73 = vector.shape_cast %72 : vector<8xf32> to vector<8x1xf32>
    %74 = vector.broadcast %73 : vector<8x1xf32> to vector<8x8xf32>
    %75 = arith.subf %71, %74 : vector<8x8xf32>
    %76 = math.exp %75 : vector<8x8xf32>
    %cst_23 = arith.constant dense<0.000000e+00> : vector<8xf32>
    %77 = vector.multi_reduction <add>, %76, %cst_23 [1] : vector<8x8xf32> to vector<8xf32>
    %78 = vector.shape_cast %77 : vector<8xf32> to vector<8x1xf32>
    %79 = tpu.reciprocal %78 {approx = true} : vector<8x1xf32> -> vector<8x1xf32>
    %80 = vector.broadcast %79 : vector<8x1xf32> to vector<8x8xf32>
    %81 = arith.mulf %76, %80 : vector<8x8xf32>
    %82 = arith.truncf %81 : vector<8x8xf32> to vector<8x8xbf16>
    %cst_24 = arith.constant dense<0.000000e+00> : vector<8x64xf32>
    %83 = tpu.matmul %82, %66, %cst_24 {dimension_numbers = #tpu.dot_dimension_numbers<[1], [0], [0], [1], [0, 0, 1, 1], [], []>} : vector<8x8xbf16>, vector<8x64xbf16>, vector<8x64xf32> -> vector<8x64xf32>
    %c8 = arith.constant 8 : index
    %c0_25 = arith.constant 0 : index
    %84 = vector.load %arg16[%c8, %c0_25] : memref<16x128xf32, #tpu.memory_space<vmem>>, vector<8x64xf32>
    tpu.vector_store %arg16[%c8, %c0_25], %83 {strides = array<i32>} : memref<16x128xf32, #tpu.memory_space<vmem>>, vector<8x64xf32>,
    %85 = vector.extract_strided_slice %8 {offsets = [8, 64], sizes = [8, 64], strides = [1, 1]} : vector<16x128xf32> to vector<8x64xf32>
    %86 = arith.truncf %85 : vector<8x64xf32> to vector<8x64xbf16>
    %87 = vector.extract_strided_slice %9 {offsets = [8, 64], sizes = [8, 64], strides = [1, 1]} : vector<16x128xf32> to vector<8x64xf32>
    %88 = arith.truncf %87 : vector<8x64xf32> to vector<8x64xbf16>
    %89 = vector.extract_strided_slice %10 {offsets = [8, 64], sizes = [8, 64], strides = [1, 1]} : vector<16x128xf32> to vector<8x64xf32>
    %90 = arith.truncf %89 : vector<8x64xf32> to vector<8x64xbf16>
    %cst_26 = arith.constant dense<0.000000e+00> : vector<8x8xf32>
    %91 = tpu.matmul %86, %88, %cst_26 {dimension_numbers = #tpu.dot_dimension_numbers<[1], [1], [0], [0], [0, 0, 1, 0], [], []>} : vector<8x64xbf16>, vector<8x64xbf16>, vector<8x8xf32> -> vector<8x8xf32>
    %cst_27 = arith.constant 1.250000e-01 : f32
    %92 = vector.broadcast %cst_27 : f32 to vector<8x8xf32>
    %93 = arith.mulf %91, %92 : vector<8x8xf32>
    %94 = vector.broadcast %60 : vector<1x8xf32> to vector<8x8xf32>
    %95 = arith.addf %93, %94 : vector<8x8xf32>
    %cst_28 = arith.constant dense<0xFF800000> : vector<8xf32>
    %96 = vector.multi_reduction <maximumf>, %95, %cst_28 [1] : vector<8x8xf32> to vector<8xf32>
    %97 = vector.shape_cast %96 : vector<8xf32> to vector<8x1xf32>
    %98 = vector.broadcast %97 : vector<8x1xf32> to vector<8x8xf32>
    %99 = arith.subf %95, %98 : vector<8x8xf32>
    %100 = math.exp %99 : vector<8x8xf32>
    %cst_29 = arith.constant dense<0.000000e+00> : vector<8xf32>
    %101 = vector.multi_reduction <add>, %100, %cst_29 [1] : vector<8x8xf32> to vector<8xf32>
    %102 = vector.shape_cast %101 : vector<8xf32> to vector<8x1xf32>
    %103 = tpu.reciprocal %102 {approx = true} : vector<8x1xf32> -> vector<8x1xf32>
    %104 = vector.broadcast %103 : vector<8x1xf32> to vector<8x8xf32>
    %105 = arith.mulf %100, %104 : vector<8x8xf32>
    %106 = arith.truncf %105 : vector<8x8xf32> to vector<8x8xbf16>
    %cst_30 = arith.constant dense<0.000000e+00> : vector<8x64xf32>
    %107 = tpu.matmul %106, %90, %cst_30 {dimension_numbers = #tpu.dot_dimension_numbers<[1], [0], [0], [1], [0, 0, 1, 1], [], []>} : vector<8x8xbf16>, vector<8x64xbf16>, vector<8x64xf32> -> vector<8x64xf32>
    %c8_31 = arith.constant 8 : index
    %c64_32 = arith.constant 64 : index
    %108 = vector.load %arg16[%c8_31, %c64_32] : memref<16x128xf32, #tpu.memory_space<vmem>>, vector<8x64xf32>
    tpu.vector_store %arg16[%c8_31, %c64_32], %107 {strides = array<i32>} : memref<16x128xf32, #tpu.memory_space<vmem>>, vector<8x64xf32>,
    %c0_33 = arith.constant 0 : index
    %c0_34 = arith.constant 0 : index
    %109 = vector.load %arg16[%c0_33, %c0_34] : memref<16x128xf32, #tpu.memory_space<vmem>>, vector<16x128xf32>
    %110 = arith.truncf %109 : vector<16x128xf32> to vector<16x128xbf16>
    %c0_35 = arith.constant 0 : index
    %c0_36 = arith.constant 0 : index
    %111 = vector.load %arg5[%c0_35, %c0_36] : memref<128x128xbf16, #tpu.memory_space<vmem>>, vector<128x128xbf16>
    %cst_37 = arith.constant dense<0.000000e+00> : vector<16x128xf32>
    %112 = tpu.matmul %110, %111, %cst_37 {dimension_numbers = #tpu.dot_dimension_numbers<[1], [0], [0], [1], [0, 0, 1, 1], [], []>} : vector<16x128xbf16>, vector<128x128xbf16>, vector<16x128xf32> -> vector<16x128xf32>
    %c0_38 = arith.constant 0 : index
    %c0_39 = arith.constant 0 : index
    %113 = vector.load %arg6[%c0_38, %c0_39] : memref<1x128xf32, #tpu.memory_space<vmem>>, vector<1x128xf32>
    %114 = vector.broadcast %113 : vector<1x128xf32> to vector<16x128xf32>
    %115 = arith.addf %112, %114 : vector<16x128xf32>
    %116 = arith.addf %115, %0 : vector<16x128xf32>
    %c0_40 = arith.constant 0 : index
    %c0_41 = arith.constant 0 : index
    %117 = vector.load %arg7[%c0_40, %c0_41] : memref<1x128xf32, #tpu.memory_space<vmem>>, vector<1x128xf32>
    %c0_42 = arith.constant 0 : index
    %c0_43 = arith.constant 0 : index
    %118 = vector.load %arg8[%c0_42, %c0_43] : memref<1x128xf32, #tpu.memory_space<vmem>>, vector<1x128xf32>
    %cst_44 = arith.constant dense<0.000000e+00> : vector<16xf32>
    %119 = vector.multi_reduction <add>, %116, %cst_44 [1] : vector<16x128xf32> to vector<16xf32>
    %120 = vector.shape_cast %119 : vector<16xf32> to vector<16x1xf32>
    %cst_45 = arith.constant 1.280000e+02 : f32
    %121 = vector.broadcast %cst_45 : f32 to vector<16x1xf32>
    %122 = arith.divf %120, %121 : vector<16x1xf32>
    %123 = vector.broadcast %122 : vector<16x1xf32> to vector<16x128xf32>
    %124 = arith.subf %116, %123 : vector<16x128xf32>
    %125 = arith.mulf %124, %124 : vector<16x128xf32>
    %cst_46 = arith.constant dense<0.000000e+00> : vector<16xf32>
    %126 = vector.multi_reduction <add>, %125, %cst_46 [1] : vector<16x128xf32> to vector<16xf32>
    %127 = vector.shape_cast %126 : vector<16xf32> to vector<16x1xf32>
    %cst_47 = arith.constant 1.280000e+02 : f32
    %128 = vector.broadcast %cst_47 : f32 to vector<16x1xf32>
    %129 = arith.divf %127, %128 : vector<16x1xf32>
    %130 = vector.broadcast %122 : vector<16x1xf32> to vector<16x128xf32>
    %131 = arith.subf %116, %130 : vector<16x128xf32>
    %cst_48 = arith.constant 9.99999996E-13 : f32
    %132 = vector.broadcast %cst_48 : f32 to vector<16x1xf32>
    %133 = arith.addf %129, %132 : vector<16x1xf32>
    %134 = math.rsqrt %133 : vector<16x1xf32>
    %135 = vector.broadcast %134 : vector<16x1xf32> to vector<16x128xf32>
    %136 = arith.mulf %131, %135 : vector<16x128xf32>
    %137 = vector.broadcast %117 : vector<1x128xf32> to vector<16x128xf32>
    %138 = arith.mulf %136, %137 : vector<16x128xf32>
    %139 = vector.broadcast %118 : vector<1x128xf32> to vector<16x128xf32>
    %140 = arith.addf %138, %139 : vector<16x128xf32>
    %141 = arith.truncf %140 : vector<16x128xf32> to vector<16x128xbf16>
    %c0_49 = arith.constant 0 : index
    %c0_50 = arith.constant 0 : index
    %142 = vector.load %arg9[%c0_49, %c0_50] : memref<128x512xbf16, #tpu.memory_space<vmem>>, vector<128x512xbf16>
    %cst_51 = arith.constant dense<0.000000e+00> : vector<16x512xf32>
    %143 = tpu.matmul %141, %142, %cst_51 {dimension_numbers = #tpu.dot_dimension_numbers<[1], [0], [0], [1], [0, 0, 1, 1], [], []>} : vector<16x128xbf16>, vector<128x512xbf16>, vector<16x512xf32> -> vector<16x512xf32>
    %c0_52 = arith.constant 0 : index
    %c0_53 = arith.constant 0 : index
    %144 = vector.load %arg10[%c0_52, %c0_53] : memref<1x512xf32, #tpu.memory_space<vmem>>, vector<1x512xf32>
    %145 = vector.broadcast %144 : vector<1x512xf32> to vector<16x512xf32>
    %146 = arith.addf %143, %145 : vector<16x512xf32>
    %147 = arith.mulf %146, %146 : vector<16x512xf32>
    %148 = arith.mulf %146, %147 : vector<16x512xf32>
    %cst_54 = arith.constant 4.471500e-02 : f32
    %149 = vector.broadcast %cst_54 : f32 to vector<16x512xf32>
    %150 = arith.mulf %149, %148 : vector<16x512xf32>
    %151 = arith.addf %146, %150 : vector<16x512xf32>
    %cst_55 = arith.constant 0.797884583 : f32
    %152 = vector.broadcast %cst_55 : f32 to vector<16x512xf32>
    %153 = arith.mulf %152, %151 : vector<16x512xf32>
    %154 = math.tanh %153 : vector<16x512xf32>
    %cst_56 = arith.constant 1.000000e+00 : f32
    %155 = vector.broadcast %cst_56 : f32 to vector<16x512xf32>
    %156 = arith.addf %155, %154 : vector<16x512xf32>
    %cst_57 = arith.constant 5.000000e-01 : f32
    %157 = vector.broadcast %cst_57 : f32 to vector<16x512xf32>
    %158 = arith.mulf %157, %156 : vector<16x512xf32>
    %159 = arith.mulf %146, %158 : vector<16x512xf32>
    %160 = arith.truncf %159 : vector<16x512xf32> to vector<16x512xbf16>
    %c0_58 = arith.constant 0 : index
    %c0_59 = arith.constant 0 : index
    %161 = vector.load %arg11[%c0_58, %c0_59] : memref<512x128xbf16, #tpu.memory_space<vmem>>, vector<512x128xbf16>
    %cst_60 = arith.constant dense<0.000000e+00> : vector<16x128xf32>
    %162 = tpu.matmul %160, %161, %cst_60 {dimension_numbers = #tpu.dot_dimension_numbers<[1], [0], [0], [1], [0, 0, 1, 1], [], []>} : vector<16x512xbf16>, vector<512x128xbf16>, vector<16x128xf32> -> vector<16x128xf32>
    %c0_61 = arith.constant 0 : index
    %c0_62 = arith.constant 0 : index
    %163 = vector.load %arg12[%c0_61, %c0_62] : memref<1x128xf32, #tpu.memory_space<vmem>>, vector<1x128xf32>
    %164 = vector.broadcast %163 : vector<1x128xf32> to vector<16x128xf32>
    %165 = arith.addf %162, %164 : vector<16x128xf32>
    %166 = arith.addf %165, %140 : vector<16x128xf32>
    %c0_63 = arith.constant 0 : index
    %c0_64 = arith.constant 0 : index
    %167 = vector.load %arg13[%c0_63, %c0_64] : memref<1x128xf32, #tpu.memory_space<vmem>>, vector<1x128xf32>
    %c0_65 = arith.constant 0 : index
    %c0_66 = arith.constant 0 : index
    %168 = vector.load %arg14[%c0_65, %c0_66] : memref<1x128xf32, #tpu.memory_space<vmem>>, vector<1x128xf32>
    %cst_67 = arith.constant dense<0.000000e+00> : vector<16xf32>
    %169 = vector.multi_reduction <add>, %166, %cst_67 [1] : vector<16x128xf32> to vector<16xf32>
    %170 = vector.shape_cast %169 : vector<16xf32> to vector<16x1xf32>
    %cst_68 = arith.constant 1.280000e+02 : f32
    %171 = vector.broadcast %cst_68 : f32 to vector<16x1xf32>
    %172 = arith.divf %170, %171 : vector<16x1xf32>
    %173 = vector.broadcast %172 : vector<16x1xf32> to vector<16x128xf32>
    %174 = arith.subf %166, %173 : vector<16x128xf32>
    %175 = arith.mulf %174, %174 : vector<16x128xf32>
    %cst_69 = arith.constant dense<0.000000e+00> : vector<16xf32>
    %176 = vector.multi_reduction <add>, %175, %cst_69 [1] : vector<16x128xf32> to vector<16xf32>
    %177 = vector.shape_cast %176 : vector<16xf32> to vector<16x1xf32>
    %cst_70 = arith.constant 1.280000e+02 : f32
    %178 = vector.broadcast %cst_70 : f32 to vector<16x1xf32>
    %179 = arith.divf %177, %178 : vector<16x1xf32>
    %180 = vector.broadcast %172 : vector<16x1xf32> to vector<16x128xf32>
    %181 = arith.subf %166, %180 : vector<16x128xf32>
    %cst_71 = arith.constant 9.99999996E-13 : f32
    %182 = vector.broadcast %cst_71 : f32 to vector<16x1xf32>
    %183 = arith.addf %179, %182 : vector<16x1xf32>
    %184 = math.rsqrt %183 : vector<16x1xf32>
    %185 = vector.broadcast %184 : vector<16x1xf32> to vector<16x128xf32>
    %186 = arith.mulf %181, %185 : vector<16x128xf32>
    %187 = vector.broadcast %167 : vector<1x128xf32> to vector<16x128xf32>
    %188 = arith.mulf %186, %187 : vector<16x128xf32>
    %189 = vector.broadcast %168 : vector<1x128xf32> to vector<16x128xf32>
    %190 = arith.addf %188, %189 : vector<16x128xf32>
    %c0_72 = arith.constant 0 : index
    %c0_73 = arith.constant 0 : index
    %191 = vector.load %arg15[%c0_72, %c0_73] : memref<16x128xf32, #tpu.memory_space<vmem>>, vector<16x128xf32>
    tpu.vector_store %arg15[%c0_72, %c0_73], %190 {strides = array<i32>} : memref<16x128xf32, #tpu.memory_space<vmem>>, vector<16x128xf32>,
    return
  }
  func.func @transform_0(%arg0: i32) -> (i32, i32) {
    %c0_i32 = arith.constant 0 : i32
    %c0_i32_0 = arith.constant 0 : i32
    %c0_i32_1 = arith.constant 0 : i32
    return %c0_i32, %c0_i32_0 : i32, i32
  }
  func.func @transform_1(%arg0: i32) -> (i32, i32) {
    %c0_i32 = arith.constant 0 : i32
    %c0_i32_0 = arith.constant 0 : i32
    %c0_i32_1 = arith.constant 0 : i32
    return %c0_i32, %c0_i32_0 : i32, i32
  }
  func.func @transform_2(%arg0: i32) -> (i32, i32) {
    %c0_i32 = arith.constant 0 : i32
    %c0_i32_0 = arith.constant 0 : i32
    %c0_i32_1 = arith.constant 0 : i32
    return %c0_i32, %c0_i32_0 : i32, i32
  }
  func.func @transform_3(%arg0: i32) -> (i32, i32) {
    %c0_i32 = arith.constant 0 : i32
    %c0_i32_0 = arith.constant 0 : i32
    %c0_i32_1 = arith.constant 0 : i32
    return %c0_i32, %c0_i32_0 : i32, i32
  }
  func.func @transform_4(%arg0: i32) -> (i32, i32) {
    %c0_i32 = arith.constant 0 : i32
    %c0_i32_0 = arith.constant 0 : i32
    %c0_i32_1 = arith.constant 0 : i32
    return %c0_i32, %c0_i32_0 : i32, i32
  }
  func.func @transform_5(%arg0: i32) -> (i32, i32) {
    %c0_i32 = arith.constant 0 : i32
    %c0_i32_0 = arith.constant 0 : i32
    %c0_i32_1 = arith.constant 0 : i32
    return %c0_i32, %c0_i32_0 : i32, i32
  }
  func.func @transform_6(%arg0: i32) -> (i32, i32) {
    %c0_i32 = arith.constant 0 : i32
    %c0_i32_0 = arith.constant 0 : i32
    %c0_i32_1 = arith.constant 0 : i32
    return %c0_i32, %c0_i32_0 : i32, i32
  }
  func.func @transform_7(%arg0: i32) -> (i32, i32) {
    %c0_i32 = arith.constant 0 : i32
    %c0_i32_0 = arith.constant 0 : i32
    %c0_i32_1 = arith.constant 0 : i32
    return %c0_i32, %c0_i32_0 : i32, i32
  }
  func.func @transform_8(%arg0: i32) -> (i32, i32) {
    %c0_i32 = arith.constant 0 : i32
    %c0_i32_0 = arith.constant 0 : i32
    %c0_i32_1 = arith.constant 0 : i32
    return %c0_i32, %c0_i32_0 : i32, i32
  }
  func.func @transform_9(%arg0: i32) -> (i32, i32) {
    %c0_i32 = arith.constant 0 : i32
    %c0_i32_0 = arith.constant 0 : i32
    %c0_i32_1 = arith.constant 0 : i32
    return %c0_i32, %c0_i32_0 : i32, i32
  }
  func.func @transform_10(%arg0: i32) -> (i32, i32) {
    %c0_i32 = arith.constant 0 : i32
    %c0_i32_0 = arith.constant 0 : i32
    %c0_i32_1 = arith.constant 0 : i32
    return %c0_i32, %c0_i32_0 : i32, i32
  }
  func.func @transform_11(%arg0: i32) -> (i32, i32) {
    %c0_i32 = arith.constant 0 : i32
    %c0_i32_0 = arith.constant 0 : i32
    %c0_i32_1 = arith.constant 0 : i32
    return %c0_i32, %c0_i32_0 : i32, i32
  }
  func.func @transform_12(%arg0: i32) -> (i32, i32) {
    %c0_i32 = arith.constant 0 : i32
    %c0_i32_0 = arith.constant 0 : i32
    %c0_i32_1 = arith.constant 0 : i32
    return %c0_i32, %c0_i32_0 : i32, i32
  }
  func.func @transform_13(%arg0: i32) -> (i32, i32) {
    %c0_i32 = arith.constant 0 : i32
    %c0_i32_0 = arith.constant 0 : i32
    %c0_i32_1 = arith.constant 0 : i32
    return %c0_i32, %c0_i32_0 : i32, i32
  }
  func.func @transform_14(%arg0: i32) -> (i32, i32) {
    %c0_i32 = arith.constant 0 : i32
    %c0_i32_0 = arith.constant 0 : i32
    %c0_i32_1 = arith.constant 0 : i32
    return %c0_i32, %c0_i32_0 : i32, i32
  }
}

</mosaic_0001>

<bundles_post_ra>
// kernel: bert_classifier_forward.4
= control target key start
LH: loop header
LB: loop body
LE: loop exit
PB: predicated region body
PF: predicated region fallthrough
CT: control target
= control target key end

     0   :  { %8 = vsyncpa [#allocation3], 0  ;;  %s181_s0 = inlined_call_operand.vmem [shape: f32[16,128], index: 0, kind: input, shape index: {}]   ;;  %s182_s1 = inlined_call_operand.hbm [shape: f32[1,128], index: 1, kind: input, shape index: {}]   ;;  %s183_s2 = inlined_call_operand.hbm [shape: f32[1,128], index: 2, kind: input, shape index: {}]   ;;  %s184_s3 = inlined_call_operand.vmem [shape: f32[16,128], index: 3, kind: output, shape index: {}]  }
   0x1   :  { %9 = vsyncpa [#allocation5], 0  ;;  %s141_s12 = smov [#allocation2]   ;;  %s142_s14 = smov [#allocation4]  }
   0x2   :  { %s18_s13 = sshll.u32 %s141_s12, 4  ;;  %s28_s15 = sshll.u32 %s142_s14, 4  ;;  %s19_s13 = int_to_ptr.vmem [resolvable:$true] %s18_s13  ;;  %s29_s15 = int_to_ptr.vmem [resolvable:$true] %s28_s15 }
   0x3   :  { %s105_s16 = scalar_lea.vmem %s19_s13, 16  ;;  %s109_s17 = scalar_lea.vmem %s19_s13, 32 }
   0x4   :  { %p106_p0 = scmp.ne.s32.totalorder %s19_s13, %s105_s16  ;;  %p110_p1 = scmp.lt.s32.totalorder %s19_s13, %s19_s13 }
   0x5   :  { %p111_p2 = scmp.lt.s32.totalorder %s109_s17, %s105_s16 }
   0x7   :  { %p112_p3 = por %p111_p2, %p110_p1 }
   0x9   :  { %p113_p4 = pnand %p112_p3, %p106_p0 }
   0xb   :  { %116 = shalt.err (!%p113_p4)
}
   0xc   :  { %21 = dma.hbm_to_vmem [thread:$0]  %s182_s1, 16, %s19_s13, [#allocation3]  }
   0xd   :  { %s125_s20 = scalar_lea.vmem %s29_s15, 16  ;;  %s129_s21 = scalar_lea.vmem %s29_s15, 32 }
   0xe   :  { %p126_p5 = scmp.ne.s32.totalorder %s29_s15, %s125_s20  ;;  %p130_p6 = scmp.lt.s32.totalorder %s29_s15, %s29_s15 }
   0xf   :  { %p131_p7 = scmp.lt.s32.totalorder %s129_s21, %s125_s20 }
  0x11   :  { %p132_p8 = por %p131_p7, %p130_p6 }
  0x13   :  { %p133_p9 = pnand %p132_p8, %p126_p5 }
  0x15   :  { %136 = shalt.err (!%p133_p9)
}
  0x16   :  { %31 = dma.hbm_to_vmem [thread:$0]  %s183_s2, 16, %s29_s15, [#allocation5]  }
  0x17   :  { %137 = dma.done.wait [#allocation3], 16  }
  0x18   :  { %138 = vsyncadd [#allocation3], 4294967280 }
  0x19   :  { %139 = dma.done.wait [#allocation5], 16  }
  0x1a   :  { %140 = vsyncadd [#allocation5], 4294967280  ;;  %v38_v0 = vld [vmem:[%s181_s0] sm:$0xff]  ;;  %v39_v1 = vld [vmem:[%s181_s0 + $0x8] sm:$0xff] }
  0x1b   :  { %42 = vadd.xlane.f32.xlu0 %v38_v0  ;;  %v89_v17 = vld [vmem:[#allocation2] ss:$0 sm:$0xff]  ;;  %v90_v19 = vld [vmem:[#allocation4] ss:$0 sm:$0xff] }
  0x1f   :  { %44 = vadd.xlane.f32.xlu0 %v39_v1 }
  0xa4   :  { %v43_v2 = vpop.xlane.xlu0 %42 }
  0xa5   :  { %v47_v3 = vmul.f32 0.0078125, %v43_v2 }
  0xa7   :  { %v49_v4 = vsub.f32 %v38_v0, %v47_v3 }
  0xa8   :  { %v45_v5 = vpop.xlane.xlu0 %44 }
  0xa9   :  { %v48_v6 = vmul.f32 0.0078125, %v45_v5  ;;  %v51_v7 = vmul.f32 %v49_v4, %v49_v4 }
  0xab   :  { %v50_v8 = vsub.f32 %v39_v1, %v48_v6  ;;  %53 = vadd.xlane.f32.xlu1 %v51_v7 }
  0xad   :  { %v52_v9 = vmul.f32 %v50_v8, %v50_v8 }
  0xaf   :  { %55 = vadd.xlane.f32.xlu1 %v52_v9 }
 0x134   :  { %v54_v10 = vpop.xlane.xlu1 %53 }
 0x135   :  { %v57_v11 = vmul.f32 0.0078125, %v54_v10 }
 0x137   :  { %v59_v12 = vadd.f32 1e-12, %v57_v11 }
 0x138   :  { %v56_v13 = vpop.xlane.xlu1 %55 }
 0x139   :  { %93 = vrsqrt.f32 %v59_v12  ;;  %v58_v14 = vmul.f32 0.0078125, %v56_v13 }
 0x13b   :  { %v60_v15 = vadd.f32 1e-12, %v58_v14 }
 0x13d   :  { %95 = vrsqrt.f32 %v60_v15 }
 0x146   :  { %v94_v16 = vpop.eup %93 }
 0x147   :  { %v63_v18 = vmul.f32 %v94_v16, %v49_v4 }
 0x149   :  { %v71_v20 = vmul.f32 %v89_v17, %v63_v18 }
 0x14a   :  { %v96_v21 = vpop.eup %95 }
 0x14b   :  { %v79_v22 = vadd.f32 %v90_v19, %v71_v20  ;;  %v64_v23 = vmul.f32 %v96_v21, %v50_v8 }
 0x14d   :  { %81 = vst [vmem:[%s184_s3] sm:$0xff] %v79_v22  ;;  %v72_v24 = vmul.f32 %v89_v17, %v64_v23 }
 0x14f   :  { %v80_v25 = vadd.f32 %v90_v19, %v72_v24 }
 0x151   :  { %82 = vst [vmem:[%s184_s3 + $0x8] sm:$0xff] %v80_v25 }
 0x152   :  { %87 = vsyncpa [#allocation3], 1 }
 0x153   :  { %88 = vsyncpa [#allocation5], 1 }

// kernel: bert_classifier_forward.7
= control target key start
LH: loop header
LB: loop body
LE: loop exit
PB: predicated region body
PF: predicated region fallthrough
CT: control target
= control target key end

     0   :  { %v216_v1 = vmov 0.0   ;;  %vm217_vm0 = vmmov 0   ;;  %s272_s0 = inlined_call_operand.vmem [shape: f32[2,128], index: 0, kind: input, shape index: {}]   ;;  %s273_s1 = inlined_call_operand.vmem [shape: bf16[128,2], index: 1, kind: input, shape index: {}]   ;;  %s274_s2 = inlined_call_operand.vmem [shape: f32[1,2], index: 2, kind: input, shape index: {}]   ;;  %s275_s3 = inlined_call_operand.hbm [shape: f32[2,2], index: 3, kind: output, shape index: {}]  }
   0x1   :  { %v186_v0 = vld [vmem:[%s273_s1 + $0x38] sm:$0xff]   ;;  %163 = vmatprep.subr.bf16.mxu0 %v216_v1  ;;  %v187_v2 = vld [vmem:[%s273_s1 + $0x30] sm:$0xff]   ;;  %179 = vmatprep.mubr.msk.bf16.mxu0 %vm217_vm0, %v216_v1  ;;  %v188_v3 = vld [vmem:[%s273_s1 + $0x28] sm:$0xff]  }
   0x2   :  { %164 = vmatpush3.bf16.msra.mxu0 %v186_v0 }
   0x3   :  { %165 = vmatprep.subr.bf16.mxu0 %v216_v1 }
   0x6   :  { %166 = vmatpush3.bf16.msra.mxu0 %v187_v2 }
   0x7   :  { %167 = vmatprep.subr.bf16.mxu0 %v216_v1 }
   0x8   :  { %8 = vsyncpa [#allocation3], 0  ;;  %v189_v4 = vld [vmem:[%s273_s1 + $0x20] sm:$0xff]   ;;  %v190_v5 = vld [vmem:[%s273_s1 + $0x18] sm:$0xff]   ;;  %s218_s5 = smov [#allocation2]   ;;  %vm129_vm1 = vcmask 9216  }
   0x9   :  { %v191_v6 = vld [vmem:[%s273_s1 + $0x10] sm:$0xff]   ;;  %v192_v7 = vld [vmem:[%s273_s1 + $0x8] sm:$0xff]   ;;  %v193_v8 = vld [vmem:[%s273_s1] sm:$0xff]   ;;  %s137_s6 = sshll.u32 %s218_s5, 4  ;;  %s138_s6 = int_to_ptr.vmem [resolvable:$true] %s137_s6 }
   0xa   :  { %168 = vmatpush3.bf16.msra.mxu0 %v188_v3  ;;  %v16_v9 = vld [vmem:[%s272_s0] sm:$0x3]  ;;  %s194_s1 = scalar_lea.vmem %s138_s6, 32  ;;  %p199_p1 = scmp.lt.s32.totalorder %s138_s6, %s138_s6 }
   0xb   :  { %169 = vmatprep.subr.bf16.mxu0 %v216_v1  ;;  %v17_v10 = vpack.c.bf16 %v16_v9, %v16_v9  ;;  %v145_v11 = vld [vmem:[%s274_s2] ss:$0 sm:$0xff]  ;;  %p195_p0 = scmp.ne.s32.totalorder %s138_s6, %s194_s1  ;;  %p200_p2 = scmp.lt.s32.totalorder %s194_s1, %s194_s1 }
   0xd   :  { %p201_p3 = por %p200_p2, %p199_p1 }
   0xe   :  { %170 = vmatpush3.bf16.msra.mxu0 %v189_v4 }
   0xf   :  { %171 = vmatprep.subr.bf16.mxu0 %v216_v1  ;;  %p202_p4 = pnand %p201_p3, %p195_p0 }
  0x12   :  { %172 = vmatpush3.bf16.msra.mxu0 %v190_v5 }
  0x13   :  { %173 = vmatprep.subr.bf16.mxu0 %v216_v1 }
  0x16   :  { %174 = vmatpush3.bf16.msra.mxu0 %v191_v6 }
  0x17   :  { %175 = vmatprep.subr.bf16.mxu0 %v216_v1 }
  0x1a   :  { %176 = vmatpush3.bf16.msra.mxu0 %v192_v7 }
  0x1b   :  { %177 = vmatprep.subr.bf16.mxu0 %v216_v1 }
  0x1e   :  { %178 = vmatpush3.bf16.msra.mxu0 %v193_v8 }
  0x21   :  { %180 = vmatmul.mubr.bf16.vlgmr.msra.gmra.mxu0 %v17_v10 }
  0xe1   :  { %v123_v12 = vpop.f32.mrf.mxu0 }
  0xe2   :  { %v124_v13 = vadd.f32 %v145_v11, %v123_v12 }
  0xe3   :  { %v181_v14 = vpop.f32.mrf.mxu0 }
  0xe4   :  { %130 = vst.msk [vmem:[#allocation2] sm:$0x3] %vm129_vm1, %v124_v13 }
  0xe5   :  { %v126_v15 = vpop.f32.mrf.mxu0 }
  0xe6   :  { %205 = shalt.err (!%p202_p4)
}
  0xe7   :  { %140 = dma.vmem_to_hbm [thread:$0]  %s138_s6, 32, %s275_s3, [#allocation3]   ;;  %v182_v16 = vpop.f32.mrf.mxu0 }
  0xe8   :  { %214 = dma.done.wait [#allocation3], 32  }
  0xe9   :  { %215 = vsyncadd [#allocation3], 4294967264 }
  0xea   :  { %144 = vsyncpa [#allocation3], 1 }

// kernel: bert_classifier_forward.5
= control target key start
LH: loop header
LB: loop body
LE: loop exit
PB: predicated region body
PF: predicated region fallthrough
CT: control target
= control target key end

     0   :  { %19 = vsyncpa [#allocation4], 0  ;;  %s2972_s0 = inlined_call_operand.vmem [shape: f32[16,128], index: 0, kind: input, shape index: {}]   ;;  %s2973_s1 = inlined_call_operand.vmem [shape: f32[2,8], index: 1, kind: input, shape index: {}]   ;;  %s2974_s2 = inlined_call_operand.hbm [shape: bf16[128,384], index: 2, kind: input, shape index: {}]   ;;  %s2975_s3 = inlined_call_operand.hbm [shape: f32[1,384], index: 3, kind: input, shape index: {}]   ;;  %s2976_s4 = inlined_call_operand.hbm [shape: bf16[128,128], index: 4, kind: input, shape index: {}]   ;;  %s2977_s5 = inlined_call_operand.hbm [shape: f32[1,128], index: 5, kind: input, shape index: {}]   ;;  %s2978_s6 = inlined_call_operand.hbm [shape: f32[1,128], index: 6, kind: input, shape index: {}]   ;;  %s2979_s7 = inlined_call_operand.hbm [shape: f32[1,128], index: 7, kind: input, shape index: {}]   ;;  %s2980_s8 = inlined_call_operand.vmem [shape: bf16[128,512], index: 8, kind: input, shape index: {}]   ;;  %s2981_s9 = inlined_call_operand.hbm [shape: f32[1,512], index: 9, kind: input, shape index: {}]   ;;  %s2982_s10 = inlined_call_operand.hbm [shape: bf16[512,128], index: 10, kind: input, shape index: {}]   ;;  %s2983_s11 = inlined_call_operand.hbm [shape: f32[1,128], index: 11, kind: input, shape index: {}]   ;;  %s2984_s12 = inlined_call_operand.hbm [shape: f32[1,128], index: 12, kind: input, shape index: {}]   ;;  %s2985_s13 = inlined_call_operand.hbm [shape: f32[1,128], index: 13, kind: input, shape index: {}]   ;;  %s2986_s14 = inlined_call_operand.vmem [shape: f32[16,128], index: 14, kind: output, shape index: {}]  }
   0x1   :  { %20 = vsyncpa [#allocation6], 0 }
   0x2   :  { %21 = vsyncpa [#allocation9], 0 }
   0x3   :  { %22 = vsyncpa [#allocation12], 0 }
   0x4   :  { %23 = vsyncpa [#allocation15], 0 }
   0x5   :  { %24 = vsyncpa [#allocation18], 0  ;;  %s2538_s29 = smov [#allocation5]   ;;  %s2539_s15 = smov [#allocation8]  }
   0x6   :  { %s47_s30 = sshll.u32 %s2538_s29, 4  ;;  %s69_s16 = sshll.u32 %s2539_s15, 4  ;;  %s48_s30 = int_to_ptr.vmem [resolvable:$true] %s47_s30  ;;  %s70_s16 = int_to_ptr.vmem [resolvable:$true] %s69_s16 }
   0x7   :  { %s2314_s17 = scalar_lea.vmem %s48_s30, 48  ;;  %s2318_s18 = scalar_lea.vmem %s48_s30, 64 }
   0x8   :  { %p2315_p0 = scmp.ne.s32.totalorder %s48_s30, %s2314_s17  ;;  %p2319_p1 = scmp.lt.s32.totalorder %s48_s30, %s48_s30 }
   0x9   :  { %p2320_p2 = scmp.lt.s32.totalorder %s2318_s18, %s2314_s17 }
   0xb   :  { %p2321_p3 = por %p2320_p2, %p2319_p1 }
   0xd   :  { %p2322_p4 = pnand %p2321_p3, %p2315_p0 }
   0xf   :  { %2325 = shalt.err (!%p2322_p4)
}
  0x10   :  { %50 = dma.hbm_to_vmem [thread:$0]  %s2975_s3, 48, %s48_s30, [#allocation6]  }
  0x11   :  { %s2334_s21 = scalar_lea.vmem %s70_s16, 16  ;;  %s2338_s22 = scalar_lea.vmem %s70_s16, 32 }
  0x12   :  { %p2335_p5 = scmp.ne.s32.totalorder %s70_s16, %s2334_s21  ;;  %p2339_p6 = scmp.lt.s32.totalorder %s70_s16, %s70_s16 }
  0x13   :  { %p2340_p7 = scmp.lt.s32.totalorder %s2338_s22, %s2334_s21 }
  0x15   :  { %p2341_p8 = por %p2340_p7, %p2339_p6 }
  0x17   :  { %p2342_p9 = pnand %p2341_p8, %p2335_p5 }
  0x19   :  { %2345 = shalt.err (!%p2342_p9)
}
  0x1a   :  { %72 = dma.hbm_to_vmem [thread:$0]  %s2977_s5, 16, %s70_s16, [#allocation9]  }
  0x1b   :  { %s2540_s25 = smov [#allocation11]  }
  0x1c   :  { %s89_s26 = sshll.u32 %s2540_s25, 4  ;;  %s90_s26 = int_to_ptr.vmem [resolvable:$true] %s89_s26 }
  0x1d   :  { %s2354_s27 = scalar_lea.vmem %s90_s26, 16  ;;  %s2358_s28 = scalar_lea.vmem %s90_s26, 32 }
  0x1e   :  { %p2355_p10 = scmp.ne.s32.totalorder %s90_s26, %s2354_s27  ;;  %p2359_p11 = scmp.lt.s32.totalorder %s90_s26, %s90_s26 }
  0x1f   :  { %p2360_p12 = scmp.lt.s32.totalorder %s2358_s28, %s2354_s27 }
  0x21   :  { %p2361_p13 = por %p2360_p12, %p2359_p11 }
  0x23   :  { %p2362_p0 = pnand %p2361_p13, %p2355_p10 }
  0x25   :  { %2365 = shalt.err (!%p2362_p0)
}
  0x26   :  { %92 = dma.hbm_to_vmem [thread:$0]  %s2979_s7, 16, %s90_s26, [#allocation12]  }
  0x27   :  { %s2541_s30 = smov [#allocation14]   ;;  %s2542_s17 = smov [#allocation17]  }
  0x28   :  { %s110_s15 = sshll.u32 %s2541_s30, 4  ;;  %s133_s5 = sshll.u32 %s2542_s17, 4  ;;  %s111_s15 = int_to_ptr.vmem [resolvable:$true] %s110_s15  ;;  %s134_s5 = int_to_ptr.vmem [resolvable:$true] %s133_s5 }
  0x29   :  { %s2374_s16 = scalar_lea.vmem %s111_s15, 4096  ;;  %p2379_p2 = scmp.lt.s32.totalorder %s111_s15, %s111_s15 }
  0x2a   :  { %p2375_p1 = scmp.ne.s32.totalorder %s111_s15, %s2374_s16  ;;  %p2380_p3 = scmp.lt.s32.totalorder %s2374_s16, %s2374_s16 }
  0x2c   :  { %p2381_p4 = por %p2380_p3, %p2379_p2 }
  0x2e   :  { %p2382_p5 = pnand %p2381_p4, %p2375_p1 }
  0x30   :  { %2385 = shalt.err (!%p2382_p5)
}
  0x31   :  { %s2543_s18 = smov 64   ;;  %s2544_s19 = smov 4  }
  0x32   :  { %116 = dma.hbm_to_vmem [thread:$0]  %s2982_s10, 4096, %s111_s15, [#allocation15], %s2543_s18, %s2543_s18, %s2544_s19  }
  0x33   :  { %s2394_s7 = scalar_lea.vmem %s134_s5, 16  ;;  %s2398_s22 = scalar_lea.vmem %s134_s5, 32 }
  0x34   :  { %p2395_p6 = scmp.ne.s32.totalorder %s134_s5, %s2394_s7  ;;  %p2399_p7 = scmp.lt.s32.totalorder %s134_s5, %s134_s5 }
  0x35   :  { %p2400_p8 = scmp.lt.s32.totalorder %s2398_s22, %s2394_s7 }
  0x37   :  { %p2401_p9 = por %p2400_p8, %p2399_p7 }
  0x39   :  { %p2402_p10 = pnand %p2401_p9, %p2395_p6 }
  0x3b   :  { %2405 = shalt.err (!%p2402_p10)
}
  0x3c   :  { %136 = dma.hbm_to_vmem [thread:$0]  %s2984_s12, 16, %s134_s5, [#allocation18]  }
  0x3d   :  { %s2545_s25 = smov [#allocation3]  }
  0x3e   :  { %s34_s26 = sshll.u32 %s2545_s25, 4  ;;  %s35_s26 = int_to_ptr.vmem [resolvable:$true] %s34_s26 }
  0x3f   :  { %s2414_s27 = scalar_lea.vmem %s35_s26, 3072  ;;  %p2419_p12 = scmp.lt.s32.totalorder %s35_s26, %s35_s26 }
  0x40   :  { %p2415_p11 = scmp.ne.s32.totalorder %s35_s26, %s2414_s27  ;;  %p2420_p13 = scmp.lt.s32.totalorder %s2414_s27, %s2414_s27 }
  0x42   :  { %p2421_p0 = por %p2420_p13, %p2419_p12 }
  0x44   :  { %p2422_p1 = pnand %p2421_p0, %p2415_p11 }
  0x46   :  { %2425 = shalt.err (!%p2422_p1)
}
  0x47   :  { %s2546_s10 = smov 192   ;;  %s2547_s28 = smov 12  }
  0x48   :  { %40 = dma.hbm_to_vmem [thread:$0]  %s2974_s2, 3072, %s35_s26, [#allocation4], %s2546_s10, %s2546_s10, %s2547_s28  }
  0x49   :  { %s2548_s30 = smov [#allocation7]   ;;  %s2549_s17 = smov [#allocation10]  }
  0x4a   :  { %s56_s15 = sshll.u32 %s2548_s30, 4  ;;  %s79_s12 = sshll.u32 %s2549_s17, 4  ;;  %s57_s15 = int_to_ptr.vmem [resolvable:$true] %s56_s15  ;;  %s80_s12 = int_to_ptr.vmem [resolvable:$true] %s79_s12 }
  0x4b   :  { %s2434_s5 = scalar_lea.vmem %s57_s15, 1024  ;;  %p2439_p3 = scmp.lt.s32.totalorder %s57_s15, %s57_s15 }
  0x4c   :  { %p2435_p2 = scmp.ne.s32.totalorder %s57_s15, %s2434_s5  ;;  %p2440_p4 = scmp.lt.s32.totalorder %s2434_s5, %s2434_s5 }
  0x4e   :  { %p2441_p5 = por %p2440_p4, %p2439_p3 }
  0x50   :  { %p2442_p6 = pnand %p2441_p5, %p2435_p2 }
  0x52   :  { %2445 = shalt.err (!%p2442_p6)
}
  0x53   :  { %62 = dma.hbm_to_vmem [thread:$0]  %s2976_s4, 1024, %s57_s15, [#allocation6], %s2543_s18, %s2543_s18, %s2544_s19  }
  0x54   :  { %s2454_s2 = scalar_lea.vmem %s80_s12, 16  ;;  %s2458_s21 = scalar_lea.vmem %s80_s12, 32 }
  0x55   :  { %p2455_p7 = scmp.ne.s32.totalorder %s80_s12, %s2454_s2  ;;  %p2459_p8 = scmp.lt.s32.totalorder %s80_s12, %s80_s12 }
  0x56   :  { %p2460_p9 = scmp.lt.s32.totalorder %s2458_s21, %s2454_s2 }
  0x58   :  { %p2461_p10 = por %p2460_p9, %p2459_p8 }
  0x5a   :  { %p2462_p11 = pnand %p2461_p10, %p2455_p7 }
  0x5c   :  { %2465 = shalt.err (!%p2462_p11)
}
  0x5d   :  { %82 = dma.hbm_to_vmem [thread:$0]  %s2978_s6, 16, %s80_s12, [#allocation9]  }
  0x5e   :  { %s2550_s23 = smov [#allocation13]   ;;  %s2551_s25 = smov [#allocation16]  }
  0x5f   :  { %s101_s24 = sshll.u32 %s2550_s23, 4  ;;  %s123_s26 = sshll.u32 %s2551_s25, 4  ;;  %s102_s24 = int_to_ptr.vmem [resolvable:$true] %s101_s24  ;;  %s124_s26 = int_to_ptr.vmem [resolvable:$true] %s123_s26 }
  0x60   :  { %s2474_s27 = scalar_lea.vmem %s102_s24, 64  ;;  %p2479_p13 = scmp.lt.s32.totalorder %s102_s24, %s102_s24 }
  0x61   :  { %p2475_p12 = scmp.ne.s32.totalorder %s102_s24, %s2474_s27  ;;  %p2480_p0 = scmp.lt.s32.totalorder %s2474_s27, %s2474_s27 }
  0x63   :  { %p2481_p1 = por %p2480_p0, %p2479_p13 }
  0x65   :  { %p2482_p2 = pnand %p2481_p1, %p2475_p12 }
  0x67   :  { %2485 = shalt.err (!%p2482_p2)
}
  0x68   :  { %104 = dma.hbm_to_vmem [thread:$0]  %s2981_s9, 64, %s102_s24, [#allocation12]  }
  0x69   :  { %s2494_s10 = scalar_lea.vmem %s124_s26, 16  ;;  %s2498_s6 = scalar_lea.vmem %s124_s26, 32 }
  0x6a   :  { %p2495_p3 = scmp.ne.s32.totalorder %s124_s26, %s2494_s10  ;;  %p2499_p4 = scmp.lt.s32.totalorder %s124_s26, %s124_s26 }
  0x6b   :  { %p2500_p5 = scmp.lt.s32.totalorder %s2498_s6, %s2494_s10 }
  0x6d   :  { %p2501_p6 = por %p2500_p5, %p2499_p4 }
  0x6f   :  { %p2502_p7 = pnand %p2501_p6, %p2495_p3 }
  0x71   :  { %2505 = shalt.err (!%p2502_p7)
}
  0x72   :  { %126 = dma.hbm_to_vmem [thread:$0]  %s2983_s11, 16, %s124_s26, [#allocation15]  }
  0x73   :  { %s2552_s29 = smov [#allocation19]  }
  0x74   :  { %s143_s30 = sshll.u32 %s2552_s29, 4  ;;  %s144_s30 = int_to_ptr.vmem [resolvable:$true] %s143_s30 }
  0x75   :  { %s2514_s15 = scalar_lea.vmem %s144_s30, 16  ;;  %s2518_s17 = scalar_lea.vmem %s144_s30, 32 }
  0x76   :  { %p2515_p8 = scmp.ne.s32.totalorder %s144_s30, %s2514_s15  ;;  %p2519_p9 = scmp.lt.s32.totalorder %s144_s30, %s144_s30 }
  0x77   :  { %p2520_p10 = scmp.lt.s32.totalorder %s2518_s17, %s2514_s15 }
  0x79   :  { %p2521_p11 = por %p2520_p10, %p2519_p9 }
  0x7b   :  { %p2522_p12 = pnand %p2521_p11, %p2515_p8 }
  0x7d   :  { %2525 = shalt.err (!%p2522_p12)
}
  0x7e   :  { %146 = dma.hbm_to_vmem [thread:$0]  %s2985_s13, 16, %s144_s30, [#allocation18]  }
  0x7f   :  { %2526 = dma.done.wait [#allocation4], 3072  }
  0x80   :  { %2527 = vsyncadd [#allocation4], 4294964224 }
  0x81   :  { %2528 = dma.done.wait [#allocation6], 1072  }
  0x82   :  { %2529 = vsyncadd [#allocation6], 4294966224 }
  0x83   :  { %2530 = dma.done.wait [#allocation9], 32  }
  0x84   :  { %2531 = vsyncadd [#allocation9], 4294967264 }
  0x85   :  { %2532 = dma.done.wait [#allocation12], 80  }
  0x86   :  { %2533 = vsyncadd [#allocation12], 4294967216 }
  0x87   :  { %2534 = dma.done.wait [#allocation15], 4112  }
  0x88   :  { %2535 = vsyncadd [#allocation15], 4294963184 }
  0x89   :  { %2536 = dma.done.wait [#allocation18], 32  }
  0x8a   :  { %2537 = vsyncadd [#allocation18], 4294967264  ;;  %v2553_v0 = vmov 0   ;;  %v2554_v1 = vmov 0.0   ;;  %v2146_v2 = vld [vmem:[#allocation3 + $0xac] ss:$12 sps:$4 sm:$0xff]   ;;  %v219_v29 = vlaneseq }
  0x8b   :  { %394 = vmatprep.mubr.bf16.mxu0 %v2553_v0  ;;  %2040 = vmatprep.subr.bf16.mxu1 %v2554_v1  ;;  %v2148_v3 = vld [vmem:[#allocation3 + $0xa8] ss:$12 sps:$4 sm:$0xff]   ;;  %v2151_v5 = vld [vmem:[#allocation3 + $0x90] ss:$12 sps:$4 sm:$0xff]   ;;  %v2154_v7 = vld [vmem:[#allocation3 + $0x78] ss:$12 sps:$4 sm:$0xff]  }
  0x8c   :  { %362 = vmatprep.subr.bf16.mxu0 %v2146_v2  ;;  %v2149_v4 = vld [vmem:[#allocation3 + $0x94] ss:$12 sps:$4 sm:$0xff]   ;;  %v2152_v6 = vld [vmem:[#allocation3 + $0x7c] ss:$12 sps:$4 sm:$0xff]   ;;  %v2155_v8 = vld [vmem:[#allocation3 + $0x64] ss:$12 sps:$4 sm:$0xff]  }
  0x8d   :  { %363 = vmatpush1.bf16.msra.mxu0 %v2148_v3  ;;  %v2157_v9 = vld [vmem:[#allocation3 + $0x60] ss:$12 sps:$4 sm:$0xff]   ;;  %v2170_v11 = vld [vmem:[#allocation3 + $0xb0] ss:$12 sps:$4 sm:$0xff]   ;;  %v2171_v12 = vld [vmem:[#allocation3 + $0x98] ss:$12 sps:$4 sm:$0xff]  }
  0x8e   :  { %364 = vmatprep.subr.bf16.mxu0 %v2149_v4  ;;  %v2158_v10 = vld [vmem:[#allocation3 + $0x4c] ss:$12 sps:$4 sm:$0xff]   ;;  %2041 = vmatpush3.bf16.msra.mxu1 %v2170_v11  ;;  %v2160_v13 = vld [vmem:[#allocation3 + $0x48] ss:$12 sps:$4 sm:$0xff]   ;;  %v2163_v16 = vld [vmem:[#allocation3 + $0x30] ss:$12 sps:$4 sm:$0xff]  }
  0x8f   :  { %2042 = vmatprep.subr.bf16.mxu1 %v2554_v1  ;;  %v2161_v14 = vld [vmem:[#allocation3 + $0x34] ss:$12 sps:$4 sm:$0xff]   ;;  %v2164_v17 = vld [vmem:[#allocation3 + $0x1c] ss:$12 sps:$4 sm:$0xff]   ;;  %v2166_v19 = vld [vmem:[#allocation3 + $0x18] ss:$12 sps:$4 sm:$0xff]  }
  0x90   :  { %v2172_v15 = vld [vmem:[#allocation3 + $0x80] ss:$12 sps:$4 sm:$0xff]   ;;  %v2173_v18 = vld [vmem:[#allocation3 + $0x68] ss:$12 sps:$4 sm:$0xff]   ;;  %v2167_v20 = vld [vmem:[#allocation3 + $0x4] ss:$12 sps:$4 sm:$0xff]  }
  0x91   :  { %365 = vmatpush1.bf16.msra.mxu0 %v2151_v5  ;;  %v2174_v21 = vld [vmem:[#allocation3 + $0x50] ss:$12 sps:$4 sm:$0xff]   ;;  %v2169_v22 = vld [vmem:[#allocation3] ss:$12 sps:$4 sm:$0xff]   ;;  %v2175_v25 = vld [vmem:[#allocation3 + $0x38] ss:$12 sps:$4 sm:$0xff]  }
  0x92   :  { %366 = vmatprep.subr.bf16.mxu0 %v2152_v6  ;;  %2043 = vmatpush3.bf16.msra.mxu1 %v2171_v12  ;;  %v2678_v23 = vld [vmem:[%s2972_s0] sm:$0xff]  ;;  %v2683_v24 = vld [vmem:[%s2972_s0 + $0x8] sm:$0xff]  ;;  %v2176_v27 = vld [vmem:[#allocation3 + $0x20] ss:$12 sps:$4 sm:$0xff]   ;;  %vm2555_vm0 = vmmov 0   ;;  %v2699_v30 = vshrl.u32 %v219_v29, 7 }
  0x93   :  { %2044 = vmatprep.subr.bf16.mxu1 %v2554_v1  ;;  %v184_v26 = vpack.c.bf16 %v2683_v24, %v2678_v23  ;;  %v2177_v28 = vld [vmem:[#allocation3 + $0x8] ss:$12 sps:$4 sm:$0xff]   ;;  %2056 = vmatprep.mubr.msk.bf16.mxu1 %vm2555_vm0, %v2554_v1  ;;  %v217_v33 = vld [vmem:[#allocation5] sm:$0x7]  ;;  %vm449_vm1 = vcmask 523264   ;;  %vm518_vm2 = vcmask 1043456  }
  0x94   :  { %v2702_v31 = vsub.s32 1, %v2699_v30  ;;  %v2705_v32 = vsub.s32 0, %v2699_v30  ;;  %v229_v50 = vsub.s32 2, %v2699_v30  ;;  %v183_v60 = vld [vmem:[%s2973_s1] sm:$0x3]  ;;  %vm502_vm3 = vcmask 64512  }
  0x95   :  { %367 = vmatpush1.bf16.msra.mxu0 %v2154_v7  ;;  %vm682_vm4 = vcmask 1048064  }
  0x96   :  { %368 = vmatprep.subr.bf16.mxu0 %v2155_v8  ;;  %2045 = vmatpush3.bf16.msra.mxu1 %v2172_v15  ;;  %v226_v34 = vrot.slane %v217_v33, %v2702_v31  ;;  %v222_v36 = vrot.slane %v217_v33, %v2705_v32  ;;  %v230_v51 = vrot.slane %v217_v33, %v229_v50 }
  0x97   :  { %2046 = vmatprep.subr.bf16.mxu1 %v2554_v1  ;;  %v2733_v61 = vrot.slane %v183_v60, %v2705_v32 }
  0x99   :  { %369 = vmatpush1.bf16.msra.mxu0 %v2157_v9 }
  0x9a   :  { %370 = vmatprep.subr.bf16.mxu0 %v2158_v10  ;;  %2047 = vmatpush3.bf16.msra.mxu1 %v2173_v18 }
  0x9b   :  { %2048 = vmatprep.subr.bf16.mxu1 %v2554_v1 }
  0x9d   :  { %371 = vmatpush1.bf16.msra.mxu0 %v2160_v13 }
  0x9e   :  { %372 = vmatprep.subr.bf16.mxu0 %v2161_v14  ;;  %2049 = vmatpush3.bf16.msra.mxu1 %v2174_v21 }
  0x9f   :  { %2050 = vmatprep.subr.bf16.mxu1 %v2554_v1 }
  0xa1   :  { %373 = vmatpush1.bf16.msra.mxu0 %v2163_v16 }
  0xa2   :  { %374 = vmatprep.subr.bf16.mxu0 %v2164_v17  ;;  %2051 = vmatpush3.bf16.msra.mxu1 %v2175_v25  ;;  %v737_v17 = vrot.slane %v183_v60, %v2702_v31 }
  0xa3   :  { %2052 = vmatprep.subr.bf16.mxu1 %v2554_v1 }
  0xa5   :  { %375 = vmatpush1.bf16.msra.mxu0 %v2166_v19 }
  0xa6   :  { %376 = vmatprep.subr.bf16.mxu0 %v2167_v20  ;;  %2053 = vmatpush3.bf16.msra.mxu1 %v2176_v27 }
  0xa7   :  { %2054 = vmatprep.subr.bf16.mxu1 %v2554_v1 }
  0xa9   :  { %377 = vmatpush1.bf16.msra.mxu0 %v2169_v22 }
  0xaa   :  { %2084 = vmatprep.subr.bf16.mxu0 %v2554_v1  ;;  %2055 = vmatpush3.bf16.msra.mxu1 %v2177_v28 }
  0xab   :  { %2060 = vmatprep.subr.bf16.mxu1 %v2554_v1 }
  0xac   :  { %395 = vmatmul.mubr.bf16.vlgmr.msra.gmra.mxu0 %v184_v26 }
  0xad   :  { %2086 = vmatprep.mubr.msk.bf16.mxu0 %vm2555_vm0, %v2554_v1  ;;  %2057 = vmatmul.mubr.bf16.vlgmr.msra.gmra.mxu1 %v184_v26 }
  0xae   :  { %2062 = vmatprep.mubr.msk.bf16.mxu1 %vm2555_vm0, %v2554_v1 }
 0x16c   :  { %v396_v35 = vpop.f32.mrf.mxu0 }
 0x16d   :  { %v397_v40 = vadd.f32 %v396_v35, %v222_v36  ;;  %v439_v52 = vpop.f32.mrf.mxu1 }
 0x16e   :  { %v398_v37 = vpop.f32.mrf.mxu0  ;;  %v440_v53 = vadd.f32 %v439_v52, %v230_v51 }
 0x16f   :  { %v399_v38 = vadd.f32 %v398_v37, %v226_v34  ;;  %v446_v45 = vpack.c.bf16 %v397_v40, %v397_v40  ;;  %v2058_v54 = vpop.f32.mrf.mxu1 }
 0x170   :  { %v400_v39 = vpop.f32.mrf.mxu0  ;;  %v448_v55 = vpack.c.bf16 %v440_v53, %v440_v53 }
 0x171   :  { %v447_v41 = vpack.c.bf16 %v399_v38, %v399_v38  ;;  %v401_v46 = vadd.f32 %v400_v39, %v222_v36  ;;  %v442_v56 = vpop.f32.mrf.mxu1 }
 0x172   :  { %v402_v42 = vpop.f32.mrf.mxu0  ;;  %v520_v57 = vsel %vm518_vm2, %v448_v55, 0  ;;  %v2726_v58 = vadd.f32 %v442_v56, %v230_v51 }
 0x173   :  { %v454_v43 = vsel %vm449_vm1, %v447_v41, 0  ;;  %v403_v44 = vadd.f32 %v402_v42, %v226_v34  ;;  %567 = vrot.lane.b32.xlu1 %v447_v41, %s2543_s18  ;;  %v684_v49 = vpack.c.bf16 %v401_v46, %v401_v46  ;;  %v2059_v59 = vpop.f32.mrf.mxu1 }
 0x174   :  { %2061 = vmatpush3.bf16.xpose.msra.mxu1 %v454_v43 }
 0x175   :  { %v685_v47 = vpack.c.bf16 %v403_v44, %v403_v44  ;;  %2066 = vmatprep.subr.bf16.mxu1 %v2554_v1 }
 0x177   :  { %v691_v48 = vsel %vm449_vm1, %v685_v47, 0  ;;  %564 = vrot.lane.b32.xlu1 %v446_v45, %s2543_s18 }
 0x178   :  { %2085 = vmatpush3.bf16.xpose.msra.mxu0 %v691_v48 }
 0x179   :  { %2096 = vmatprep.subr.bf16.mxu0 %v2554_v1 }
 0x17b   :  { %799 = vrot.lane.b32.xlu1 %v684_v49, %s2543_s18  ;;  %2063 = vmatmul.mubr.msk.bf16.vlgmr.msra.gmra.mxu1 %vm449_vm1, %v446_v45 }
 0x17c   :  { %2068 = vmatprep.mubr.msk.bf16.mxu1 %vm2555_vm0, %v2554_v1  ;;  %2067 = vmatpush3.bf16.msra.mxu1 %v520_v57 }
 0x17d   :  { %2072 = vmatprep.subr.bf16.mxu1 %v2554_v1 }
 0x17f   :  { %2087 = vmatmul.mubr.msk.bf16.vlgmr.msra.gmra.mxu0 %vm449_vm1, %v684_v49 }
 0x180   :  { %2098 = vmatprep.mubr.msk.bf16.mxu0 %vm2555_vm0, %v2554_v1 }
 0x1e5   :  { %v568_v20 = vpop.permute.xlu1 %567 }
 0x1e6   :  { %v573_v34 = vsel %vm449_vm1, %v568_v20, 0 }
 0x1e9   :  { %v565_v26 = vpop.permute.xlu1 %564 }
 0x1ed   :  { %v800_v27 = vpop.permute.xlu1 %799 }
 0x23b   :  { %v490_v62 = vpop.f32.mrf.mxu1 }
 0x23c   :  { %v496_v63 = vmul.f32 0.125, %v490_v62 }
 0x23d   :  { %v2064_v2 = vpop.f32.mrf.mxu1 }
 0x23e   :  { %v501_v3 = vadd.f32 %v2733_v61, %v496_v63 }
 0x23f   :  { %v493_v4 = vpop.f32.mrf.mxu1  ;;  %v727_v5 = vpop.f32.mrf.mxu0 }
 0x240   :  { %v503_v6 = vsel %vm502_vm3, %v501_v3, -inf  ;;  %v733_v16 = vmul.f32 0.125, %v727_v5 }
 0x241   :  { %v2088_v7 = vpop.f32.mrf.mxu0  ;;  %504 = vmax.xlane.f32.xlu0 %v503_v6  ;;  %v2065_v8 = vpop.f32.mrf.mxu1 }
 0x242   :  { %v738_v18 = vadd.f32 %v737_v17, %v733_v16 }
 0x243   :  { %v730_v9 = vpop.f32.mrf.mxu0 }
 0x244   :  { %v739_v19 = vsel %vm502_vm3, %v738_v18, -inf }
 0x245   :  { %v2089_v10 = vpop.f32.mrf.mxu0 }
 0x246   :  { %v686_v10 = vpack.c.bf16 %v2726_v58, %v2726_v58 }
 0x2ca   :  { %v505_v11 = vpop.xlane.xlu0 %504 }
 0x2cb   :  { %v506_v12 = vsub.f32 %v501_v3, %v505_v11 }
 0x2cd   :  { %v507_v13 = vmul.f32 1.442695, %v506_v12 }
 0x2cf   :  { %2266 = vpow2.f32 %v507_v13 }
 0x2dc   :  { %v2267_v14 = vpop.eup %2266 }
 0x2dd   :  { %v509_v15 = vsel %vm502_vm3, %v2267_v14, 0.0 }
 0x2de   :  { %510 = vadd.xlane.f32.xlu0 %v509_v15 }
 0x2f4   :  { %802 = vrot.lane.b32.xlu0 %v685_v47, %s2543_s18 }
 0x313   :  { %740 = vmax.xlane.f32.xlu0 %v739_v19 }
 0x329   :  { %630 = vrot.lane.b32.xlu0 %v448_v55, %s2543_s18 }
 0x367   :  { %v511_v21 = vpop.xlane.xlu0 %510 }
 0x368   :  { %2268 = vrcp.f32 %v511_v21 }
 0x36b   :  { %v803_v22 = vpop.permute.xlu0 %802 }
 0x36c   :  { %v808_v25 = vsel %vm449_vm1, %v803_v22, 0 }
 0x36d   :  { %2097 = vmatpush3.bf16.xpose.msra.mxu0 %v808_v25 }
 0x36e   :  { %2108 = vmatprep.subr.bf16.mxu0 %v2554_v1 }
 0x374   :  { %2099 = vmatmul.mubr.msk.bf16.vlgmr.msra.gmra.mxu0 %vm449_vm1, %v800_v27  ;;  %v2178_v27 = vld [vmem:[#allocation7 + $0x38] sm:$0xff]  }
 0x375   :  { %v2269_v28 = vpop.eup %2268  ;;  %2124 = vmatprep.mubr.msk.bf16.mxu0 %vm2555_vm0, %v2554_v1  ;;  %2109 = vmatpush3.bf16.msra.mxu0 %v2178_v27  ;;  %v2210_v27 = vld [vmem:[%s2980_s8 + $0x60] ss:$16 sps:$4 sm:$0xff]  }
 0x376   :  { %v513_v29 = vmul.f32 %v2269_v28, %v2267_v14  ;;  %v2179_v28 = vld [vmem:[#allocation7 + $0x30] sm:$0xff]   ;;  %2110 = vmatprep.subr.bf16.mxu0 %v2554_v1 }
 0x378   :  { %v514_v33 = vpack.c.bf16 %v513_v29, %v513_v29  ;;  %v2180_v29 = vld [vmem:[#allocation7 + $0x28] sm:$0xff]  }
 0x379   :  { %2111 = vmatpush3.bf16.msra.mxu0 %v2179_v28  ;;  %v2213_v28 = vld [vmem:[%s2980_s8 + $0x68] ss:$16 sps:$4 sm:$0xff]  }
 0x37a   :  { %2069 = vmatmul.mubr.msk.bf16.vlgmr.msra.gmra.mxu1 %vm502_vm3, %v514_v33  ;;  %2112 = vmatprep.subr.bf16.mxu0 %v2554_v1  ;;  %v2181_v33 = vld [vmem:[#allocation7 + $0x20] sm:$0xff]  }
 0x37b   :  { %2073 = vmatpush3.bf16.xpose.msra.mxu1 %v573_v34  ;;  %2074 = vmatprep.mubr.msk.bf16.mxu1 %vm2555_vm0, %v2554_v1  ;;  %v2182_v34 = vld [vmem:[#allocation7 + $0x18] sm:$0xff]  }
 0x37c   :  { %2078 = vmatprep.subr.bf16.mxu1 %v2554_v1 }
 0x37d   :  { %2113 = vmatpush3.bf16.msra.mxu0 %v2180_v29  ;;  %v2218_v29 = vld [vmem:[%s2980_s8 + $0x44] ss:$16 sps:$4 sm:$0xff]  }
 0x37e   :  { %2114 = vmatprep.subr.bf16.mxu0 %v2554_v1 }
 0x381   :  { %2115 = vmatpush3.bf16.msra.mxu0 %v2181_v33  ;;  %v2221_v33 = vld [vmem:[%s2980_s8 + $0x4c] ss:$16 sps:$4 sm:$0xff]  }
 0x382   :  { %2075 = vmatmul.mubr.msk.bf16.vlgmr.msra.gmra.mxu1 %vm449_vm1, %v565_v26  ;;  %2116 = vmatprep.subr.bf16.mxu0 %v2554_v1 }
 0x383   :  { %2080 = vmatprep.mubr.msk.bf16.mxu1 %vm2555_vm0, %v2554_v1 }
 0x385   :  { %2117 = vmatpush3.bf16.msra.mxu0 %v2182_v34  ;;  %v2216_v34 = vld [vmem:[%s2980_s8 + $0x40] ss:$16 sps:$4 sm:$0xff]  }
 0x386   :  { %2118 = vmatprep.subr.bf16.mxu0 %v2554_v1 }
 0x39c   :  { %v741_v35 = vpop.xlane.xlu0 %740 }
 0x39d   :  { %v742_v57 = vsub.f32 %v738_v18, %v741_v35  ;;  %v755_v18 = vsel %vm518_vm2, %v686_v10, 0  ;;  %v2183_v35 = vld [vmem:[#allocation7 + $0x10] sm:$0xff]  }
 0x39e   :  { %2119 = vmatpush3.bf16.msra.mxu0 %v2183_v35  ;;  %v2219_v35 = vld [vmem:[%s2980_s8 + $0x48] ss:$16 sps:$4 sm:$0xff]  }
 0x39f   :  { %v743_v62 = vmul.f32 1.442695, %v742_v57  ;;  %2120 = vmatprep.subr.bf16.mxu0 %v2554_v1 }
 0x3a0   :  { %v631_v36 = vpop.permute.xlu0 %630 }
 0x3a1   :  { %v636_v37 = vsel %vm518_vm2, %v631_v36, 0 }
 0x3a2   :  { %2079 = vmatpush3.bf16.msra.mxu1 %v636_v37 }
 0x3a3   :  { %2090 = vmatprep.subr.bf16.mxu1 %v2554_v1 }
 0x434   :  { %v844_v38 = vpop.f32.mrf.mxu0 }
 0x435   :  { %v850_v47 = vmul.f32 0.125, %v844_v38 }
 0x436   :  { %v2100_v39 = vpop.f32.mrf.mxu0 }
 0x437   :  { %v851_v54 = vadd.f32 %v850_v47, %v737_v17  ;;  %v2184_v39 = vld [vmem:[#allocation7 + $0x8] sm:$0xff]  }
 0x438   :  { %v847_v40 = vpop.f32.mrf.mxu0  ;;  %2121 = vmatpush3.bf16.msra.mxu0 %v2184_v39  ;;  %v2225_v39 = vld [vmem:[%s2980_s8 + $0x28] ss:$16 sps:$4 sm:$0xff]  }
 0x439   :  { %v852_v56 = vsel %vm502_vm3, %v851_v54, -inf  ;;  %2122 = vmatprep.subr.bf16.mxu0 %v2554_v1 }
 0x43a   :  { %v556_v41 = vpop.f32.mrf.mxu1  ;;  %v2101_v42 = vpop.f32.mrf.mxu0 }
 0x43b   :  { %562 = vst.msk [vmem:[#allocation2] sm:$0xff] %vm449_vm1, %v556_v41  ;;  %v2185_v41 = vld [vmem:[#allocation7] sm:$0xff]  }
 0x43c   :  { %v2070_v43 = vpop.f32.mrf.mxu1  ;;  %2123 = vmatpush3.bf16.msra.mxu0 %v2185_v41  ;;  %v2233_v41 = vld [vmem:[%s2980_s8 + $0xc] ss:$16 sps:$4 sm:$0xff]  }
 0x43e   :  { %v559_v44 = vpop.f32.mrf.mxu1 }
 0x440   :  { %v2071_v45 = vpop.f32.mrf.mxu1 }
 0x442   :  { %v609_v46 = vpop.f32.mrf.mxu1 }
 0x443   :  { %v615_v48 = vmul.f32 0.125, %v609_v46 }
 0x444   :  { %v2076_v49 = vpop.f32.mrf.mxu1 }
 0x445   :  { %v616_v51 = vadd.f32 %v615_v48, %v2733_v61 }
 0x446   :  { %v612_v52 = vpop.f32.mrf.mxu1 }
 0x447   :  { %v617_v53 = vsel %vm502_vm3, %v616_v51, -inf }
 0x448   :  { %618 = vmax.xlane.f32.xlu1 %v617_v53  ;;  %v2077_v55 = vpop.f32.mrf.mxu1 }
 0x449   :  { %v1884_v55 = vld [vmem:[#allocation8] ss:$0 sm:$0xff] }
 0x44c   :  { %853 = vmax.xlane.f32.xlu1 %v852_v56 }
 0x4d1   :  { %v619_v59 = vpop.xlane.xlu1 %618 }
 0x4d2   :  { %v620_v60 = vsub.f32 %v616_v51, %v619_v59 }
 0x4d4   :  { %v621_v63 = vmul.f32 1.442695, %v620_v60 }
 0x4d5   :  { %v854_v2 = vpop.xlane.xlu1 %853 }
 0x4d6   :  { %2270 = vpow2.f32 %v621_v63  ;;  %v855_v3 = vsub.f32 %v851_v54, %v854_v2 }
 0x4d7   :  { %2272 = vpow2.f32 %v743_v62 }
 0x4d8   :  { %v856_v4 = vmul.f32 1.442695, %v855_v3 }
 0x4da   :  { %2274 = vpow2.f32 %v856_v4  ;;  %v2186_v4 = vld [vmem:[%s2980_s8 + $0xe0] ss:$16 sps:$4 sm:$0xff]  }
 0x4e3   :  { %v2271_v61 = vpop.eup %2270 }
 0x4e4   :  { %v623_v5 = vsel %vm502_vm3, %v2271_v61, 0.0  ;;  %v2273_v6 = vpop.eup %2272 }
 0x4e5   :  { %624 = vadd.xlane.f32.xlu1 %v623_v5  ;;  %v745_v7 = vsel %vm502_vm3, %v2273_v6, 0.0 }
 0x4e7   :  { %v2275_v8 = vpop.eup %2274 }
 0x4e8   :  { %v858_v9 = vsel %vm502_vm3, %v2275_v8, 0.0 }
 0x4e9   :  { %746 = vadd.xlane.f32.xlu1 %v745_v7 }
 0x4ed   :  { %859 = vadd.xlane.f32.xlu1 %v858_v9 }
 0x4fe   :  { %865 = vrot.lane.b32.xlu1 %v686_v10, %s2543_s18 }
 0x56e   :  { %v625_v11 = vpop.xlane.xlu1 %624 }
 0x56f   :  { %2276 = vrcp.f32 %v625_v11 }
 0x572   :  { %v747_v12 = vpop.xlane.xlu1 %746 }
 0x573   :  { %2278 = vrcp.f32 %v747_v12  ;;  %v2194_v12 = vld [vmem:[%s2980_s8 + $0xc4] ss:$16 sps:$4 sm:$0xff]  }
 0x576   :  { %v860_v13 = vpop.xlane.xlu1 %859 }
 0x577   :  { %2280 = vrcp.f32 %v860_v13  ;;  %v2197_v13 = vld [vmem:[%s2980_s8 + $0xcc] ss:$16 sps:$4 sm:$0xff]  }
 0x57a   :  { %v866_v19 = vpop.permute.xlu1 %865 }
 0x57b   :  { %v871_v22 = vsel %vm518_vm2, %v866_v19, 0  ;;  %v2204_v19 = vld [vmem:[%s2980_s8 + $0x80] ss:$16 sps:$4 sm:$0xff]  }
 0x57c   :  { %v2277_v14 = vpop.eup %2276 }
 0x57d   :  { %v627_v15 = vmul.f32 %v2277_v14, %v2271_v61  ;;  %v2189_v61 = vld [vmem:[%s2980_s8 + $0xe8] ss:$16 sps:$4 sm:$0xff]   ;;  %v2192_v14 = vld [vmem:[%s2980_s8 + $0xc0] ss:$16 sps:$4 sm:$0xff]  }
 0x57f   :  { %v628_v16 = vpack.c.bf16 %v627_v15, %v627_v15  ;;  %v2195_v15 = vld [vmem:[%s2980_s8 + $0xc8] ss:$16 sps:$4 sm:$0xff]  }
 0x580   :  { %v2279_v17 = vpop.eup %2278 }
 0x581   :  { %2081 = vmatmul.mubr.msk.bf16.vlgmr.msra.gmra.mxu1 %vm502_vm3, %v628_v16  ;;  %v749_v58 = vmul.f32 %v2279_v17, %v2273_v6  ;;  %v2200_v16 = vld [vmem:[%s2980_s8 + $0xa4] ss:$16 sps:$4 sm:$0xff]   ;;  %v2203_v17 = vld [vmem:[%s2980_s8 + $0xac] ss:$16 sps:$4 sm:$0xff]  }
 0x582   :  { %2091 = vmatpush3.bf16.msra.mxu1 %v755_v18  ;;  %2092 = vmatprep.mubr.msk.bf16.mxu1 %vm2555_vm0, %v2554_v1  ;;  %v2198_v18 = vld [vmem:[%s2980_s8 + $0xa0] ss:$16 sps:$4 sm:$0xff]  }
 0x583   :  { %2102 = vmatprep.subr.bf16.mxu1 %v2554_v1  ;;  %v750_v20 = vpack.c.bf16 %v749_v58, %v749_v58  ;;  %v2201_v58 = vld [vmem:[%s2980_s8 + $0xa8] ss:$16 sps:$4 sm:$0xff]  }
 0x584   :  { %v2281_v21 = vpop.eup %2280 }
 0x585   :  { %v862_v25 = vmul.f32 %v2281_v21, %v2275_v8  ;;  %v2207_v21 = vld [vmem:[%s2980_s8 + $0x88] ss:$16 sps:$4 sm:$0xff]  }
 0x587   :  { %v863_v26 = vpack.c.bf16 %v862_v25, %v862_v25  ;;  %v2212_v25 = vld [vmem:[%s2980_s8 + $0x64] ss:$16 sps:$4 sm:$0xff]  }
 0x589   :  { %2093 = vmatmul.mubr.msk.bf16.vlgmr.msra.gmra.mxu1 %vm502_vm3, %v750_v20  ;;  %v2206_v20 = vld [vmem:[%s2980_s8 + $0x84] ss:$16 sps:$4 sm:$0xff]  }
 0x58a   :  { %2103 = vmatpush3.bf16.msra.mxu1 %v871_v22  ;;  %2104 = vmatprep.mubr.msk.bf16.mxu1 %vm2555_vm0, %v2554_v1  ;;  %v2209_v22 = vld [vmem:[%s2980_s8 + $0x8c] ss:$16 sps:$4 sm:$0xff]  }
 0x591   :  { %2105 = vmatmul.mubr.msk.bf16.vlgmr.msra.gmra.mxu1 %vm502_vm3, %v863_v26  ;;  %v2215_v26 = vld [vmem:[%s2980_s8 + $0x6c] ss:$16 sps:$4 sm:$0xff]  }
 0x592   :  { %1323 = vmatprep.mubr.bf16.mxu1 %v2553_v0 }
 0x641   :  { %v672_v36 = vpop.f32.mrf.mxu1 }
 0x642   :  { %679 = vrot.lane.b32.xlu1 %v672_v36, %s2543_s18  ;;  %v2224_v36 = vld [vmem:[%s2980_s8 + $0x24] ss:$16 sps:$4 sm:$0xff]  }
 0x643   :  { %v2082_v37 = vpop.f32.mrf.mxu1 }
 0x644   :  { %v2227_v37 = vld [vmem:[%s2980_s8 + $0x2c] ss:$16 sps:$4 sm:$0xff]  }
 0x645   :  { %v675_v38 = vpop.f32.mrf.mxu1 }
 0x646   :  { %v2222_v38 = vld [vmem:[%s2980_s8 + $0x20] ss:$16 sps:$4 sm:$0xff]  }
 0x647   :  { %v2083_v40 = vpop.f32.mrf.mxu1 }
 0x648   :  { %v2230_v40 = vld [vmem:[%s2980_s8 + $0x4] ss:$16 sps:$4 sm:$0xff]  }
 0x649   :  { %v791_v42 = vpop.f32.mrf.mxu1 }
 0x64a   :  { %797 = vst.msk [vmem:[#allocation2 + $0x8] sm:$0xff] %vm449_vm1, %v791_v42  ;;  %v2228_v42 = vld [vmem:[%s2980_s8] ss:$16 sps:$4 sm:$0xff]  }
 0x64b   :  { %v2094_v43 = vpop.f32.mrf.mxu1 }
 0x64c   :  { %v2231_v43 = vld [vmem:[%s2980_s8 + $0x8] ss:$16 sps:$4 sm:$0xff]  }
 0x64d   :  { %v794_v44 = vpop.f32.mrf.mxu1 }
 0x64f   :  { %v2095_v45 = vpop.f32.mrf.mxu1 }
 0x651   :  { %v907_v46 = vpop.f32.mrf.mxu1 }
 0x652   :  { %914 = vrot.lane.b32.xlu0 %v907_v46, %s2543_s18 }
 0x653   :  { %v2106_v47 = vpop.f32.mrf.mxu1 }
 0x655   :  { %v910_v48 = vpop.f32.mrf.mxu1 }
 0x657   :  { %v2107_v49 = vpop.f32.mrf.mxu1 }
 0x6b4   :  { %v680_v51 = vpop.permute.xlu1 %679 }
 0x6b5   :  { %683 = vst.msk [vmem:[#allocation2] sm:$0xff] %vm682_vm4, %v680_v51 }
 0x6bc   :  { %v918_v53 = vld [vmem:[#allocation2] sm:$0xff] }
 0x6c4   :  { %v915_v52 = vpop.permute.xlu0 %914 }
 0x6c5   :  { %917 = vst.msk [vmem:[#allocation2 + $0x8] sm:$0xff] %vm682_vm4, %v915_v52 }
 0x6cc   :  { %v919_v1 = vld [vmem:[#allocation2 + $0x8] sm:$0xff] }
 0x6cd   :  { %v920_v54 = vpack.c.bf16 %v919_v1, %v918_v53  ;;  %v1893_v53 = vld [vmem:[#allocation10] ss:$0 sm:$0xff] }
 0x6cf   :  { %2125 = vmatmul.mubr.bf16.vlgmr.msra.gmra.mxu0 %v920_v54 }
 0x6d0   :  { %1366 = vmatprep.mubr.bf16.mxu0 %v2553_v0  ;;  %v2188_v0 = vld [vmem:[%s2980_s8 + $0xe4] ss:$16 sps:$4 sm:$0xff]  }
 0x6d1   :  { %1291 = vmatprep.subr.bf16.mxu1 %v2188_v0  ;;  %v2238_v0 = vld [vmem:[#allocation14 + $0x70] sm:$0xff]  }
 0x6d2   :  { %1292 = vmatpush1.bf16.msra.mxu1 %v2186_v4  ;;  %v2237_v4 = vld [vmem:[#allocation14 + $0xb8] sm:$0xff]  }
 0x6d3   :  { %1293 = vmatprep.subr.bf16.mxu1 %v2194_v12  ;;  %v2249_v12 = vld [vmem:[#allocation14 + $0xa0] sm:$0xff]  }
 0x6d6   :  { %1294 = vmatpush1.bf16.msra.mxu1 %v2192_v14  ;;  %v2251_v14 = vld [vmem:[#allocation14 + $0xd8] sm:$0xff]  }
 0x6d7   :  { %1295 = vmatprep.subr.bf16.mxu1 %v2200_v16  ;;  %v2253_v16 = vld [vmem:[#allocation14 + $0x98] sm:$0xff]  }
 0x6da   :  { %1296 = vmatpush1.bf16.msra.mxu1 %v2198_v18  ;;  %v2255_v18 = vld [vmem:[#allocation14 + $0xd0] sm:$0xff]  }
 0x6db   :  { %1297 = vmatprep.subr.bf16.mxu1 %v2206_v20  ;;  %v2258_v20 = vld [vmem:[#allocation14 + $0x48] sm:$0xff]  }
 0x6de   :  { %1298 = vmatpush1.bf16.msra.mxu1 %v2204_v19  ;;  %v2257_v19 = vld [vmem:[#allocation14 + $0x90] sm:$0xff]  }
 0x6df   :  { %1299 = vmatprep.subr.bf16.mxu1 %v2212_v25  ;;  %v2261_v25 = vld [vmem:[#allocation14 + $0x88] sm:$0xff]  }
 0x6e2   :  { %1300 = vmatpush1.bf16.msra.mxu1 %v2210_v27  ;;  %v2263_v27 = vld [vmem:[#allocation14 + $0xc0] sm:$0xff]  }
 0x6e3   :  { %1301 = vmatprep.subr.bf16.mxu1 %v2218_v29  ;;  %v2265_v29 = vld [vmem:[#allocation14 + $0x80] sm:$0xff]  }
 0x6e6   :  { %1302 = vmatpush1.bf16.msra.mxu1 %v2216_v34  ;;  %v1125_v34 = vsub.s32 3, %v2699_v30 }
 0x6e7   :  { %1303 = vmatprep.subr.bf16.mxu1 %v2224_v36 }
 0x6ea   :  { %1304 = vmatpush1.bf16.msra.mxu1 %v2222_v38 }
 0x6eb   :  { %1305 = vmatprep.subr.bf16.mxu1 %v2230_v40 }
 0x6ee   :  { %1306 = vmatpush1.bf16.msra.mxu1 %v2228_v42 }
 0x78f   :  { %v1026_v56 = vpop.f32.mrf.mxu0 }
 0x790   :  { %v1027_v57 = vadd.f32 %v1884_v55, %v1026_v56  ;;  %v1894_v56 = vld [vmem:[#allocation11] ss:$0 sm:$0xff] }
 0x791   :  { %v2126_v59 = vpop.f32.mrf.mxu0 }
 0x792   :  { %v1033_v60 = vadd.f32 %v1027_v57, %v2678_v23  ;;  %v2191_v23 = vld [vmem:[%s2980_s8 + $0xec] ss:$16 sps:$4 sm:$0xff]  }
 0x793   :  { %v1029_v62 = vpop.f32.mrf.mxu0  ;;  %1334 = vmatprep.subr.bf16.mxu0 %v2191_v23  ;;  %v2240_v23 = vld [vmem:[#allocation14 + $0x30] sm:$0xff]  }
 0x794   :  { %v1030_v63 = vadd.f32 %v1884_v55, %v1029_v62  ;;  %1037 = vadd.xlane.f32.xlu1 %v1033_v60  ;;  %1335 = vmatpush1.bf16.msra.mxu0 %v2189_v61  ;;  %v2239_v61 = vld [vmem:[#allocation14 + $0xf0] sm:$0xff]  }
 0x795   :  { %v2127_v2 = vpop.f32.mrf.mxu0  ;;  %1336 = vmatprep.subr.bf16.mxu0 %v2197_v13  ;;  %v2250_v13 = vld [vmem:[#allocation14 + $0x58] sm:$0xff]  }
 0x796   :  { %v1034_v3 = vadd.f32 %v1030_v63, %v2683_v24  ;;  %v2234_v63 = vld [vmem:[#allocation14 + $0x78] sm:$0xff]  }
 0x797   :  { %v2235_v2 = vld [vmem:[#allocation14 + $0xf8] sm:$0xff]   ;;  %1996 = vmatprep.subr.bf16.mxu1 %v2234_v63 }
 0x798   :  { %1039 = vadd.xlane.f32.xlu0 %v1034_v3  ;;  %1337 = vmatpush1.bf16.msra.mxu0 %v2195_v15  ;;  %v2252_v15 = vld [vmem:[#allocation14 + $0x18] sm:$0xff]  }
 0x799   :  { %1338 = vmatprep.subr.bf16.mxu0 %v2203_v17  ;;  %v2254_v17 = vld [vmem:[#allocation14 + $0x50] sm:$0xff]  }
 0x79c   :  { %1339 = vmatpush1.bf16.msra.mxu0 %v2201_v58  ;;  %v2256_v58 = vld [vmem:[#allocation14 + $0x10] sm:$0xff]  }
 0x79d   :  { %1340 = vmatprep.subr.bf16.mxu0 %v2209_v22  ;;  %v2260_v22 = vld [vmem:[#allocation14 + $0x8] sm:$0xff]  }
 0x7a0   :  { %1341 = vmatpush1.bf16.msra.mxu0 %v2207_v21  ;;  %v2259_v21 = vld [vmem:[#allocation14 + $0xc8] sm:$0xff]  }
 0x7a1   :  { %1342 = vmatprep.subr.bf16.mxu0 %v2215_v26  ;;  %v2262_v26 = vld [vmem:[#allocation14 + $0x40] sm:$0xff]  }
 0x7a4   :  { %1343 = vmatpush1.bf16.msra.mxu0 %v2213_v28  ;;  %v2264_v28 = vld [vmem:[#allocation14] sm:$0xff]  }
 0x7a5   :  { %1344 = vmatprep.subr.bf16.mxu0 %v2221_v33  ;;  %v1109_v33 = vld [vmem:[#allocation13] sm:$0xf] }
 0x7a6   :  { %v1122_v36 = vrot.slane %v1109_v33, %v229_v50  ;;  %v1126_v38 = vrot.slane %v1109_v33, %v1125_v34 }
 0x7a8   :  { %1345 = vmatpush1.bf16.msra.mxu0 %v2219_v35  ;;  %v1114_v35 = vrot.slane %v1109_v33, %v2705_v32 }
 0x7a9   :  { %1346 = vmatprep.subr.bf16.mxu0 %v2227_v37  ;;  %v1118_v37 = vrot.slane %v1109_v33, %v2702_v31 }
 0x7ac   :  { %1347 = vmatpush1.bf16.msra.mxu0 %v2225_v39 }
 0x7ad   :  { %1348 = vmatprep.subr.bf16.mxu0 %v2233_v41 }
 0x7b0   :  { %1349 = vmatpush1.bf16.msra.mxu0 %v2231_v43 }
 0x7b1   :  { %2018 = vmatprep.subr.bf16.mxu0 %v2235_v2 }
 0x81d   :  { %v1038_v24 = vpop.xlane.xlu1 %1037 }
 0x81e   :  { %v1042_v5 = vmul.f32 0.0078125, %v1038_v24  ;;  %v2241_v24 = vld [vmem:[#allocation14 + $0xb0] sm:$0xff]  }
 0x820   :  { %v2803_v6 = vsub.f32 %v1033_v60, %v1042_v5  ;;  %v2242_v5 = vld [vmem:[#allocation14 + $0x68] sm:$0xff]  }
 0x821   :  { %v1040_v7 = vpop.xlane.xlu0 %1039 }
 0x822   :  { %v1043_v8 = vmul.f32 0.0078125, %v1040_v7  ;;  %v1046_v9 = vmul.f32 %v2803_v6, %v2803_v6  ;;  %v2244_v7 = vld [vmem:[#allocation14 + $0x28] sm:$0xff]  }
 0x824   :  { %v2807_v10 = vsub.f32 %v1034_v3, %v1043_v8  ;;  %1048 = vadd.xlane.f32.xlu0 %v1046_v9  ;;  %v2236_v3 = vld [vmem:[#allocation14 + $0x38] sm:$0xff]   ;;  %v2245_v8 = vld [vmem:[#allocation14 + $0xa8] sm:$0xff]   ;;  %v2246_v9 = vld [vmem:[#allocation14 + $0x60] sm:$0xff]  }
 0x826   :  { %v1047_v11 = vmul.f32 %v2807_v10, %v2807_v10 }
 0x828   :  { %1050 = vadd.xlane.f32.xlu1 %v1047_v11  ;;  %v2248_v11 = vld [vmem:[#allocation14 + $0x20] sm:$0xff]  }
 0x8ad   :  { %v1049_v44 = vpop.xlane.xlu0 %1048 }
 0x8ae   :  { %v1052_v45 = vmul.f32 0.0078125, %v1049_v44 }
 0x8b0   :  { %v1054_v46 = vadd.f32 1e-12, %v1052_v45 }
 0x8b1   :  { %v1051_v47 = vpop.xlane.xlu1 %1050 }
 0x8b2   :  { %2282 = vrsqrt.f32 %v1054_v46  ;;  %v1053_v48 = vmul.f32 0.0078125, %v1051_v47 }
 0x8b4   :  { %v1055_v49 = vadd.f32 1e-12, %v1053_v48 }
 0x8b6   :  { %2284 = vrsqrt.f32 %v1055_v49 }
 0x8bf   :  { %v2283_v51 = vpop.eup %2282 }
 0x8c0   :  { %v1058_v52 = vmul.f32 %v2283_v51, %v2803_v6  ;;  %v2243_v6 = vld [vmem:[#allocation14 + $0xe8] sm:$0xff]  }
 0x8c2   :  { %v1066_v55 = vmul.f32 %v1893_v53, %v1058_v52 }
 0x8c3   :  { %v2285_v1 = vpop.eup %2284 }
 0x8c4   :  { %v1059_v54 = vmul.f32 %v2285_v1, %v2807_v10  ;;  %v2897_v59 = vadd.f32 %v1894_v56, %v1066_v55  ;;  %v2247_v10 = vld [vmem:[#allocation14 + $0xe0] sm:$0xff]  }
 0x8c6   :  { %v1067_v57 = vmul.f32 %v1893_v53, %v1059_v54 }
 0x8c8   :  { %v2899_v60 = vadd.f32 %v1894_v56, %v1067_v57 }
 0x8ca   :  { %v1076_v62 = vpack.c.bf16 %v2899_v60, %v2897_v59 }
 0x8cc   :  { %1324 = vmatmul.mubr.bf16.vlgmr.msra.gmra.mxu1 %v1076_v62  ;;  %1367 = vmatmul.mubr.bf16.vlgmr.msra.gmra.mxu0 %v1076_v62 }
 0x8cd   :  { %1997 = vmatpush3.bf16.msra.mxu1 %v2236_v3  ;;  %2019 = vmatpush3.bf16.msra.mxu0 %v2237_v4 }
 0x8ce   :  { %1998 = vmatprep.subr.bf16.mxu1 %v2238_v0  ;;  %2020 = vmatprep.subr.bf16.mxu0 %v2239_v61 }
 0x8d1   :  { %1999 = vmatpush3.bf16.msra.mxu1 %v2240_v23  ;;  %2021 = vmatpush3.bf16.msra.mxu0 %v2241_v24 }
 0x8d2   :  { %2000 = vmatprep.subr.bf16.mxu1 %v2242_v5  ;;  %2022 = vmatprep.subr.bf16.mxu0 %v2243_v6 }
 0x8d5   :  { %2001 = vmatpush3.bf16.msra.mxu1 %v2244_v7  ;;  %2023 = vmatpush3.bf16.msra.mxu0 %v2245_v8 }
 0x8d6   :  { %2002 = vmatprep.subr.bf16.mxu1 %v2246_v9  ;;  %2024 = vmatprep.subr.bf16.mxu0 %v2247_v10 }
 0x8d9   :  { %2003 = vmatpush3.bf16.msra.mxu1 %v2248_v11  ;;  %2025 = vmatpush3.bf16.msra.mxu0 %v2249_v12 }
 0x8da   :  { %2004 = vmatprep.subr.bf16.mxu1 %v2250_v13  ;;  %2026 = vmatprep.subr.bf16.mxu0 %v2251_v14 }
 0x8dd   :  { %2005 = vmatpush3.bf16.msra.mxu1 %v2252_v15  ;;  %2027 = vmatpush3.bf16.msra.mxu0 %v2253_v16 }
 0x8de   :  { %2006 = vmatprep.subr.bf16.mxu1 %v2254_v17  ;;  %2028 = vmatprep.subr.bf16.mxu0 %v2255_v18 }
 0x8e1   :  { %2007 = vmatpush3.bf16.msra.mxu1 %v2256_v58  ;;  %2029 = vmatpush3.bf16.msra.mxu0 %v2257_v19 }
 0x8e2   :  { %2008 = vmatprep.subr.bf16.mxu1 %v2258_v20  ;;  %2030 = vmatprep.subr.bf16.mxu0 %v2259_v21 }
 0x8e5   :  { %2009 = vmatpush3.bf16.msra.mxu1 %v2260_v22  ;;  %2031 = vmatpush3.bf16.msra.mxu0 %v2261_v25 }
 0x8e6   :  { %2010 = vmatprep.subr.bf16.mxu1 %v2262_v26  ;;  %2032 = vmatprep.subr.bf16.mxu0 %v2263_v27 }
 0x8e9   :  { %2011 = vmatpush3.bf16.msra.mxu1 %v2264_v28  ;;  %2033 = vmatpush3.bf16.msra.mxu0 %v2265_v29 }
 0x98c   :  { %v1325_v39 = vpop.f32.mrf.mxu1  ;;  %v1368_v40 = vpop.f32.mrf.mxu0 }
 0x98d   :  { %v2908_v41 = vadd.f32 %v1325_v39, %v1114_v35  ;;  %v2910_v42 = vadd.f32 %v1368_v40, %v1122_v36 }
 0x98e   :  { %v1327_v43 = vpop.f32.mrf.mxu1  ;;  %v1370_v44 = vpop.f32.mrf.mxu0 }
 0x98f   :  { %v1377_v45 = vmul.f32 %v2908_v41, %v2908_v41  ;;  %v1379_v32 = vmul.f32 %v2910_v42, %v2910_v42  ;;  %v2916_v46 = vadd.f32 %v1327_v43, %v1118_v37  ;;  %v2918_v30 = vadd.f32 %v1370_v44, %v1126_v38 }
 0x990   :  { %v1329_v31 = vpop.f32.mrf.mxu1  ;;  %v1372_v50 = vpop.f32.mrf.mxu0 }
 0x991   :  { %v1385_v47 = vmul.f32 %v1377_v45, %v2908_v41  ;;  %v1387_v48 = vmul.f32 %v1379_v32, %v2910_v42  ;;  %v1378_v49 = vmul.f32 %v2916_v46, %v2916_v46  ;;  %v1380_v51 = vmul.f32 %v2918_v30, %v2918_v30 }
 0x992   :  { %v2926_v52 = vadd.f32 %v1329_v31, %v1114_v35  ;;  %v2928_v53 = vadd.f32 %v1372_v50, %v1122_v36  ;;  %v1331_v1 = vpop.f32.mrf.mxu1  ;;  %v1374_v54 = vpop.f32.mrf.mxu0 }
 0x993   :  { %v1393_v55 = vmul.f32 0.044715, %v1385_v47  ;;  %v1395_v56 = vmul.f32 0.044715, %v1387_v48  ;;  %v1386_v57 = vmul.f32 %v1378_v49, %v2916_v46  ;;  %v1388_v62 = vmul.f32 %v1380_v51, %v2918_v30 }
 0x994   :  { %v1381_v63 = vmul.f32 %v2926_v52, %v2926_v52  ;;  %v1383_v2 = vmul.f32 %v2928_v53, %v2928_v53  ;;  %v2936_v3 = vadd.f32 %v1331_v1, %v1118_v37  ;;  %v2938_v4 = vadd.f32 %v1374_v54, %v1126_v38 }
 0x995   :  { %v1401_v0 = vadd.f32 %v1393_v55, %v2908_v41  ;;  %v1403_v61 = vadd.f32 %v1395_v56, %v2910_v42  ;;  %v1394_v23 = vmul.f32 0.044715, %v1386_v57  ;;  %v1396_v24 = vmul.f32 0.044715, %v1388_v62 }
 0x996   :  { %v1389_v5 = vmul.f32 %v1381_v63, %v2926_v52  ;;  %v1391_v6 = vmul.f32 %v1383_v2, %v2928_v53  ;;  %v1382_v7 = vmul.f32 %v2936_v3, %v2936_v3  ;;  %v1384_v8 = vmul.f32 %v2938_v4, %v2938_v4 }
 0x997   :  { %v1409_v9 = vmul.f32 0.7978846, %v1401_v0  ;;  %v1411_v10 = vmul.f32 0.7978846, %v1403_v61  ;;  %v1402_v11 = vadd.f32 %v1394_v23, %v2916_v46  ;;  %v1404_v12 = vadd.f32 %v1396_v24, %v2918_v30 }
 0x998   :  { %v1397_v13 = vmul.f32 0.044715, %v1389_v5  ;;  %v1399_v14 = vmul.f32 0.044715, %v1391_v6  ;;  %v1390_v15 = vmul.f32 %v1382_v7, %v2936_v3  ;;  %v1392_v16 = vmul.f32 %v1384_v8, %v2938_v4 }
 0x999   :  { %2286 = vtanh.f32 %v1409_v9  ;;  %v1410_v17 = vmul.f32 0.7978846, %v1402_v11  ;;  %v1412_v18 = vmul.f32 0.7978846, %v1404_v12 }
 0x99a   :  { %2288 = vtanh.f32 %v1411_v10  ;;  %v1405_v58 = vadd.f32 %v1397_v13, %v2926_v52  ;;  %v1407_v19 = vadd.f32 %v1399_v14, %v2928_v53  ;;  %v1398_v20 = vmul.f32 0.044715, %v1390_v15  ;;  %v1927_v10 = vld [vmem:[#allocation16] ss:$0 sm:$0xff] }
 0x99b   :  { %2290 = vtanh.f32 %v1410_v17  ;;  %v1400_v21 = vmul.f32 0.044715, %v1392_v16 }
 0x99c   :  { %2292 = vtanh.f32 %v1412_v18  ;;  %v1413_v22 = vmul.f32 0.7978846, %v1405_v58  ;;  %v1415_v25 = vmul.f32 0.7978846, %v1407_v19  ;;  %v1406_v26 = vadd.f32 %v1398_v20, %v2936_v3 }
 0x99d   :  { %v1408_v27 = vadd.f32 %v1400_v21, %v2938_v4 }
 0x99e   :  { %2294 = vtanh.f32 %v1413_v22  ;;  %v1414_v28 = vmul.f32 0.7978846, %v1406_v26 }
 0x99f   :  { %2296 = vtanh.f32 %v1415_v25  ;;  %v1416_v29 = vmul.f32 0.7978846, %v1408_v27 }
 0x9a0   :  { %2298 = vtanh.f32 %v1414_v28 }
 0x9a1   :  { %2300 = vtanh.f32 %v1416_v29 }
 0x9a6   :  { %v2287_v33 = vpop.eup %2286 }
 0x9a7   :  { %v2289_v34 = vpop.eup %2288  ;;  %v1425_v39 = vadd.f32 1.0, %v2287_v33 }
 0x9a8   :  { %v2291_v35 = vpop.eup %2290  ;;  %v1427_v44 = vadd.f32 1.0, %v2289_v34 }
 0x9a9   :  { %v2293_v36 = vpop.eup %2292  ;;  %v1426_v37 = vadd.f32 1.0, %v2291_v35  ;;  %v1433_v51 = vmul.f32 0.5, %v1425_v39  ;;  %v1960_v39 = vld [vmem:[#allocation17] ss:$0 sm:$0xff] }
 0x9aa   :  { %v1428_v40 = vadd.f32 1.0, %v2293_v36  ;;  %v1435_v56 = vmul.f32 0.5, %v1427_v44 }
 0x9ab   :  { %v2295_v38 = vpop.eup %2294  ;;  %v1434_v49 = vmul.f32 0.5, %v1426_v37  ;;  %v1441_v23 = vmul.f32 %v1433_v51, %v2908_v41 }
 0x9ac   :  { %v2297_v43 = vpop.eup %2296  ;;  %v1429_v45 = vadd.f32 1.0, %v2295_v38  ;;  %v1436_v55 = vmul.f32 0.5, %v1428_v40  ;;  %v1443_v6 = vmul.f32 %v1435_v56, %v2910_v42 }
 0x9ad   :  { %v2299_v32 = vpop.eup %2298  ;;  %v1431_v31 = vadd.f32 1.0, %v2297_v43  ;;  %v1442_v0 = vmul.f32 %v1434_v49, %v2916_v46  ;;  %v1961_v43 = vld [vmem:[#allocation19] ss:$0 sm:$0xff] }
 0x9ae   :  { %v2301_v50 = vpop.eup %2300  ;;  %v1437_v47 = vmul.f32 0.5, %v1429_v45  ;;  %v1430_v48 = vadd.f32 1.0, %v2299_v32  ;;  %v1444_v24 = vmul.f32 %v1436_v55, %v2918_v30 }
 0x9af   :  { %v1439_v1 = vmul.f32 0.5, %v1431_v31  ;;  %v1432_v54 = vadd.f32 1.0, %v2301_v50 }
 0x9b0   :  { %v1438_v57 = vmul.f32 0.5, %v1430_v48  ;;  %v1445_v62 = vmul.f32 %v1437_v47, %v2926_v52 }
 0x9b1   :  { %v1440_v63 = vmul.f32 0.5, %v1432_v54  ;;  %v1447_v2 = vmul.f32 %v1439_v1, %v2928_v53 }
 0x9b2   :  { %v1446_v61 = vmul.f32 %v1438_v57, %v2936_v3  ;;  %v1449_v9 = vpack.c.bf16 %v1445_v62, %v1441_v23 }
 0x9b3   :  { %v1448_v5 = vmul.f32 %v1440_v63, %v2938_v4  ;;  %v1451_v52 = vpack.c.bf16 %v1447_v2, %v1443_v6 }
 0x9b4   :  { %v1450_v7 = vpack.c.bf16 %v1446_v61, %v1442_v0 }
 0x9b5   :  { %v1452_v8 = vpack.c.bf16 %v1448_v5, %v1444_v24 }
 0x9b6   :  { %1748 = vmatprep.mubr.bf16.mxu1 %v1450_v7 }
 0x9b7   :  { %1789 = vmatprep.mubr.bf16.mxu0 %v1452_v8  ;;  %1749 = vmatmul.mubr.bf16.vlgmr.msra.gmra.mxu1 %v1449_v9 }
 0x9b8   :  { %1790 = vmatmul.mubr.bf16.vlgmr.msra.gmra.mxu0 %v1451_v52 }
 0xa77   :  { %v2012_v53 = vpop.f32.mrf.mxu1 }
 0xa78   :  { %v2034_v46 = vpop.f32.mrf.mxu0 }
 0xa79   :  { %v2013_v3 = vpop.f32.mrf.mxu1 }
 0xa7a   :  { %v2014_v11 = vadd.f32 %v2013_v3, %v2012_v53  ;;  %v2035_v41 = vpop.f32.mrf.mxu0 }
 0xa7b   :  { %v2015_v12 = vpop.f32.mrf.mxu1  ;;  %v2036_v13 = vadd.f32 %v2035_v41, %v2034_v46 }
 0xa7c   :  { %v1751_v30 = vadd.f32 %v2014_v11, %v1927_v10  ;;  %v2037_v4 = vpop.f32.mrf.mxu0 }
 0xa7d   :  { %v2016_v14 = vpop.f32.mrf.mxu1 }
 0xa7e   :  { %v1792_v42 = vadd.f32 %v2036_v13, %v1751_v30  ;;  %v2017_v15 = vadd.f32 %v2016_v14, %v2015_v12  ;;  %v2038_v16 = vpop.f32.mrf.mxu0 }
 0xa7f   :  { %v2039_v18 = vadd.f32 %v2038_v16, %v2037_v4 }
 0xa80   :  { %v1754_v17 = vadd.f32 %v2017_v15, %v1927_v10  ;;  %v1798_v58 = vadd.f32 %v1792_v42, %v2897_v59 }
 0xa82   :  { %v1795_v19 = vadd.f32 %v2039_v18, %v1754_v17  ;;  %1802 = vadd.xlane.f32.xlu0 %v1798_v58 }
 0xa84   :  { %v1799_v20 = vadd.f32 %v1795_v19, %v2899_v60 }
 0xa86   :  { %1804 = vadd.xlane.f32.xlu1 %v1799_v20 }
 0xb0b   :  { %v1803_v21 = vpop.xlane.xlu0 %1802 }
 0xb0c   :  { %v1806_v22 = vmul.f32 0.0078125, %v1803_v21 }
 0xb0e   :  { %v1808_v25 = vsub.f32 %v1798_v58, %v1806_v22 }
 0xb0f   :  { %v1805_v26 = vpop.xlane.xlu1 %1804 }
 0xb10   :  { %v1807_v27 = vmul.f32 0.0078125, %v1805_v26  ;;  %v1810_v28 = vmul.f32 %v1808_v25, %v1808_v25 }
 0xb12   :  { %v1809_v29 = vsub.f32 %v1799_v20, %v1807_v27  ;;  %1812 = vadd.xlane.f32.xlu0 %v1810_v28 }
 0xb14   :  { %v1811_v33 = vmul.f32 %v1809_v29, %v1809_v29 }
 0xb16   :  { %1814 = vadd.xlane.f32.xlu1 %v1811_v33 }
 0xb9b   :  { %v1813_v34 = vpop.xlane.xlu0 %1812 }
 0xb9c   :  { %v1816_v35 = vmul.f32 0.0078125, %v1813_v34 }
 0xb9e   :  { %v1818_v36 = vadd.f32 1e-12, %v1816_v35 }
 0xb9f   :  { %v1815_v37 = vpop.xlane.xlu1 %1814 }
 0xba0   :  { %2302 = vrsqrt.f32 %v1818_v36  ;;  %v1817_v59 = vmul.f32 0.0078125, %v1815_v37 }
 0xba2   :  { %v1819_v38 = vadd.f32 1e-12, %v1817_v59 }
 0xba4   :  { %2304 = vrsqrt.f32 %v1819_v38 }
 0xbad   :  { %v2303_v60 = vpop.eup %2302 }
 0xbae   :  { %v1822_v40 = vmul.f32 %v2303_v60, %v1808_v25 }
 0xbb0   :  { %v1830_v44 = vmul.f32 %v1960_v39, %v1822_v40 }
 0xbb1   :  { %v2305_v45 = vpop.eup %2304 }
 0xbb2   :  { %v1838_v32 = vadd.f32 %v1961_v43, %v1830_v44  ;;  %v1823_v31 = vmul.f32 %v2305_v45, %v1809_v29 }
 0xbb4   :  { %1840 = vst [vmem:[%s2986_s14] sm:$0xff] %v1838_v32  ;;  %v1831_v50 = vmul.f32 %v1960_v39, %v1823_v31 }
 0xbb6   :  { %v1839_v47 = vadd.f32 %v1961_v43, %v1831_v50 }
 0xbb8   :  { %1841 = vst [vmem:[%s2986_s14 + $0x8] sm:$0xff] %v1839_v47 }
 0xbb9   :  { %1846 = vsyncpa [#allocation4], 1 }
 0xbba   :  { %1847 = vsyncpa [#allocation6], 1 }
 0xbbb   :  { %1848 = vsyncpa [#allocation9], 1 }
 0xbbc   :  { %1849 = vsyncpa [#allocation12], 1 }
 0xbbd   :  { %1850 = vsyncpa [#allocation15], 1 }
 0xbbe   :  { %1851 = vsyncpa [#allocation18], 1 }

// kernel: bert_classifier_forward.6
= control target key start
LH: loop header
LB: loop body
LE: loop exit
PB: predicated region body
PF: predicated region fallthrough
CT: control target
= control target key end

     0   :  { %v2153_v1 = vmov 0   ;;  %v2154_v2 = vmov 0.0   ;;  %vm2155_vm0 = vmmov 0   ;;  %v86_v29 = vlaneseq  ;;  %s2156_s17 = smov 64   ;;  %s2750_s2 = inlined_call_operand.vmem [shape: bf16[128,384], index: 2, kind: input, shape index: {}]   ;;  %s2751_s0 = inlined_call_operand.vmem [shape: f32[16,128], index: 0, kind: input, shape index: {}]   ;;  %s2752_s3 = inlined_call_operand.vmem [shape: f32[1,384], index: 3, kind: input, shape index: {}]   ;;  %s2753_s1 = inlined_call_operand.vmem [shape: f32[2,8], index: 1, kind: input, shape index: {}]   ;;  %s2754_s4 = inlined_call_operand.vmem [shape: bf16[128,128], index: 4, kind: input, shape index: {}]   ;;  %s2755_s5 = inlined_call_operand.vmem [shape: f32[1,128], index: 5, kind: input, shape index: {}]   ;;  %s2756_s8 = inlined_call_operand.vmem [shape: bf16[128,512], index: 8, kind: input, shape index: {}]   ;;  %s2757_s6 = inlined_call_operand.vmem [shape: f32[1,128], index: 6, kind: input, shape index: {}]   ;;  %s2758_s7 = inlined_call_operand.vmem [shape: f32[1,128], index: 7, kind: input, shape index: {}]   ;;  %s2759_s10 = inlined_call_operand.vmem [shape: bf16[512,128], index: 10, kind: input, shape index: {}]   ;;  %s2760_s9 = inlined_call_operand.vmem [shape: f32[1,512], index: 9, kind: input, shape index: {}]   ;;  %s2761_s11 = inlined_call_operand.vmem [shape: f32[1,128], index: 11, kind: input, shape index: {}]   ;;  %s2762_s12 = inlined_call_operand.vmem [shape: f32[1,128], index: 12, kind: input, shape index: {}]   ;;  %s2763_s13 = inlined_call_operand.vmem [shape: f32[1,128], index: 13, kind: input, shape index: {}]   ;;  %s2764_s14 = inlined_call_operand.vmem [shape: f32[16,128], index: 14, kind: output, shape index: {}]  }
   0x1   :  { %v1993_v0 = vld [vmem:[%s2750_s2 + $0xac] ss:$12 sps:$4 sm:$0xff]   ;;  %261 = vmatprep.mubr.bf16.mxu0 %v2153_v1  ;;  %1901 = vmatprep.subr.bf16.mxu1 %v2154_v2  ;;  %v1995_v3 = vld [vmem:[%s2750_s2 + $0xa8] ss:$12 sps:$4 sm:$0xff]   ;;  %v1998_v5 = vld [vmem:[%s2750_s2 + $0x90] ss:$12 sps:$4 sm:$0xff]  }
   0x2   :  { %229 = vmatprep.subr.bf16.mxu0 %v1993_v0  ;;  %v1996_v4 = vld [vmem:[%s2750_s2 + $0x94] ss:$12 sps:$4 sm:$0xff]   ;;  %v1999_v6 = vld [vmem:[%s2750_s2 + $0x7c] ss:$12 sps:$4 sm:$0xff]   ;;  %v2001_v7 = vld [vmem:[%s2750_s2 + $0x78] ss:$12 sps:$4 sm:$0xff]   ;;  %1917 = vmatprep.mubr.msk.bf16.mxu1 %vm2155_vm0, %v2154_v2 }
   0x3   :  { %230 = vmatpush1.bf16.msra.mxu0 %v1995_v3  ;;  %v2002_v8 = vld [vmem:[%s2750_s2 + $0x64] ss:$12 sps:$4 sm:$0xff]   ;;  %v2004_v9 = vld [vmem:[%s2750_s2 + $0x60] ss:$12 sps:$4 sm:$0xff]   ;;  %v2007_v13 = vld [vmem:[%s2750_s2 + $0x48] ss:$12 sps:$4 sm:$0xff]  }
   0x4   :  { %231 = vmatprep.subr.bf16.mxu0 %v1996_v4  ;;  %v2005_v10 = vld [vmem:[%s2750_s2 + $0x4c] ss:$12 sps:$4 sm:$0xff]   ;;  %v2017_v11 = vld [vmem:[%s2750_s2 + $0xb0] ss:$12 sps:$4 sm:$0xff]   ;;  %v2008_v14 = vld [vmem:[%s2750_s2 + $0x34] ss:$12 sps:$4 sm:$0xff]  }
   0x5   :  { %1902 = vmatpush3.bf16.msra.mxu1 %v2017_v11  ;;  %v2018_v12 = vld [vmem:[%s2750_s2 + $0x98] ss:$12 sps:$4 sm:$0xff]   ;;  %v2019_v15 = vld [vmem:[%s2750_s2 + $0x80] ss:$12 sps:$4 sm:$0xff]   ;;  %v2010_v16 = vld [vmem:[%s2750_s2 + $0x30] ss:$12 sps:$4 sm:$0xff]  }
   0x6   :  { %1903 = vmatprep.subr.bf16.mxu1 %v2154_v2  ;;  %v2011_v17 = vld [vmem:[%s2750_s2 + $0x1c] ss:$12 sps:$4 sm:$0xff]   ;;  %v2013_v19 = vld [vmem:[%s2750_s2 + $0x18] ss:$12 sps:$4 sm:$0xff]   ;;  %v2016_v22 = vld [vmem:[%s2750_s2] ss:$12 sps:$4 sm:$0xff]  }
   0x7   :  { %232 = vmatpush1.bf16.msra.mxu0 %v1998_v5  ;;  %v2020_v18 = vld [vmem:[%s2750_s2 + $0x68] ss:$12 sps:$4 sm:$0xff]   ;;  %v2014_v20 = vld [vmem:[%s2750_s2 + $0x4] ss:$12 sps:$4 sm:$0xff]   ;;  %v2023_v27 = vld [vmem:[%s2750_s2 + $0x20] ss:$12 sps:$4 sm:$0xff]  }
   0x8   :  { %233 = vmatprep.subr.bf16.mxu0 %v1999_v6  ;;  %v2021_v21 = vld [vmem:[%s2750_s2 + $0x50] ss:$12 sps:$4 sm:$0xff]   ;;  %v2303_v23 = vld [vmem:[%s2751_s0] sm:$0xff]  ;;  %v2308_v24 = vld [vmem:[%s2751_s0 + $0x8] sm:$0xff]  ;;  %v2333_v30 = vshrl.u32 %v86_v29, 7  ;;  %vm316_vm1 = vcmask 523264  }
   0x9   :  { %1904 = vmatpush3.bf16.msra.mxu1 %v2018_v12  ;;  %v51_v25 = vpack.c.bf16 %v2308_v24, %v2303_v23  ;;  %v2022_v26 = vld [vmem:[%s2750_s2 + $0x38] ss:$12 sps:$4 sm:$0xff]   ;;  %v2024_v28 = vld [vmem:[%s2750_s2 + $0x8] ss:$12 sps:$4 sm:$0xff]   ;;  %v84_v33 = vld [vmem:[%s2752_s3] sm:$0x7] }
   0xa   :  { %1905 = vmatprep.subr.bf16.mxu1 %v2154_v2  ;;  %v2336_v31 = vsub.s32 1, %v2333_v30  ;;  %v2339_v32 = vsub.s32 0, %v2333_v30  ;;  %v96_v50 = vsub.s32 2, %v2333_v30  ;;  %vm385_vm2 = vcmask 1043456   ;;  %v50_v60 = vld [vmem:[%s2753_s1] sm:$0x3] }
   0xb   :  { %234 = vmatpush1.bf16.msra.mxu0 %v2001_v7  ;;  %vm369_vm3 = vcmask 64512   ;;  %vm549_vm4 = vcmask 1048064  }
   0xc   :  { %235 = vmatprep.subr.bf16.mxu0 %v2002_v8  ;;  %v93_v34 = vrot.slane %v84_v33, %v2336_v31  ;;  %v89_v36 = vrot.slane %v84_v33, %v2339_v32  ;;  %v97_v51 = vrot.slane %v84_v33, %v96_v50  ;;  %v2370_v61 = vrot.slane %v50_v60, %v2339_v32 }
   0xd   :  { %1906 = vmatpush3.bf16.msra.mxu1 %v2019_v15 }
   0xe   :  { %1907 = vmatprep.subr.bf16.mxu1 %v2154_v2 }
   0xf   :  { %236 = vmatpush1.bf16.msra.mxu0 %v2004_v9 }
  0x10   :  { %237 = vmatprep.subr.bf16.mxu0 %v2005_v10 }
  0x11   :  { %1908 = vmatpush3.bf16.msra.mxu1 %v2020_v18 }
  0x12   :  { %1909 = vmatprep.subr.bf16.mxu1 %v2154_v2 }
  0x13   :  { %238 = vmatpush1.bf16.msra.mxu0 %v2007_v13 }
  0x14   :  { %239 = vmatprep.subr.bf16.mxu0 %v2008_v14 }
  0x15   :  { %1910 = vmatpush3.bf16.msra.mxu1 %v2021_v21 }
  0x16   :  { %1911 = vmatprep.subr.bf16.mxu1 %v2154_v2 }
  0x17   :  { %240 = vmatpush1.bf16.msra.mxu0 %v2010_v16 }
  0x18   :  { %241 = vmatprep.subr.bf16.mxu0 %v2011_v17  ;;  %v604_v17 = vrot.slane %v50_v60, %v2336_v31 }
  0x19   :  { %1912 = vmatpush3.bf16.msra.mxu1 %v2022_v26 }
  0x1a   :  { %1913 = vmatprep.subr.bf16.mxu1 %v2154_v2 }
  0x1b   :  { %242 = vmatpush1.bf16.msra.mxu0 %v2013_v19 }
  0x1c   :  { %243 = vmatprep.subr.bf16.mxu0 %v2014_v20 }
  0x1d   :  { %1914 = vmatpush3.bf16.msra.mxu1 %v2023_v27 }
  0x1e   :  { %1915 = vmatprep.subr.bf16.mxu1 %v2154_v2 }
  0x1f   :  { %244 = vmatpush1.bf16.msra.mxu0 %v2016_v22 }
  0x20   :  { %1945 = vmatprep.subr.bf16.mxu0 %v2154_v2 }
  0x21   :  { %1916 = vmatpush3.bf16.msra.mxu1 %v2024_v28 }
  0x22   :  { %262 = vmatmul.mubr.bf16.vlgmr.msra.gmra.mxu0 %v51_v25  ;;  %1921 = vmatprep.subr.bf16.mxu1 %v2154_v2 }
  0x23   :  { %1947 = vmatprep.mubr.msk.bf16.mxu0 %vm2155_vm0, %v2154_v2 }
  0x24   :  { %1918 = vmatmul.mubr.bf16.vlgmr.msra.gmra.mxu1 %v51_v25 }
  0x25   :  { %1923 = vmatprep.mubr.msk.bf16.mxu1 %vm2155_vm0, %v2154_v2 }
  0xe2   :  { %v263_v35 = vpop.f32.mrf.mxu0 }
  0xe3   :  { %v264_v40 = vadd.f32 %v263_v35, %v89_v36 }
  0xe4   :  { %v265_v37 = vpop.f32.mrf.mxu0  ;;  %v306_v52 = vpop.f32.mrf.mxu1 }
  0xe5   :  { %v266_v38 = vadd.f32 %v265_v37, %v93_v34  ;;  %v313_v45 = vpack.c.bf16 %v264_v40, %v264_v40  ;;  %v307_v53 = vadd.f32 %v306_v52, %v97_v51 }
  0xe6   :  { %v267_v39 = vpop.f32.mrf.mxu0  ;;  %v1919_v54 = vpop.f32.mrf.mxu1 }
  0xe7   :  { %v314_v41 = vpack.c.bf16 %v266_v38, %v266_v38  ;;  %v268_v46 = vadd.f32 %v267_v39, %v89_v36  ;;  %v315_v55 = vpack.c.bf16 %v307_v53, %v307_v53 }
  0xe8   :  { %v269_v42 = vpop.f32.mrf.mxu0  ;;  %v309_v56 = vpop.f32.mrf.mxu1 }
  0xe9   :  { %v321_v43 = vsel %vm316_vm1, %v314_v41, 0  ;;  %v270_v44 = vadd.f32 %v269_v42, %v93_v34  ;;  %434 = vrot.lane.b32.xlu1 %v314_v41, %s2156_s17  ;;  %v551_v49 = vpack.c.bf16 %v268_v46, %v268_v46  ;;  %v387_v57 = vsel %vm385_vm2, %v315_v55, 0 }
  0xea   :  { %1922 = vmatpush3.bf16.xpose.msra.mxu1 %v321_v43  ;;  %v2363_v58 = vadd.f32 %v309_v56, %v97_v51  ;;  %v1920_v59 = vpop.f32.mrf.mxu1 }
  0xeb   :  { %v552_v47 = vpack.c.bf16 %v270_v44, %v270_v44  ;;  %1927 = vmatprep.subr.bf16.mxu1 %v2154_v2 }
  0xed   :  { %v558_v48 = vsel %vm316_vm1, %v552_v47, 0  ;;  %431 = vrot.lane.b32.xlu1 %v313_v45, %s2156_s17 }
  0xee   :  { %1946 = vmatpush3.bf16.xpose.msra.mxu0 %v558_v48 }
  0xef   :  { %1957 = vmatprep.subr.bf16.mxu0 %v2154_v2 }
  0xf1   :  { %666 = vrot.lane.b32.xlu1 %v551_v49, %s2156_s17  ;;  %1924 = vmatmul.mubr.msk.bf16.vlgmr.msra.gmra.mxu1 %vm316_vm1, %v313_v45 }
  0xf2   :  { %1929 = vmatprep.mubr.msk.bf16.mxu1 %vm2155_vm0, %v2154_v2  ;;  %1928 = vmatpush3.bf16.msra.mxu1 %v387_v57 }
  0xf3   :  { %1933 = vmatprep.subr.bf16.mxu1 %v2154_v2 }
  0xf5   :  { %1948 = vmatmul.mubr.msk.bf16.vlgmr.msra.gmra.mxu0 %vm316_vm1, %v551_v49 }
  0xf6   :  { %1959 = vmatprep.mubr.msk.bf16.mxu0 %vm2155_vm0, %v2154_v2 }
 0x15b   :  { %v435_v20 = vpop.permute.xlu1 %434 }
 0x15c   :  { %v440_v34 = vsel %vm316_vm1, %v435_v20, 0 }
 0x15f   :  { %v432_v26 = vpop.permute.xlu1 %431 }
 0x163   :  { %v667_v27 = vpop.permute.xlu1 %666 }
 0x1b1   :  { %v357_v62 = vpop.f32.mrf.mxu1 }
 0x1b2   :  { %v363_v63 = vmul.f32 0.125, %v357_v62 }
 0x1b3   :  { %v1925_v0 = vpop.f32.mrf.mxu1 }
 0x1b4   :  { %v368_v3 = vadd.f32 %v2370_v61, %v363_v63 }
 0x1b5   :  { %v360_v4 = vpop.f32.mrf.mxu1  ;;  %v594_v5 = vpop.f32.mrf.mxu0 }
 0x1b6   :  { %v370_v6 = vsel %vm369_vm3, %v368_v3, -inf  ;;  %v600_v16 = vmul.f32 0.125, %v594_v5 }
 0x1b7   :  { %v1949_v7 = vpop.f32.mrf.mxu0  ;;  %371 = vmax.xlane.f32.xlu0 %v370_v6  ;;  %v1926_v8 = vpop.f32.mrf.mxu1 }
 0x1b8   :  { %v605_v18 = vadd.f32 %v604_v17, %v600_v16 }
 0x1b9   :  { %v597_v9 = vpop.f32.mrf.mxu0 }
 0x1ba   :  { %v606_v19 = vsel %vm369_vm3, %v605_v18, -inf }
 0x1bb   :  { %v1950_v10 = vpop.f32.mrf.mxu0 }
 0x1bc   :  { %v553_v10 = vpack.c.bf16 %v2363_v58, %v2363_v58 }
 0x240   :  { %v372_v11 = vpop.xlane.xlu0 %371 }
 0x241   :  { %v373_v12 = vsub.f32 %v368_v3, %v372_v11 }
 0x243   :  { %v374_v13 = vmul.f32 1.442695, %v373_v12 }
 0x245   :  { %2113 = vpow2.f32 %v374_v13 }
 0x252   :  { %v2114_v14 = vpop.eup %2113 }
 0x253   :  { %v376_v15 = vsel %vm369_vm3, %v2114_v14, 0.0 }
 0x254   :  { %377 = vadd.xlane.f32.xlu0 %v376_v15 }
 0x26a   :  { %669 = vrot.lane.b32.xlu0 %v552_v47, %s2156_s17 }
 0x289   :  { %607 = vmax.xlane.f32.xlu0 %v606_v19 }
 0x29f   :  { %497 = vrot.lane.b32.xlu0 %v315_v55, %s2156_s17 }
 0x2dd   :  { %v378_v21 = vpop.xlane.xlu0 %377 }
 0x2de   :  { %2115 = vrcp.f32 %v378_v21 }
 0x2e1   :  { %v670_v22 = vpop.permute.xlu0 %669 }
 0x2e2   :  { %v675_v25 = vsel %vm316_vm1, %v670_v22, 0 }
 0x2e3   :  { %1958 = vmatpush3.bf16.xpose.msra.mxu0 %v675_v25 }
 0x2e4   :  { %1969 = vmatprep.subr.bf16.mxu0 %v2154_v2 }
 0x2ea   :  { %1960 = vmatmul.mubr.msk.bf16.vlgmr.msra.gmra.mxu0 %vm316_vm1, %v667_v27  ;;  %v2025_v27 = vld [vmem:[%s2754_s4 + $0x38] sm:$0xff]  }
 0x2eb   :  { %v2116_v28 = vpop.eup %2115  ;;  %1985 = vmatprep.mubr.msk.bf16.mxu0 %vm2155_vm0, %v2154_v2  ;;  %1970 = vmatpush3.bf16.msra.mxu0 %v2025_v27  ;;  %v2057_v27 = vld [vmem:[%s2756_s8 + $0x60] ss:$16 sps:$4 sm:$0xff]  }
 0x2ec   :  { %v380_v29 = vmul.f32 %v2116_v28, %v2114_v14  ;;  %v2026_v28 = vld [vmem:[%s2754_s4 + $0x30] sm:$0xff]   ;;  %1971 = vmatprep.subr.bf16.mxu0 %v2154_v2 }
 0x2ee   :  { %v381_v33 = vpack.c.bf16 %v380_v29, %v380_v29  ;;  %v2027_v29 = vld [vmem:[%s2754_s4 + $0x28] sm:$0xff]  }
 0x2ef   :  { %1972 = vmatpush3.bf16.msra.mxu0 %v2026_v28  ;;  %v2060_v28 = vld [vmem:[%s2756_s8 + $0x68] ss:$16 sps:$4 sm:$0xff]  }
 0x2f0   :  { %1930 = vmatmul.mubr.msk.bf16.vlgmr.msra.gmra.mxu1 %vm369_vm3, %v381_v33  ;;  %1973 = vmatprep.subr.bf16.mxu0 %v2154_v2  ;;  %v2028_v33 = vld [vmem:[%s2754_s4 + $0x20] sm:$0xff]  }
 0x2f1   :  { %1934 = vmatpush3.bf16.xpose.msra.mxu1 %v440_v34  ;;  %1935 = vmatprep.mubr.msk.bf16.mxu1 %vm2155_vm0, %v2154_v2  ;;  %v2029_v34 = vld [vmem:[%s2754_s4 + $0x18] sm:$0xff]  }
 0x2f2   :  { %1939 = vmatprep.subr.bf16.mxu1 %v2154_v2 }
 0x2f3   :  { %1974 = vmatpush3.bf16.msra.mxu0 %v2027_v29  ;;  %v2065_v29 = vld [vmem:[%s2756_s8 + $0x44] ss:$16 sps:$4 sm:$0xff]  }
 0x2f4   :  { %1975 = vmatprep.subr.bf16.mxu0 %v2154_v2 }
 0x2f7   :  { %1976 = vmatpush3.bf16.msra.mxu0 %v2028_v33  ;;  %v2068_v33 = vld [vmem:[%s2756_s8 + $0x4c] ss:$16 sps:$4 sm:$0xff]  }
 0x2f8   :  { %1936 = vmatmul.mubr.msk.bf16.vlgmr.msra.gmra.mxu1 %vm316_vm1, %v432_v26  ;;  %1977 = vmatprep.subr.bf16.mxu0 %v2154_v2 }
 0x2f9   :  { %1941 = vmatprep.mubr.msk.bf16.mxu1 %vm2155_vm0, %v2154_v2 }
 0x2fb   :  { %1978 = vmatpush3.bf16.msra.mxu0 %v2029_v34  ;;  %v2063_v34 = vld [vmem:[%s2756_s8 + $0x40] ss:$16 sps:$4 sm:$0xff]  }
 0x2fc   :  { %1979 = vmatprep.subr.bf16.mxu0 %v2154_v2 }
 0x312   :  { %v608_v35 = vpop.xlane.xlu0 %607 }
 0x313   :  { %v609_v57 = vsub.f32 %v605_v18, %v608_v35  ;;  %v622_v18 = vsel %vm385_vm2, %v553_v10, 0  ;;  %v2030_v35 = vld [vmem:[%s2754_s4 + $0x10] sm:$0xff]  }
 0x314   :  { %1980 = vmatpush3.bf16.msra.mxu0 %v2030_v35  ;;  %v2066_v35 = vld [vmem:[%s2756_s8 + $0x48] ss:$16 sps:$4 sm:$0xff]  }
 0x315   :  { %v610_v62 = vmul.f32 1.442695, %v609_v57  ;;  %1981 = vmatprep.subr.bf16.mxu0 %v2154_v2 }
 0x316   :  { %v498_v36 = vpop.permute.xlu0 %497 }
 0x317   :  { %v503_v37 = vsel %vm385_vm2, %v498_v36, 0 }
 0x318   :  { %1940 = vmatpush3.bf16.msra.mxu1 %v503_v37 }
 0x319   :  { %1951 = vmatprep.subr.bf16.mxu1 %v2154_v2 }
 0x3aa   :  { %v711_v38 = vpop.f32.mrf.mxu0 }
 0x3ab   :  { %v717_v47 = vmul.f32 0.125, %v711_v38 }
 0x3ac   :  { %v1961_v39 = vpop.f32.mrf.mxu0 }
 0x3ad   :  { %v718_v54 = vadd.f32 %v717_v47, %v604_v17  ;;  %v2031_v39 = vld [vmem:[%s2754_s4 + $0x8] sm:$0xff]  }
 0x3ae   :  { %v714_v40 = vpop.f32.mrf.mxu0  ;;  %1982 = vmatpush3.bf16.msra.mxu0 %v2031_v39  ;;  %v2072_v39 = vld [vmem:[%s2756_s8 + $0x28] ss:$16 sps:$4 sm:$0xff]  }
 0x3af   :  { %v719_v56 = vsel %vm369_vm3, %v718_v54, -inf  ;;  %1983 = vmatprep.subr.bf16.mxu0 %v2154_v2 }
 0x3b0   :  { %v423_v41 = vpop.f32.mrf.mxu1  ;;  %v1962_v42 = vpop.f32.mrf.mxu0 }
 0x3b1   :  { %429 = vst.msk [vmem:[#allocation2] sm:$0xff] %vm316_vm1, %v423_v41  ;;  %v2032_v41 = vld [vmem:[%s2754_s4] sm:$0xff]  }
 0x3b2   :  { %v1931_v43 = vpop.f32.mrf.mxu1  ;;  %1984 = vmatpush3.bf16.msra.mxu0 %v2032_v41  ;;  %v2080_v41 = vld [vmem:[%s2756_s8 + $0xc] ss:$16 sps:$4 sm:$0xff]  }
 0x3b4   :  { %v426_v44 = vpop.f32.mrf.mxu1 }
 0x3b6   :  { %v1932_v45 = vpop.f32.mrf.mxu1 }
 0x3b8   :  { %v476_v46 = vpop.f32.mrf.mxu1 }
 0x3b9   :  { %v482_v48 = vmul.f32 0.125, %v476_v46 }
 0x3ba   :  { %v1937_v49 = vpop.f32.mrf.mxu1 }
 0x3bb   :  { %v483_v51 = vadd.f32 %v482_v48, %v2370_v61 }
 0x3bc   :  { %v479_v52 = vpop.f32.mrf.mxu1 }
 0x3bd   :  { %v484_v53 = vsel %vm369_vm3, %v483_v51, -inf }
 0x3be   :  { %485 = vmax.xlane.f32.xlu1 %v484_v53  ;;  %v1938_v55 = vpop.f32.mrf.mxu1 }
 0x3bf   :  { %v1745_v55 = vld [vmem:[%s2755_s5] ss:$0 sm:$0xff] }
 0x3c2   :  { %720 = vmax.xlane.f32.xlu1 %v719_v56 }
 0x447   :  { %v486_v59 = vpop.xlane.xlu1 %485 }
 0x448   :  { %v487_v60 = vsub.f32 %v483_v51, %v486_v59 }
 0x44a   :  { %v488_v63 = vmul.f32 1.442695, %v487_v60 }
 0x44b   :  { %v721_v0 = vpop.xlane.xlu1 %720 }
 0x44c   :  { %2117 = vpow2.f32 %v488_v63  ;;  %v722_v3 = vsub.f32 %v718_v54, %v721_v0 }
 0x44d   :  { %2119 = vpow2.f32 %v610_v62 }
 0x44e   :  { %v723_v4 = vmul.f32 1.442695, %v722_v3 }
 0x450   :  { %2121 = vpow2.f32 %v723_v4  ;;  %v2035_v4 = vld [vmem:[%s2756_s8 + $0xe4] ss:$16 sps:$4 sm:$0xff]  }
 0x459   :  { %v2118_v61 = vpop.eup %2117 }
 0x45a   :  { %v490_v5 = vsel %vm369_vm3, %v2118_v61, 0.0  ;;  %v2120_v6 = vpop.eup %2119 }
 0x45b   :  { %491 = vadd.xlane.f32.xlu1 %v490_v5  ;;  %v612_v7 = vsel %vm369_vm3, %v2120_v6, 0.0 }
 0x45d   :  { %v2122_v8 = vpop.eup %2121 }
 0x45e   :  { %v725_v9 = vsel %vm369_vm3, %v2122_v8, 0.0 }
 0x45f   :  { %613 = vadd.xlane.f32.xlu1 %v612_v7 }
 0x463   :  { %726 = vadd.xlane.f32.xlu1 %v725_v9 }
 0x474   :  { %732 = vrot.lane.b32.xlu1 %v553_v10, %s2156_s17 }
 0x4e4   :  { %v492_v11 = vpop.xlane.xlu1 %491 }
 0x4e5   :  { %2123 = vrcp.f32 %v492_v11 }
 0x4e8   :  { %v614_v12 = vpop.xlane.xlu1 %613 }
 0x4e9   :  { %2125 = vrcp.f32 %v614_v12  ;;  %v2041_v12 = vld [vmem:[%s2756_s8 + $0xc4] ss:$16 sps:$4 sm:$0xff]  }
 0x4ec   :  { %v727_v13 = vpop.xlane.xlu1 %726 }
 0x4ed   :  { %2127 = vrcp.f32 %v727_v13  ;;  %v2044_v13 = vld [vmem:[%s2756_s8 + $0xcc] ss:$16 sps:$4 sm:$0xff]  }
 0x4f0   :  { %v733_v19 = vpop.permute.xlu1 %732 }
 0x4f1   :  { %v738_v22 = vsel %vm385_vm2, %v733_v19, 0  ;;  %v2051_v19 = vld [vmem:[%s2756_s8 + $0x80] ss:$16 sps:$4 sm:$0xff]  }
 0x4f2   :  { %v2124_v14 = vpop.eup %2123 }
 0x4f3   :  { %v494_v15 = vmul.f32 %v2124_v14, %v2118_v61  ;;  %v2036_v61 = vld [vmem:[%s2756_s8 + $0xe8] ss:$16 sps:$4 sm:$0xff]   ;;  %v2039_v14 = vld [vmem:[%s2756_s8 + $0xc0] ss:$16 sps:$4 sm:$0xff]  }
 0x4f5   :  { %v495_v16 = vpack.c.bf16 %v494_v15, %v494_v15  ;;  %v2042_v15 = vld [vmem:[%s2756_s8 + $0xc8] ss:$16 sps:$4 sm:$0xff]  }
 0x4f6   :  { %v2126_v17 = vpop.eup %2125 }
 0x4f7   :  { %1942 = vmatmul.mubr.msk.bf16.vlgmr.msra.gmra.mxu1 %vm369_vm3, %v495_v16  ;;  %v616_v58 = vmul.f32 %v2126_v17, %v2120_v6  ;;  %v2047_v16 = vld [vmem:[%s2756_s8 + $0xa4] ss:$16 sps:$4 sm:$0xff]   ;;  %v2050_v17 = vld [vmem:[%s2756_s8 + $0xac] ss:$16 sps:$4 sm:$0xff]  }
 0x4f8   :  { %1952 = vmatpush3.bf16.msra.mxu1 %v622_v18  ;;  %1953 = vmatprep.mubr.msk.bf16.mxu1 %vm2155_vm0, %v2154_v2  ;;  %v2045_v18 = vld [vmem:[%s2756_s8 + $0xa0] ss:$16 sps:$4 sm:$0xff]  }
 0x4f9   :  { %1963 = vmatprep.subr.bf16.mxu1 %v2154_v2  ;;  %v617_v20 = vpack.c.bf16 %v616_v58, %v616_v58  ;;  %v2048_v58 = vld [vmem:[%s2756_s8 + $0xa8] ss:$16 sps:$4 sm:$0xff]  }
 0x4fa   :  { %v2128_v21 = vpop.eup %2127 }
 0x4fb   :  { %v729_v25 = vmul.f32 %v2128_v21, %v2122_v8  ;;  %v2054_v21 = vld [vmem:[%s2756_s8 + $0x88] ss:$16 sps:$4 sm:$0xff]  }
 0x4fd   :  { %v730_v26 = vpack.c.bf16 %v729_v25, %v729_v25  ;;  %v2059_v25 = vld [vmem:[%s2756_s8 + $0x64] ss:$16 sps:$4 sm:$0xff]  }
 0x4ff   :  { %1954 = vmatmul.mubr.msk.bf16.vlgmr.msra.gmra.mxu1 %vm369_vm3, %v617_v20  ;;  %v2053_v20 = vld [vmem:[%s2756_s8 + $0x84] ss:$16 sps:$4 sm:$0xff]  }
 0x500   :  { %1964 = vmatpush3.bf16.msra.mxu1 %v738_v22  ;;  %1965 = vmatprep.mubr.msk.bf16.mxu1 %vm2155_vm0, %v2154_v2  ;;  %v2056_v22 = vld [vmem:[%s2756_s8 + $0x8c] ss:$16 sps:$4 sm:$0xff]  }
 0x501   :  { %1158 = vmatprep.subr.bf16.mxu1 %v2035_v4  ;;  %v2085_v4 = vld [vmem:[%s2759_s10 + $0x70] sm:$0xff]  }
 0x507   :  { %1966 = vmatmul.mubr.msk.bf16.vlgmr.msra.gmra.mxu1 %vm369_vm3, %v730_v26  ;;  %v2062_v26 = vld [vmem:[%s2756_s8 + $0x6c] ss:$16 sps:$4 sm:$0xff]  }
 0x508   :  { %1190 = vmatprep.mubr.bf16.mxu1 %v2153_v1 }
 0x5b7   :  { %v539_v36 = vpop.f32.mrf.mxu1 }
 0x5b8   :  { %546 = vrot.lane.b32.xlu1 %v539_v36, %s2156_s17  ;;  %v2071_v36 = vld [vmem:[%s2756_s8 + $0x24] ss:$16 sps:$4 sm:$0xff]  }
 0x5b9   :  { %v1943_v37 = vpop.f32.mrf.mxu1 }
 0x5ba   :  { %v2074_v37 = vld [vmem:[%s2756_s8 + $0x2c] ss:$16 sps:$4 sm:$0xff]  }
 0x5bb   :  { %v542_v38 = vpop.f32.mrf.mxu1 }
 0x5bc   :  { %v2069_v38 = vld [vmem:[%s2756_s8 + $0x20] ss:$16 sps:$4 sm:$0xff]  }
 0x5bd   :  { %v1944_v40 = vpop.f32.mrf.mxu1 }
 0x5be   :  { %v2077_v40 = vld [vmem:[%s2756_s8 + $0x4] ss:$16 sps:$4 sm:$0xff]  }
 0x5bf   :  { %v658_v42 = vpop.f32.mrf.mxu1 }
 0x5c0   :  { %664 = vst.msk [vmem:[#allocation2 + $0x8] sm:$0xff] %vm316_vm1, %v658_v42  ;;  %v2075_v42 = vld [vmem:[%s2756_s8] ss:$16 sps:$4 sm:$0xff]  }
 0x5c1   :  { %v1955_v43 = vpop.f32.mrf.mxu1 }
 0x5c2   :  { %v2078_v43 = vld [vmem:[%s2756_s8 + $0x8] ss:$16 sps:$4 sm:$0xff]  }
 0x5c3   :  { %v661_v44 = vpop.f32.mrf.mxu1 }
 0x5c5   :  { %v1956_v45 = vpop.f32.mrf.mxu1 }
 0x5c7   :  { %v774_v46 = vpop.f32.mrf.mxu1 }
 0x5c8   :  { %781 = vrot.lane.b32.xlu0 %v774_v46, %s2156_s17 }
 0x5c9   :  { %v1967_v47 = vpop.f32.mrf.mxu1 }
 0x5cb   :  { %v777_v48 = vpop.f32.mrf.mxu1 }
 0x5cd   :  { %v1968_v49 = vpop.f32.mrf.mxu1 }
 0x62a   :  { %v547_v51 = vpop.permute.xlu1 %546 }
 0x62b   :  { %550 = vst.msk [vmem:[#allocation2] sm:$0xff] %vm549_vm4, %v547_v51 }
 0x632   :  { %v785_v53 = vld [vmem:[#allocation2] sm:$0xff] }
 0x63a   :  { %v782_v52 = vpop.permute.xlu0 %781 }
 0x63b   :  { %784 = vst.msk [vmem:[#allocation2 + $0x8] sm:$0xff] %vm549_vm4, %v782_v52 }
 0x642   :  { %v786_v2 = vld [vmem:[#allocation2 + $0x8] sm:$0xff] }
 0x643   :  { %v787_v54 = vpack.c.bf16 %v786_v2, %v785_v53  ;;  %v1754_v53 = vld [vmem:[%s2757_s6] ss:$0 sm:$0xff] }
 0x645   :  { %1986 = vmatmul.mubr.bf16.vlgmr.msra.gmra.mxu0 %v787_v54 }
 0x646   :  { %1233 = vmatprep.mubr.bf16.mxu0 %v2153_v1  ;;  %v2033_v1 = vld [vmem:[%s2756_s8 + $0xe0] ss:$16 sps:$4 sm:$0xff]  }
 0x647   :  { %1159 = vmatpush1.bf16.msra.mxu1 %v2033_v1  ;;  %v2084_v1 = vld [vmem:[%s2759_s10 + $0xb8] sm:$0xff]  }
 0x648   :  { %1160 = vmatprep.subr.bf16.mxu1 %v2041_v12  ;;  %v2096_v12 = vld [vmem:[%s2759_s10 + $0xa0] sm:$0xff]  }
 0x64b   :  { %1161 = vmatpush1.bf16.msra.mxu1 %v2039_v14  ;;  %v2098_v14 = vld [vmem:[%s2759_s10 + $0xd8] sm:$0xff]  }
 0x64c   :  { %1162 = vmatprep.subr.bf16.mxu1 %v2047_v16  ;;  %v2100_v16 = vld [vmem:[%s2759_s10 + $0x98] sm:$0xff]  }
 0x64f   :  { %1163 = vmatpush1.bf16.msra.mxu1 %v2045_v18  ;;  %v2102_v18 = vld [vmem:[%s2759_s10 + $0xd0] sm:$0xff]  }
 0x650   :  { %1164 = vmatprep.subr.bf16.mxu1 %v2053_v20  ;;  %v2105_v20 = vld [vmem:[%s2759_s10 + $0x48] sm:$0xff]  }
 0x653   :  { %1165 = vmatpush1.bf16.msra.mxu1 %v2051_v19  ;;  %v2104_v19 = vld [vmem:[%s2759_s10 + $0x90] sm:$0xff]  }
 0x654   :  { %1166 = vmatprep.subr.bf16.mxu1 %v2059_v25  ;;  %v2108_v25 = vld [vmem:[%s2759_s10 + $0x88] sm:$0xff]  }
 0x657   :  { %1167 = vmatpush1.bf16.msra.mxu1 %v2057_v27  ;;  %v2110_v27 = vld [vmem:[%s2759_s10 + $0xc0] sm:$0xff]  }
 0x658   :  { %1168 = vmatprep.subr.bf16.mxu1 %v2065_v29  ;;  %v2112_v29 = vld [vmem:[%s2759_s10 + $0x80] sm:$0xff]  }
 0x65b   :  { %1169 = vmatpush1.bf16.msra.mxu1 %v2063_v34  ;;  %v992_v34 = vsub.s32 3, %v2333_v30 }
 0x65c   :  { %1170 = vmatprep.subr.bf16.mxu1 %v2071_v36 }
 0x65f   :  { %1171 = vmatpush1.bf16.msra.mxu1 %v2069_v38 }
 0x660   :  { %1172 = vmatprep.subr.bf16.mxu1 %v2077_v40 }
 0x663   :  { %1173 = vmatpush1.bf16.msra.mxu1 %v2075_v42 }
 0x705   :  { %v893_v56 = vpop.f32.mrf.mxu0 }
 0x706   :  { %v894_v57 = vadd.f32 %v1745_v55, %v893_v56  ;;  %v1755_v56 = vld [vmem:[%s2758_s7] ss:$0 sm:$0xff] }
 0x707   :  { %v1987_v59 = vpop.f32.mrf.mxu0 }
 0x708   :  { %v900_v60 = vadd.f32 %v894_v57, %v2303_v23  ;;  %v2038_v23 = vld [vmem:[%s2756_s8 + $0xec] ss:$16 sps:$4 sm:$0xff]  }
 0x709   :  { %v896_v62 = vpop.f32.mrf.mxu0  ;;  %1201 = vmatprep.subr.bf16.mxu0 %v2038_v23  ;;  %v2087_v23 = vld [vmem:[%s2759_s10 + $0x30] sm:$0xff]  }
 0x70a   :  { %v897_v63 = vadd.f32 %v1745_v55, %v896_v62  ;;  %904 = vadd.xlane.f32.xlu1 %v900_v60  ;;  %1202 = vmatpush1.bf16.msra.mxu0 %v2036_v61  ;;  %v2086_v61 = vld [vmem:[%s2759_s10 + $0xf0] sm:$0xff]  }
 0x70b   :  { %v1988_v0 = vpop.f32.mrf.mxu0  ;;  %1203 = vmatprep.subr.bf16.mxu0 %v2044_v13  ;;  %v2097_v13 = vld [vmem:[%s2759_s10 + $0x58] sm:$0xff]  }
 0x70c   :  { %v901_v3 = vadd.f32 %v897_v63, %v2308_v24  ;;  %v2081_v63 = vld [vmem:[%s2759_s10 + $0x78] sm:$0xff]  }
 0x70d   :  { %v2082_v0 = vld [vmem:[%s2759_s10 + $0xf8] sm:$0xff]   ;;  %1857 = vmatprep.subr.bf16.mxu1 %v2081_v63 }
 0x70e   :  { %906 = vadd.xlane.f32.xlu0 %v901_v3  ;;  %1204 = vmatpush1.bf16.msra.mxu0 %v2042_v15  ;;  %v2099_v15 = vld [vmem:[%s2759_s10 + $0x18] sm:$0xff]  }
 0x70f   :  { %1205 = vmatprep.subr.bf16.mxu0 %v2050_v17  ;;  %v2101_v17 = vld [vmem:[%s2759_s10 + $0x50] sm:$0xff]  }
 0x712   :  { %1206 = vmatpush1.bf16.msra.mxu0 %v2048_v58  ;;  %v2103_v58 = vld [vmem:[%s2759_s10 + $0x10] sm:$0xff]  }
 0x713   :  { %1207 = vmatprep.subr.bf16.mxu0 %v2056_v22  ;;  %v2107_v22 = vld [vmem:[%s2759_s10 + $0x8] sm:$0xff]  }
 0x716   :  { %1208 = vmatpush1.bf16.msra.mxu0 %v2054_v21  ;;  %v2106_v21 = vld [vmem:[%s2759_s10 + $0xc8] sm:$0xff]  }
 0x717   :  { %1209 = vmatprep.subr.bf16.mxu0 %v2062_v26  ;;  %v2109_v26 = vld [vmem:[%s2759_s10 + $0x40] sm:$0xff]  }
 0x71a   :  { %1210 = vmatpush1.bf16.msra.mxu0 %v2060_v28  ;;  %v2111_v28 = vld [vmem:[%s2759_s10] sm:$0xff]  }
 0x71b   :  { %1211 = vmatprep.subr.bf16.mxu0 %v2068_v33  ;;  %v976_v33 = vld [vmem:[%s2760_s9] sm:$0xf] }
 0x71c   :  { %v989_v36 = vrot.slane %v976_v33, %v96_v50  ;;  %v993_v38 = vrot.slane %v976_v33, %v992_v34 }
 0x71e   :  { %1212 = vmatpush1.bf16.msra.mxu0 %v2066_v35  ;;  %v981_v35 = vrot.slane %v976_v33, %v2339_v32 }
 0x71f   :  { %1213 = vmatprep.subr.bf16.mxu0 %v2074_v37  ;;  %v985_v37 = vrot.slane %v976_v33, %v2336_v31 }
 0x722   :  { %1214 = vmatpush1.bf16.msra.mxu0 %v2072_v39 }
 0x723   :  { %1215 = vmatprep.subr.bf16.mxu0 %v2080_v41 }
 0x726   :  { %1216 = vmatpush1.bf16.msra.mxu0 %v2078_v43 }
 0x727   :  { %1879 = vmatprep.subr.bf16.mxu0 %v2082_v0 }
 0x793   :  { %v905_v24 = vpop.xlane.xlu1 %904 }
 0x794   :  { %v909_v5 = vmul.f32 0.0078125, %v905_v24  ;;  %v2088_v24 = vld [vmem:[%s2759_s10 + $0xb0] sm:$0xff]  }
 0x796   :  { %v2467_v6 = vsub.f32 %v900_v60, %v909_v5  ;;  %v2089_v5 = vld [vmem:[%s2759_s10 + $0x68] sm:$0xff]  }
 0x797   :  { %v907_v7 = vpop.xlane.xlu0 %906 }
 0x798   :  { %v910_v8 = vmul.f32 0.0078125, %v907_v7  ;;  %v913_v9 = vmul.f32 %v2467_v6, %v2467_v6  ;;  %v2091_v7 = vld [vmem:[%s2759_s10 + $0x28] sm:$0xff]  }
 0x79a   :  { %v2471_v10 = vsub.f32 %v901_v3, %v910_v8  ;;  %915 = vadd.xlane.f32.xlu0 %v913_v9  ;;  %v2083_v3 = vld [vmem:[%s2759_s10 + $0x38] sm:$0xff]   ;;  %v2092_v8 = vld [vmem:[%s2759_s10 + $0xa8] sm:$0xff]   ;;  %v2093_v9 = vld [vmem:[%s2759_s10 + $0x60] sm:$0xff]  }
 0x79c   :  { %v914_v11 = vmul.f32 %v2471_v10, %v2471_v10 }
 0x79e   :  { %917 = vadd.xlane.f32.xlu1 %v914_v11  ;;  %v2095_v11 = vld [vmem:[%s2759_s10 + $0x20] sm:$0xff]  }
 0x823   :  { %v916_v44 = vpop.xlane.xlu0 %915 }
 0x824   :  { %v919_v45 = vmul.f32 0.0078125, %v916_v44 }
 0x826   :  { %v921_v46 = vadd.f32 1e-12, %v919_v45 }
 0x827   :  { %v918_v47 = vpop.xlane.xlu1 %917 }
 0x828   :  { %2129 = vrsqrt.f32 %v921_v46  ;;  %v920_v48 = vmul.f32 0.0078125, %v918_v47 }
 0x82a   :  { %v922_v49 = vadd.f32 1e-12, %v920_v48 }
 0x82c   :  { %2131 = vrsqrt.f32 %v922_v49 }
 0x835   :  { %v2130_v51 = vpop.eup %2129 }
 0x836   :  { %v925_v52 = vmul.f32 %v2130_v51, %v2467_v6  ;;  %v2090_v6 = vld [vmem:[%s2759_s10 + $0xe8] sm:$0xff]  }
 0x838   :  { %v933_v55 = vmul.f32 %v1754_v53, %v925_v52 }
 0x839   :  { %v2132_v2 = vpop.eup %2131 }
 0x83a   :  { %v926_v54 = vmul.f32 %v2132_v2, %v2471_v10  ;;  %v2567_v59 = vadd.f32 %v1755_v56, %v933_v55  ;;  %v2094_v10 = vld [vmem:[%s2759_s10 + $0xe0] sm:$0xff]  }
 0x83c   :  { %v934_v57 = vmul.f32 %v1754_v53, %v926_v54 }
 0x83e   :  { %v2569_v60 = vadd.f32 %v1755_v56, %v934_v57 }
 0x840   :  { %v943_v62 = vpack.c.bf16 %v2569_v60, %v2567_v59 }
 0x842   :  { %1191 = vmatmul.mubr.bf16.vlgmr.msra.gmra.mxu1 %v943_v62  ;;  %1234 = vmatmul.mubr.bf16.vlgmr.msra.gmra.mxu0 %v943_v62 }
 0x843   :  { %1858 = vmatpush3.bf16.msra.mxu1 %v2083_v3  ;;  %1880 = vmatpush3.bf16.msra.mxu0 %v2084_v1 }
 0x844   :  { %1859 = vmatprep.subr.bf16.mxu1 %v2085_v4  ;;  %1881 = vmatprep.subr.bf16.mxu0 %v2086_v61 }
 0x847   :  { %1860 = vmatpush3.bf16.msra.mxu1 %v2087_v23  ;;  %1882 = vmatpush3.bf16.msra.mxu0 %v2088_v24 }
 0x848   :  { %1861 = vmatprep.subr.bf16.mxu1 %v2089_v5  ;;  %1883 = vmatprep.subr.bf16.mxu0 %v2090_v6 }
 0x84b   :  { %1862 = vmatpush3.bf16.msra.mxu1 %v2091_v7  ;;  %1884 = vmatpush3.bf16.msra.mxu0 %v2092_v8 }
 0x84c   :  { %1863 = vmatprep.subr.bf16.mxu1 %v2093_v9  ;;  %1885 = vmatprep.subr.bf16.mxu0 %v2094_v10 }
 0x84f   :  { %1864 = vmatpush3.bf16.msra.mxu1 %v2095_v11  ;;  %1886 = vmatpush3.bf16.msra.mxu0 %v2096_v12 }
 0x850   :  { %1865 = vmatprep.subr.bf16.mxu1 %v2097_v13  ;;  %1887 = vmatprep.subr.bf16.mxu0 %v2098_v14 }
 0x853   :  { %1866 = vmatpush3.bf16.msra.mxu1 %v2099_v15  ;;  %1888 = vmatpush3.bf16.msra.mxu0 %v2100_v16 }
 0x854   :  { %1867 = vmatprep.subr.bf16.mxu1 %v2101_v17  ;;  %1889 = vmatprep.subr.bf16.mxu0 %v2102_v18 }
 0x857   :  { %1868 = vmatpush3.bf16.msra.mxu1 %v2103_v58  ;;  %1890 = vmatpush3.bf16.msra.mxu0 %v2104_v19 }
 0x858   :  { %1869 = vmatprep.subr.bf16.mxu1 %v2105_v20  ;;  %1891 = vmatprep.subr.bf16.mxu0 %v2106_v21 }
 0x85b   :  { %1870 = vmatpush3.bf16.msra.mxu1 %v2107_v22  ;;  %1892 = vmatpush3.bf16.msra.mxu0 %v2108_v25 }
 0x85c   :  { %1871 = vmatprep.subr.bf16.mxu1 %v2109_v26  ;;  %1893 = vmatprep.subr.bf16.mxu0 %v2110_v27 }
 0x85f   :  { %1872 = vmatpush3.bf16.msra.mxu1 %v2111_v28  ;;  %1894 = vmatpush3.bf16.msra.mxu0 %v2112_v29 }
 0x902   :  { %v1192_v39 = vpop.f32.mrf.mxu1  ;;  %v1235_v40 = vpop.f32.mrf.mxu0 }
 0x903   :  { %v2677_v41 = vadd.f32 %v1192_v39, %v981_v35  ;;  %v2679_v42 = vadd.f32 %v1235_v40, %v989_v36 }
 0x904   :  { %v1194_v43 = vpop.f32.mrf.mxu1  ;;  %v1237_v44 = vpop.f32.mrf.mxu0 }
 0x905   :  { %v1244_v45 = vmul.f32 %v2677_v41, %v2677_v41  ;;  %v1246_v32 = vmul.f32 %v2679_v42, %v2679_v42  ;;  %v2685_v46 = vadd.f32 %v1194_v43, %v985_v37  ;;  %v2687_v30 = vadd.f32 %v1237_v44, %v993_v38 }
 0x906   :  { %v1196_v31 = vpop.f32.mrf.mxu1  ;;  %v1239_v50 = vpop.f32.mrf.mxu0 }
 0x907   :  { %v1252_v47 = vmul.f32 %v1244_v45, %v2677_v41  ;;  %v1254_v48 = vmul.f32 %v1246_v32, %v2679_v42  ;;  %v1245_v49 = vmul.f32 %v2685_v46, %v2685_v46  ;;  %v1247_v51 = vmul.f32 %v2687_v30, %v2687_v30 }
 0x908   :  { %v2695_v52 = vadd.f32 %v1196_v31, %v981_v35  ;;  %v2697_v53 = vadd.f32 %v1239_v50, %v989_v36  ;;  %v1198_v2 = vpop.f32.mrf.mxu1  ;;  %v1241_v54 = vpop.f32.mrf.mxu0 }
 0x909   :  { %v1260_v55 = vmul.f32 0.044715, %v1252_v47  ;;  %v1262_v56 = vmul.f32 0.044715, %v1254_v48  ;;  %v1253_v57 = vmul.f32 %v1245_v49, %v2685_v46  ;;  %v1255_v62 = vmul.f32 %v1247_v51, %v2687_v30 }
 0x90a   :  { %v1248_v63 = vmul.f32 %v2695_v52, %v2695_v52  ;;  %v1250_v0 = vmul.f32 %v2697_v53, %v2697_v53  ;;  %v2705_v3 = vadd.f32 %v1198_v2, %v985_v37  ;;  %v2707_v1 = vadd.f32 %v1241_v54, %v993_v38 }
 0x90b   :  { %v1268_v4 = vadd.f32 %v1260_v55, %v2677_v41  ;;  %v1270_v61 = vadd.f32 %v1262_v56, %v2679_v42  ;;  %v1261_v23 = vmul.f32 0.044715, %v1253_v57  ;;  %v1263_v24 = vmul.f32 0.044715, %v1255_v62 }
 0x90c   :  { %v1256_v5 = vmul.f32 %v1248_v63, %v2695_v52  ;;  %v1258_v6 = vmul.f32 %v1250_v0, %v2697_v53  ;;  %v1249_v7 = vmul.f32 %v2705_v3, %v2705_v3  ;;  %v1251_v8 = vmul.f32 %v2707_v1, %v2707_v1 }
 0x90d   :  { %v1276_v9 = vmul.f32 0.7978846, %v1268_v4  ;;  %v1278_v10 = vmul.f32 0.7978846, %v1270_v61  ;;  %v1269_v11 = vadd.f32 %v1261_v23, %v2685_v46  ;;  %v1271_v12 = vadd.f32 %v1263_v24, %v2687_v30 }
 0x90e   :  { %v1264_v13 = vmul.f32 0.044715, %v1256_v5  ;;  %v1266_v14 = vmul.f32 0.044715, %v1258_v6  ;;  %v1257_v15 = vmul.f32 %v1249_v7, %v2705_v3  ;;  %v1259_v16 = vmul.f32 %v1251_v8, %v2707_v1 }
 0x90f   :  { %2133 = vtanh.f32 %v1276_v9  ;;  %v1277_v17 = vmul.f32 0.7978846, %v1269_v11  ;;  %v1279_v18 = vmul.f32 0.7978846, %v1271_v12 }
 0x910   :  { %2135 = vtanh.f32 %v1278_v10  ;;  %v1272_v58 = vadd.f32 %v1264_v13, %v2695_v52  ;;  %v1274_v19 = vadd.f32 %v1266_v14, %v2697_v53  ;;  %v1265_v20 = vmul.f32 0.044715, %v1257_v15 }
 0x911   :  { %2137 = vtanh.f32 %v1277_v17  ;;  %v1267_v21 = vmul.f32 0.044715, %v1259_v16 }
 0x912   :  { %2139 = vtanh.f32 %v1279_v18  ;;  %v1280_v22 = vmul.f32 0.7978846, %v1272_v58  ;;  %v1282_v25 = vmul.f32 0.7978846, %v1274_v19  ;;  %v1273_v26 = vadd.f32 %v1265_v20, %v2705_v3 }
 0x913   :  { %v1275_v27 = vadd.f32 %v1267_v21, %v2707_v1 }
 0x914   :  { %2141 = vtanh.f32 %v1280_v22  ;;  %v1281_v28 = vmul.f32 0.7978846, %v1273_v26 }
 0x915   :  { %2143 = vtanh.f32 %v1282_v25  ;;  %v1283_v29 = vmul.f32 0.7978846, %v1275_v27 }
 0x916   :  { %2145 = vtanh.f32 %v1281_v28 }
 0x917   :  { %2147 = vtanh.f32 %v1283_v29 }
 0x91c   :  { %v2134_v33 = vpop.eup %2133 }
 0x91d   :  { %v2136_v34 = vpop.eup %2135  ;;  %v1292_v39 = vadd.f32 1.0, %v2134_v33 }
 0x91e   :  { %v2138_v35 = vpop.eup %2137  ;;  %v1294_v44 = vadd.f32 1.0, %v2136_v34 }
 0x91f   :  { %v2140_v36 = vpop.eup %2139  ;;  %v1293_v37 = vadd.f32 1.0, %v2138_v35  ;;  %v1300_v51 = vmul.f32 0.5, %v1292_v39  ;;  %v1821_v39 = vld [vmem:[%s2762_s12] ss:$0 sm:$0xff] }
 0x920   :  { %v1295_v40 = vadd.f32 1.0, %v2140_v36  ;;  %v1302_v56 = vmul.f32 0.5, %v1294_v44 }
 0x921   :  { %v2142_v38 = vpop.eup %2141  ;;  %v1301_v49 = vmul.f32 0.5, %v1293_v37  ;;  %v1308_v23 = vmul.f32 %v1300_v51, %v2677_v41  ;;  %v1788_v41 = vld [vmem:[%s2761_s11] ss:$0 sm:$0xff] }
 0x922   :  { %v2144_v43 = vpop.eup %2143  ;;  %v1296_v45 = vadd.f32 1.0, %v2142_v38  ;;  %v1303_v55 = vmul.f32 0.5, %v1295_v40  ;;  %v1310_v6 = vmul.f32 %v1302_v56, %v2679_v42 }
 0x923   :  { %v2146_v32 = vpop.eup %2145  ;;  %v1298_v31 = vadd.f32 1.0, %v2144_v43  ;;  %v1309_v4 = vmul.f32 %v1301_v49, %v2685_v46  ;;  %v1822_v43 = vld [vmem:[%s2763_s13] ss:$0 sm:$0xff] }
 0x924   :  { %v2148_v50 = vpop.eup %2147  ;;  %v1304_v47 = vmul.f32 0.5, %v1296_v45  ;;  %v1297_v48 = vadd.f32 1.0, %v2146_v32  ;;  %v1311_v24 = vmul.f32 %v1303_v55, %v2687_v30 }
 0x925   :  { %v1306_v2 = vmul.f32 0.5, %v1298_v31  ;;  %v1299_v54 = vadd.f32 1.0, %v2148_v50 }
 0x926   :  { %v1305_v57 = vmul.f32 0.5, %v1297_v48  ;;  %v1312_v62 = vmul.f32 %v1304_v47, %v2695_v52 }
 0x927   :  { %v1307_v63 = vmul.f32 0.5, %v1299_v54  ;;  %v1314_v0 = vmul.f32 %v1306_v2, %v2697_v53 }
 0x928   :  { %v1313_v61 = vmul.f32 %v1305_v57, %v2705_v3  ;;  %v1316_v9 = vpack.c.bf16 %v1312_v62, %v1308_v23 }
 0x929   :  { %v1315_v5 = vmul.f32 %v1307_v63, %v2707_v1  ;;  %v1318_v52 = vpack.c.bf16 %v1314_v0, %v1310_v6 }
 0x92a   :  { %v1317_v7 = vpack.c.bf16 %v1313_v61, %v1309_v4 }
 0x92b   :  { %v1319_v8 = vpack.c.bf16 %v1315_v5, %v1311_v24 }
 0x92c   :  { %1615 = vmatprep.mubr.bf16.mxu1 %v1317_v7 }
 0x92d   :  { %1656 = vmatprep.mubr.bf16.mxu0 %v1319_v8  ;;  %1616 = vmatmul.mubr.bf16.vlgmr.msra.gmra.mxu1 %v1316_v9 }
 0x92e   :  { %1657 = vmatmul.mubr.bf16.vlgmr.msra.gmra.mxu0 %v1318_v52 }
 0x9ed   :  { %v1873_v53 = vpop.f32.mrf.mxu1 }
 0x9ee   :  { %v1895_v46 = vpop.f32.mrf.mxu0 }
 0x9ef   :  { %v1874_v3 = vpop.f32.mrf.mxu1 }
 0x9f0   :  { %v1875_v30 = vadd.f32 %v1874_v3, %v1873_v53  ;;  %v1896_v10 = vpop.f32.mrf.mxu0 }
 0x9f1   :  { %v1876_v1 = vpop.f32.mrf.mxu1  ;;  %v1897_v42 = vadd.f32 %v1896_v10, %v1895_v46 }
 0x9f2   :  { %v1618_v11 = vadd.f32 %v1875_v30, %v1788_v41  ;;  %v1898_v12 = vpop.f32.mrf.mxu0 }
 0x9f3   :  { %v1877_v13 = vpop.f32.mrf.mxu1 }
 0x9f4   :  { %v1659_v14 = vadd.f32 %v1897_v42, %v1618_v11  ;;  %v1878_v15 = vadd.f32 %v1877_v13, %v1876_v1  ;;  %v1899_v16 = vpop.f32.mrf.mxu0 }
 0x9f5   :  { %v1900_v18 = vadd.f32 %v1899_v16, %v1898_v12 }
 0x9f6   :  { %v1621_v17 = vadd.f32 %v1878_v15, %v1788_v41  ;;  %v1665_v58 = vadd.f32 %v1659_v14, %v2567_v59 }
 0x9f8   :  { %v1662_v19 = vadd.f32 %v1900_v18, %v1621_v17  ;;  %1669 = vadd.xlane.f32.xlu0 %v1665_v58 }
 0x9fa   :  { %v1666_v20 = vadd.f32 %v1662_v19, %v2569_v60 }
 0x9fc   :  { %1671 = vadd.xlane.f32.xlu1 %v1666_v20 }
 0xa81   :  { %v1670_v21 = vpop.xlane.xlu0 %1669 }
 0xa82   :  { %v1673_v22 = vmul.f32 0.0078125, %v1670_v21 }
 0xa84   :  { %v1675_v25 = vsub.f32 %v1665_v58, %v1673_v22 }
 0xa85   :  { %v1672_v26 = vpop.xlane.xlu1 %1671 }
 0xa86   :  { %v1674_v27 = vmul.f32 0.0078125, %v1672_v26  ;;  %v1677_v28 = vmul.f32 %v1675_v25, %v1675_v25 }
 0xa88   :  { %v1676_v29 = vsub.f32 %v1666_v20, %v1674_v27  ;;  %1679 = vadd.xlane.f32.xlu0 %v1677_v28 }
 0xa8a   :  { %v1678_v33 = vmul.f32 %v1676_v29, %v1676_v29 }
 0xa8c   :  { %1681 = vadd.xlane.f32.xlu1 %v1678_v33 }
 0xb11   :  { %v1680_v34 = vpop.xlane.xlu0 %1679 }
 0xb12   :  { %v1683_v35 = vmul.f32 0.0078125, %v1680_v34 }
 0xb14   :  { %v1685_v36 = vadd.f32 1e-12, %v1683_v35 }
 0xb15   :  { %v1682_v37 = vpop.xlane.xlu1 %1681 }
 0xb16   :  { %2149 = vrsqrt.f32 %v1685_v36  ;;  %v1684_v59 = vmul.f32 0.0078125, %v1682_v37 }
 0xb18   :  { %v1686_v38 = vadd.f32 1e-12, %v1684_v59 }
 0xb1a   :  { %2151 = vrsqrt.f32 %v1686_v38 }
 0xb23   :  { %v2150_v60 = vpop.eup %2149 }
 0xb24   :  { %v1689_v40 = vmul.f32 %v2150_v60, %v1675_v25 }
 0xb26   :  { %v1697_v44 = vmul.f32 %v1821_v39, %v1689_v40 }
 0xb27   :  { %v2152_v45 = vpop.eup %2151 }
 0xb28   :  { %v1705_v32 = vadd.f32 %v1822_v43, %v1697_v44  ;;  %v1690_v31 = vmul.f32 %v2152_v45, %v1676_v29 }
 0xb2a   :  { %1707 = vst [vmem:[%s2764_s14] sm:$0xff] %v1705_v32  ;;  %v1698_v50 = vmul.f32 %v1821_v39, %v1690_v31 }
 0xb2c   :  { %v1706_v47 = vadd.f32 %v1822_v43, %v1698_v50 }
 0xb2e   :  { %1708 = vst [vmem:[%s2764_s14 + $0x8] sm:$0xff] %v1706_v47 }

</bundles_post_ra>
